<compile_context>
chip_gen: v7x
topology: tpu7x:2x2x1
jax: 0.10.0
libtpu: 0.0.40
codegen_flags: <defaults>
</compile_context>

<pallas_src>
import jax
import jax.numpy as jnp
from jax.experimental import pallas as pl
from jax.experimental.pallas import tpu as pltpu


def _round_up(x, m):
    return ((x + m - 1) // m) * m


def time_lstm_kernel(wgt_ref, x_ref, wx_ref, xbias_ref, wh_ref, wco_ref,
                     hs_ref, agg_ref, xproj_sc):
    """Single invocation: hoisted x-projection + serial time recurrence.

    Packing order (lane blocks of width Hp):
      x gates  : [i, f, T, c, o]   (5 blocks)
      h gates  : [i, f, c, o]      (4 blocks)
    xbias_ref[t] already contains bx (+ bh where applicable, + bco for the o
    gate) and the time terms sigmoid(Wtt(dt)) / Wto(dt).
    """
    G, U, E = x_ref.shape
    Hp = wco_ref.shape[0]
    cdt = wx_ref.dtype                        # MXU operand dtype (f32 or bf16)

    # ---- Stage 1 (hoisted, once): one big (G*U, E) @ (E, 5*Hp) matmul for all
    # x-dependent gate projections, with the per-step bias folded in and the
    # T-gate sigmoid pre-applied, so nothing of this remains on the serial
    # per-step critical path.
    x2 = x_ref[...].reshape(G * U, E)
    xproj_sc[...] = (
        jnp.dot(x2, wx_ref[...], preferred_element_type=jnp.float32)
        .reshape(G, U, 5 * Hp) + xbias_ref[...])
    xproj_sc[:, :, 2 * Hp:3 * Hp] = jax.nn.sigmoid(xproj_sc[:, :, 2 * Hp:3 * Hp])

    wh = wh_ref[...]                          # (Hp, 4*Hp) packed recurrent weights
    wco = wco_ref[...]                        # (Hp, Hp)

    # ---- Stage 2: serial recurrence; only the 2 h/c-dependent matmuls and the
    # gate nonlinearities remain per step.
    def step_fn(t, carry):
        h, c = carry                                        # h: cdt, c: f32
        xg = xproj_sc[t]                                    # (U, 5*Hp) f32, bias folded
        hg = jnp.dot(h, wh, preferred_element_type=jnp.float32)   # (U, 4*Hp)

        i_t = jax.nn.sigmoid(xg[:, 0 * Hp:1 * Hp] + hg[:, 0 * Hp:1 * Hp])
        f_t = jax.nn.sigmoid(xg[:, 1 * Hp:2 * Hp] + hg[:, 1 * Hp:2 * Hp])
        T_t = xg[:, 2 * Hp:3 * Hp]                          # sigmoid already applied
        c_hat = jnp.tanh(xg[:, 3 * Hp:4 * Hp] + hg[:, 2 * Hp:3 * Hp])
        c_new = f_t * c + i_t * T_t * c_hat
        o_t = jax.nn.sigmoid(
            xg[:, 4 * Hp:5 * Hp] + hg[:, 3 * Hp:4 * Hp]
            + jnp.dot(c_new.astype(cdt), wco,
                      preferred_element_type=jnp.float32))
        h_new = o_t * jnp.tanh(c_new)                       # f32

        hs_ref[t] = h_new                                   # hidden_states[t] (f32)
        return (h_new.astype(cdt), c_new)                   # carry h in matmul dtype

    h0 = jnp.zeros((U, Hp), cdt)
    c0 = jnp.zeros((U, Hp), jnp.float32)
    unroll = True if G <= 16 else 4                         # bound vreg pressure
    jax.lax.fori_loop(0, G, step_fn, (h0, c0), unroll=unroll)

    # ---- Epilogue (off the latency chain): softmax-weighted aggregation over
    # the hidden states already resident in the VMEM output buffer.
    def agg_step(t, acc):
        return acc + wgt_ref[t] * hs_ref[t]
    agg_ref[...] = jax.lax.fori_loop(
        0, G, agg_step, jnp.zeros((U, Hp), jnp.float32), unroll=True)


def pack_time_lstm_params(params, *, use_bf16_matmul=False):
    """One-time packing/padding/casting of the TimeLSTM parameters.

    Call once per parameter set (hoisted out of the per-call wrapper so the
    pads/concats/casts don't run on every forward).
    """
    H = params["Wco"].shape[0]
    Hp = _round_up(H, 128)                    # lane-dense hidden width
    f32 = jnp.float32
    cdt = jnp.bfloat16 if use_bf16_matmul else f32   # bf16 valid on v5e/v6e/v7x

    Wx, bx = params["Wx"], params["bx"]       # (5, E, H), (5, 1, H)
    Wh, bh = params["Wh"], params["bh"]       # (4, H, H), (4, 1, H)
    Wco, bco = params["Wco"], params["bco"]   # (H, H),    (1, H)
    Wt, bt = params["Wt"], params["bt"]       # (2, 1, H), (2, 1, H)

    if Hp == H:
        padH = lambda a: a
    else:
        padH = lambda a: jnp.pad(a, [(0, 0)] * (a.ndim - 1) + [(0, Hp - H)])

    Wx_packed = jnp.concatenate([padH(Wx[k]) for k in range(5)], axis=1)  # (E, 5Hp)
    Wh_packed = jnp.concatenate([padH(Wh[k]) for k in range(4)], axis=1)  # (H, 4Hp)
    if Hp != H:
        Wh_packed = jnp.pad(Wh_packed, ((0, Hp - H), (0, 0)))             # (Hp, 4Hp)
        Wco_p = jnp.pad(Wco, ((0, Hp - H), (0, Hp - H)))                   # (Hp, Hp)
    else:
        Wco_p = Wco

    # Static (dt-independent) part of the per-step x-side bias, packed (1, 5Hp).
    static_bias = jnp.concatenate([
        padH(bx[0] + bh[0]),                  # i gate
        padH(bx[1] + bh[1]),                  # f gate
        padH(bx[2]),                          # T gate (dtt added per call)
        padH(bx[3] + bh[2]),                  # c_hat
        padH(bx[4] + bh[3] + bco),            # o gate (dto added per call)
    ], axis=1).astype(f32)

    return {
        "H": H, "Hp": Hp, "cdt": cdt,
        "Wx": Wx_packed.astype(cdt),
        "Wh": Wh_packed.astype(cdt),
        "Wco": Wco_p.astype(cdt),
        "static_bias": static_bias,
        "Wt": Wt.astype(f32), "bt": bt.astype(f32),
    }


def time_lstm_forward(node_embeddings, time_deltas, packed):
    """Returns (time_agg_embedding [U,H], hidden_states [G,U,H]).

    `time_deltas` has length == num_graphs (matching the PyTorch forward loop,
    not its docstring).  `packed` comes from `pack_time_lstm_params`.
    """
    G, U, E = node_embeddings.shape
    H, Hp, cdt = packed["H"], packed["Hp"], packed["cdt"]
    f32 = jnp.float32

    td = time_deltas.astype(f32)
    # softmax(-cumsum(td / td.max())) — tiny, done in plain JAX (glue).
    weights = jax.nn.softmax(-jnp.cumsum(td / jnp.max(td)))            # (G,)

    # Per-call dt-dependent terms folded into the per-step x bias.
    Wt, bt = packed["Wt"], packed["bt"]
    dtt = jax.nn.sigmoid(td[:, None] * Wt[0] + bt[0])                  # (G, H)
    dto = td[:, None] * Wt[1] + bt[1]                                  # (G, H)
    if Hp == H:
        padH2 = lambda a: a
    else:
        padH2 = lambda a: jnp.pad(a, ((0, 0), (0, Hp - H)))
    zg = jnp.zeros((G, Hp), f32)
    time_terms = jnp.concatenate([zg, zg, padH2(dtt), zg, padH2(dto)], axis=1)
    xbias = (packed["static_bias"] + time_terms)[:, None, :]           # (G, 1, 5Hp)

    x_in = node_embeddings.astype(cdt)

    smem_spec = pl.BlockSpec(memory_space=pltpu.MemorySpace.SMEM)

    hs_p, agg_p = pl.pallas_call(
        time_lstm_kernel,
        out_shape=(
            jax.ShapeDtypeStruct((G, U, Hp), f32),          # hidden_states (padded)
            jax.ShapeDtypeStruct((U, Hp), f32),             # time_agg (padded)
        ),
        grid=(1,),                                          # single invocation
        in_specs=[
            smem_spec,                                      # softmax weights (G,)
            pl.BlockSpec((G, U, E), lambda i: (0, 0, 0)),   # node embeddings
            pl.BlockSpec((E, 5 * Hp), lambda i: (0, 0)),    # packed x weights
            pl.BlockSpec((G, 1, 5 * Hp), lambda i: (0, 0, 0)),  # per-step x bias
            pl.BlockSpec((Hp, 4 * Hp), lambda i: (0, 0)),   # packed h weights
            pl.BlockSpec((Hp, Hp), lambda i: (0, 0)),       # Wco
        ],
        out_specs=(
            pl.BlockSpec((G, U, Hp), lambda i: (0, 0, 0)),
            pl.BlockSpec((U, Hp), lambda i: (0, 0)),
        ),
        scratch_shapes=[
            pltpu.VMEM((G, U, 5 * Hp), jnp.float32),        # hoisted x-projection
        ],
        compiler_params=pltpu.CompilerParams(
            dimension_semantics=("arbitrary",)),            # serial recurrence
    )(weights, x_in, packed["Wx"], xbias, packed["Wh"], packed["Wco"])

    if Hp == H:
        return agg_p, hs_p
    # Strip lane padding (wrapper-side glue; skipped when H % 128 == 0).
    return agg_p[:, :H], hs_p[:, :, :H]


def init_params(key, input_size, hidden_size):
    """Deterministic init mimicking nn.Linear: U(-1/sqrt(fan_in), 1/sqrt(fan_in))."""
    def linear(k, fan_in, fan_out):
        k1, k2 = jax.random.split(k)
        bound = 1.0 / float(fan_in) ** 0.5
        w = jax.random.uniform(k1, (fan_in, fan_out), jnp.float32, -bound, bound)
        b = jax.random.uniform(k2, (fan_out,), jnp.float32, -bound, bound)
        return w, b

    ks = jax.random.split(key, 12)
    Wxi, bxi = linear(ks[0], input_size, hidden_size)
    Whi, bhi = linear(ks[1], hidden_size, hidden_size)
    Wxf, bxf = linear(ks[2], input_size, hidden_size)
    Whf, bhf = linear(ks[3], hidden_size, hidden_size)
    Wxt, bxt = linear(ks[4], input_size, hidden_size)
    Wtt, btt = linear(ks[5], 1, hidden_size)
    Wxc, bxc = linear(ks[6], input_size, hidden_size)
    Whc, bhc = linear(ks[7], hidden_size, hidden_size)
    Wxo, bxo = linear(ks[8], input_size, hidden_size)
    Wto, bto = linear(ks[9], 1, hidden_size)
    Who, bho = linear(ks[10], hidden_size, hidden_size)
    Wco, bco = linear(ks[11], hidden_size, hidden_size)

    return {
        "Wx": jnp.stack([Wxi, Wxf, Wxt, Wxc, Wxo]),               # (5, E, H)
        "bx": jnp.stack([bxi, bxf, bxt, bxc, bxo])[:, None, :],   # (5, 1, H)
        "Wh": jnp.stack([Whi, Whf, Whc, Who]),                    # (4, H, H)
        "bh": jnp.stack([bhi, bhf, bhc, bho])[:, None, :],        # (4, 1, H)
        "Wco": Wco,                                               # (H, H)
        "bco": bco[None, :],                                      # (1, H)
        "Wt": jnp.stack([Wtt, Wto]),                              # (2, 1, H)
        "bt": jnp.stack([btt, bto])[:, None, :],                  # (2, 1, H)
    }


def reference_forward(node_embeddings, time_deltas, p):
    """Pure-JAX replica of the PyTorch forward (full-precision matmuls)."""
    def mm(a, b):
        return jnp.dot(a, b, precision=jax.lax.Precision.HIGHEST)

    G, U, E = node_embeddings.shape
    H = p["Wco"].shape[0]
    h = jnp.zeros((U, H), jnp.float32)
    c = jnp.zeros((U, H), jnp.float32)
    hs = []
    for i in range(G):
        x = node_embeddings[i]
        d = time_deltas[i].astype(jnp.float32)
        i_t = jax.nn.sigmoid(mm(x, p["Wx"][0]) + p["bx"][0] + mm(h, p["Wh"][0]) + p["bh"][0])
        f_t = jax.nn.sigmoid(mm(x, p["Wx"][1]) + p["bx"][1] + mm(h, p["Wh"][1]) + p["bh"][1])
        dtt = jax.nn.sigmoid(d * p["Wt"][0] + p["bt"][0])
        T_t = jax.nn.sigmoid(mm(x, p["Wx"][2]) + p["bx"][2] + dtt)
        c_hat = jnp.tanh(mm(x, p["Wx"][3]) + p["bx"][3] + mm(h, p["Wh"][2]) + p["bh"][2])
        c = f_t * c + i_t * T_t * c_hat
        dto = d * p["Wt"][1] + p["bt"][1]
        o_t = jax.nn.sigmoid(mm(x, p["Wx"][4]) + p["bx"][4] + dto
                             + mm(h, p["Wh"][3]) + p["bh"][3]
                             + mm(c, p["Wco"]) + p["bco"])
        h = o_t * jnp.tanh(c)
        hs.append(h)
    td = time_deltas.astype(jnp.float32)
    w = jax.nn.softmax(-jnp.cumsum(td / jnp.max(td)))
    hs = jnp.stack(hs)
    agg = jnp.sum(hs * w[:, None, None], axis=0)
    return agg, hs


if __name__ == "__main__":
    G, U, E, H = 8, 16, 8, 32   # num_graphs, num_users, embedding_dim, hidden_size
    # TODO(synk): for throughput, batch more users per call so the recurrent
    #   matmuls fill the MXU M dimension (>=128 rows on v5e, >=256 on v6e/v7x).

    key = jax.random.PRNGKey(0)
    kp, kx, kt = jax.random.split(key, 3)
    params = init_params(kp, E, H)
    node_embeddings = jax.random.normal(kx, (G, U, E), jnp.float32)
    time_deltas = jax.random.uniform(kt, (G,), jnp.float32, minval=0.1, maxval=2.0)

    agg_ref_, hs_ref_ = reference_forward(node_embeddings, time_deltas, params)

    # f32 MXU-operand path: tight tolerance.
    packed_f32 = pack_time_lstm_params(params, use_bf16_matmul=False)
    agg, hs = time_lstm_forward(node_embeddings, time_deltas, packed_f32)
    jax.block_until_ready((agg, hs))
    assert hs.shape == (G, U, H) and agg.shape == (U, H)
    assert jnp.allclose(hs, hs_ref_, atol=1e-4, rtol=1e-3), "hidden_states mismatch (f32)"
    assert jnp.allclose(agg, agg_ref_, atol=1e-4, rtol=1e-3), "time_agg mismatch (f32)"

    # bf16 MXU-operand fast path (valid on v5e/v6e/v7x): looser tolerance.
    packed_bf16 = pack_time_lstm_params(params, use_bf16_matmul=True)
    agg_bf, hs_bf = time_lstm_forward(node_embeddings, time_deltas, packed_bf16)
    jax.block_until_ready((agg_bf, hs_bf))
    assert jnp.allclose(hs_bf, hs_ref_, atol=5e-2, rtol=5e-2), "hidden_states mismatch (bf16)"
    assert jnp.allclose(agg_bf, agg_ref_, atol=5e-2, rtol=5e-2), "time_agg mismatch (bf16)"

    print("KERNEL_OK")
</pallas_src>

<mosaic_0001>
module attributes {stable_mosaic.version = 11 : i64} {
  func.func @time_lstm_kernel(%arg0: i32, %arg1: memref<8xf32, #tpu.memory_space<smem>>, %arg2: memref<8x16x8xf32, #tpu.memory_space<vmem>>, %arg3: memref<8x640xf32, #tpu.memory_space<vmem>>, %arg4: memref<8x1x640xf32, #tpu.memory_space<vmem>>, %arg5: memref<128x512xf32, #tpu.memory_space<vmem>>, %arg6: memref<128x128xf32, #tpu.memory_space<vmem>>, %arg7: memref<8x16x128xf32, #tpu.memory_space<vmem>>, %arg8: memref<16x128xf32, #tpu.memory_space<vmem>>, %arg9: memref<8x16x640xf32, #tpu.memory_space<vmem>>) attributes {dimension_semantics = [#tpu.dimension_semantics<arbitrary>], iteration_bounds = array<i64: 1>, scalar_prefetch = 0 : i64, scratch_operands = 1 : i64, tpu.core_type = #tpu.core_type<tc>, window_params = [{transform_indices = @transform_0, window_bounds = array<i64: 8>}, {pipeline_mode = #tpu.pipeline_mode<synchronous>, transform_indices = @transform_1, window_bounds = array<i64: 8, 16, 8>}, {pipeline_mode = #tpu.pipeline_mode<synchronous>, transform_indices = @transform_2, window_bounds = array<i64: 8, 640>}, {pipeline_mode = #tpu.pipeline_mode<synchronous>, transform_indices = @transform_3, window_bounds = array<i64: 8, 1, 640>}, {pipeline_mode = #tpu.pipeline_mode<synchronous>, transform_indices = @transform_4, window_bounds = array<i64: 128, 512>}, {pipeline_mode = #tpu.pipeline_mode<synchronous>, transform_indices = @transform_5, window_bounds = array<i64: 128, 128>}, {pipeline_mode = #tpu.pipeline_mode<synchronous>, transform_indices = @transform_6, window_bounds = array<i64: 8, 16, 128>}, {pipeline_mode = #tpu.pipeline_mode<synchronous>, transform_indices = @transform_7, window_bounds = array<i64: 16, 128>}]} {
    %c0 = arith.constant 0 : index
    %c0_0 = arith.constant 0 : index
    %c0_1 = arith.constant 0 : index
    %0 = vector.load %arg2[%c0, %c0_0, %c0_1] : memref<8x16x8xf32, #tpu.memory_space<vmem>>, vector<8x16x8xf32>
    %1 = vector.shape_cast %0 : vector<8x16x8xf32> to vector<128x8xf32>
    %c0_2 = arith.constant 0 : index
    %c0_3 = arith.constant 0 : index
    %2 = vector.load %arg3[%c0_2, %c0_3] : memref<8x640xf32, #tpu.memory_space<vmem>>, vector<8x640xf32>
    %cst = arith.constant dense<0.000000e+00> : vector<128x640xf32>
    %3 = tpu.matmul %1, %2, %cst {dimension_numbers = #tpu.dot_dimension_numbers<[1], [0], [0], [1], [0, 0, 1, 1], [], []>} : vector<128x8xf32>, vector<8x640xf32>, vector<128x640xf32> -> vector<128x640xf32>
    %4 = vector.shape_cast %3 : vector<128x640xf32> to vector<8x16x640xf32>
    %c0_4 = arith.constant 0 : index
    %c0_5 = arith.constant 0 : index
    %c0_6 = arith.constant 0 : index
    %5 = vector.load %arg4[%c0_4, %c0_5, %c0_6] : memref<8x1x640xf32, #tpu.memory_space<vmem>>, vector<8x1x640xf32>
    %6 = vector.broadcast %5 : vector<8x1x640xf32> to vector<8x16x640xf32>
    %7 = arith.addf %4, %6 : vector<8x16x640xf32>
    %c0_7 = arith.constant 0 : index
    %c0_8 = arith.constant 0 : index
    %c0_9 = arith.constant 0 : index
    %8 = vector.load %arg9[%c0_7, %c0_8, %c0_9] : memref<8x16x640xf32, #tpu.memory_space<vmem>>, vector<8x16x640xf32>
    tpu.vector_store %arg9[%c0_7, %c0_8, %c0_9], %7 {strides = array<i32>} : memref<8x16x640xf32, #tpu.memory_space<vmem>>, vector<8x16x640xf32>,
    %c0_10 = arith.constant 0 : index
    %c0_11 = arith.constant 0 : index
    %c256 = arith.constant 256 : index
    %9 = vector.load %arg9[%c0_10, %c0_11, %c256] : memref<8x16x640xf32, #tpu.memory_space<vmem>>, vector<8x16x128xf32>
    %10 = arith.negf %9 : vector<8x16x128xf32>
    %11 = math.exp %10 : vector<8x16x128xf32>
    %cst_12 = arith.constant 1.000000e+00 : f32
    %12 = vector.broadcast %cst_12 : f32 to vector<8x16x128xf32>
    %13 = arith.addf %12, %11 : vector<8x16x128xf32>
    %14 = arith.divf %12, %13 : vector<8x16x128xf32>
    %c0_13 = arith.constant 0 : index
    %c0_14 = arith.constant 0 : index
    %c256_15 = arith.constant 256 : index
    %15 = vector.load %arg9[%c0_13, %c0_14, %c256_15] : memref<8x16x640xf32, #tpu.memory_space<vmem>>, vector<8x16x128xf32>
    tpu.vector_store %arg9[%c0_13, %c0_14, %c256_15], %14 {strides = array<i32>} : memref<8x16x640xf32, #tpu.memory_space<vmem>>, vector<8x16x128xf32>,
    %c0_16 = arith.constant 0 : index
    %c0_17 = arith.constant 0 : index
    %16 = vector.load %arg5[%c0_16, %c0_17] : memref<128x512xf32, #tpu.memory_space<vmem>>, vector<128x512xf32>
    %c0_18 = arith.constant 0 : index
    %c0_19 = arith.constant 0 : index
    %17 = vector.load %arg6[%c0_18, %c0_19] : memref<128x128xf32, #tpu.memory_space<vmem>>, vector<128x128xf32>
    %cst_20 = arith.constant 0.000000e+00 : f32
    %18 = vector.broadcast %cst_20 : f32 to vector<16x128xf32>
    %cst_21 = arith.constant 0.000000e+00 : f32
    %19 = vector.broadcast %cst_21 : f32 to vector<16x128xf32>
    %c0_i32 = arith.constant 0 : i32
    %20 = arith.index_cast %c0_i32 : i32 to index
    %c0_22 = arith.constant 0 : index
    %c0_23 = arith.constant 0 : index
    %21 = vector.load %arg9[%20, %c0_22, %c0_23] : memref<8x16x640xf32, #tpu.memory_space<vmem>>, vector<1x16x640xf32>
    %22 = vector.shape_cast %21 : vector<1x16x640xf32> to vector<16x640xf32>
    %cst_24 = arith.constant dense<0.000000e+00> : vector<16x512xf32>
    %23 = tpu.matmul %18, %16, %cst_24 {dimension_numbers = #tpu.dot_dimension_numbers<[1], [0], [0], [1], [0, 0, 1, 1], [], []>} : vector<16x128xf32>, vector<128x512xf32>, vector<16x512xf32> -> vector<16x512xf32>
    %24 = vector.extract_strided_slice %22 {offsets = [0, 0], sizes = [16, 128], strides = [1, 1]} : vector<16x640xf32> to vector<16x128xf32>
    %25 = vector.extract_strided_slice %23 {offsets = [0, 0], sizes = [16, 128], strides = [1, 1]} : vector<16x512xf32> to vector<16x128xf32>
    %26 = arith.addf %24, %25 : vector<16x128xf32>
    %27 = arith.negf %26 : vector<16x128xf32>
    %28 = math.exp %27 : vector<16x128xf32>
    %cst_25 = arith.constant 1.000000e+00 : f32
    %29 = vector.broadcast %cst_25 : f32 to vector<16x128xf32>
    %30 = arith.addf %29, %28 : vector<16x128xf32>
    %31 = arith.divf %29, %30 : vector<16x128xf32>
    %32 = vector.extract_strided_slice %22 {offsets = [0, 128], sizes = [16, 128], strides = [1, 1]} : vector<16x640xf32> to vector<16x128xf32>
    %33 = vector.extract_strided_slice %23 {offsets = [0, 128], sizes = [16, 128], strides = [1, 1]} : vector<16x512xf32> to vector<16x128xf32>
    %34 = arith.addf %32, %33 : vector<16x128xf32>
    %35 = arith.negf %34 : vector<16x128xf32>
    %36 = math.exp %35 : vector<16x128xf32>
    %cst_26 = arith.constant 1.000000e+00 : f32
    %37 = vector.broadcast %cst_26 : f32 to vector<16x128xf32>
    %38 = arith.addf %37, %36 : vector<16x128xf32>
    %39 = arith.divf %37, %38 : vector<16x128xf32>
    %40 = vector.extract_strided_slice %22 {offsets = [0, 256], sizes = [16, 128], strides = [1, 1]} : vector<16x640xf32> to vector<16x128xf32>
    %41 = vector.extract_strided_slice %22 {offsets = [0, 384], sizes = [16, 128], strides = [1, 1]} : vector<16x640xf32> to vector<16x128xf32>
    %42 = vector.extract_strided_slice %23 {offsets = [0, 256], sizes = [16, 128], strides = [1, 1]} : vector<16x512xf32> to vector<16x128xf32>
    %43 = arith.addf %41, %42 : vector<16x128xf32>
    %44 = math.tanh %43 : vector<16x128xf32>
    %45 = arith.mulf %39, %19 : vector<16x128xf32>
    %46 = arith.mulf %31, %40 : vector<16x128xf32>
    %47 = arith.mulf %46, %44 : vector<16x128xf32>
    %48 = arith.addf %45, %47 : vector<16x128xf32>
    %49 = vector.extract_strided_slice %22 {offsets = [0, 512], sizes = [16, 128], strides = [1, 1]} : vector<16x640xf32> to vector<16x128xf32>
    %50 = vector.extract_strided_slice %23 {offsets = [0, 384], sizes = [16, 128], strides = [1, 1]} : vector<16x512xf32> to vector<16x128xf32>
    %51 = arith.addf %49, %50 : vector<16x128xf32>
    %cst_27 = arith.constant dense<0.000000e+00> : vector<16x128xf32>
    %52 = tpu.matmul %48, %17, %cst_27 {dimension_numbers = #tpu.dot_dimension_numbers<[1], [0], [0], [1], [0, 0, 1, 1], [], []>} : vector<16x128xf32>, vector<128x128xf32>, vector<16x128xf32> -> vector<16x128xf32>
    %53 = arith.addf %51, %52 : vector<16x128xf32>
    %54 = arith.negf %53 : vector<16x128xf32>
    %55 = math.exp %54 : vector<16x128xf32>
    %cst_28 = arith.constant 1.000000e+00 : f32
    %56 = vector.broadcast %cst_28 : f32 to vector<16x128xf32>
    %57 = arith.addf %56, %55 : vector<16x128xf32>
    %58 = arith.divf %56, %57 : vector<16x128xf32>
    %59 = math.tanh %48 : vector<16x128xf32>
    %60 = arith.mulf %58, %59 : vector<16x128xf32>
    %61 = arith.index_cast %c0_i32 : i32 to index
    %c0_29 = arith.constant 0 : index
    %c0_30 = arith.constant 0 : index
    %62 = vector.load %arg7[%61, %c0_29, %c0_30] : memref<8x16x128xf32, #tpu.memory_space<vmem>>, vector<1x16x128xf32>
    %63 = vector.shape_cast %62 : vector<1x16x128xf32> to vector<16x128xf32>
    %64 = vector.shape_cast %60 : vector<16x128xf32> to vector<1x16x128xf32>
    tpu.vector_store %arg7[%61, %c0_29, %c0_30], %64 {strides = array<i32>} : memref<8x16x128xf32, #tpu.memory_space<vmem>>, vector<1x16x128xf32>,
    %c1_i32 = arith.constant 1 : i32
    %65 = arith.index_cast %c1_i32 : i32 to index
    %c0_31 = arith.constant 0 : index
    %c0_32 = arith.constant 0 : index
    %66 = vector.load %arg9[%65, %c0_31, %c0_32] : memref<8x16x640xf32, #tpu.memory_space<vmem>>, vector<1x16x640xf32>
    %67 = vector.shape_cast %66 : vector<1x16x640xf32> to vector<16x640xf32>
    %cst_33 = arith.constant dense<0.000000e+00> : vector<16x512xf32>
    %68 = tpu.matmul %60, %16, %cst_33 {dimension_numbers = #tpu.dot_dimension_numbers<[1], [0], [0], [1], [0, 0, 1, 1], [], []>} : vector<16x128xf32>, vector<128x512xf32>, vector<16x512xf32> -> vector<16x512xf32>
    %69 = vector.extract_strided_slice %67 {offsets = [0, 0], sizes = [16, 128], strides = [1, 1]} : vector<16x640xf32> to vector<16x128xf32>
    %70 = vector.extract_strided_slice %68 {offsets = [0, 0], sizes = [16, 128], strides = [1, 1]} : vector<16x512xf32> to vector<16x128xf32>
    %71 = arith.addf %69, %70 : vector<16x128xf32>
    %72 = arith.negf %71 : vector<16x128xf32>
    %73 = math.exp %72 : vector<16x128xf32>
    %cst_34 = arith.constant 1.000000e+00 : f32
    %74 = vector.broadcast %cst_34 : f32 to vector<16x128xf32>
    %75 = arith.addf %74, %73 : vector<16x128xf32>
    %76 = arith.divf %74, %75 : vector<16x128xf32>
    %77 = vector.extract_strided_slice %67 {offsets = [0, 128], sizes = [16, 128], strides = [1, 1]} : vector<16x640xf32> to vector<16x128xf32>
    %78 = vector.extract_strided_slice %68 {offsets = [0, 128], sizes = [16, 128], strides = [1, 1]} : vector<16x512xf32> to vector<16x128xf32>
    %79 = arith.addf %77, %78 : vector<16x128xf32>
    %80 = arith.negf %79 : vector<16x128xf32>
    %81 = math.exp %80 : vector<16x128xf32>
    %cst_35 = arith.constant 1.000000e+00 : f32
    %82 = vector.broadcast %cst_35 : f32 to vector<16x128xf32>
    %83 = arith.addf %82, %81 : vector<16x128xf32>
    %84 = arith.divf %82, %83 : vector<16x128xf32>
    %85 = vector.extract_strided_slice %67 {offsets = [0, 256], sizes = [16, 128], strides = [1, 1]} : vector<16x640xf32> to vector<16x128xf32>
    %86 = vector.extract_strided_slice %67 {offsets = [0, 384], sizes = [16, 128], strides = [1, 1]} : vector<16x640xf32> to vector<16x128xf32>
    %87 = vector.extract_strided_slice %68 {offsets = [0, 256], sizes = [16, 128], strides = [1, 1]} : vector<16x512xf32> to vector<16x128xf32>
    %88 = arith.addf %86, %87 : vector<16x128xf32>
    %89 = math.tanh %88 : vector<16x128xf32>
    %90 = arith.mulf %84, %48 : vector<16x128xf32>
    %91 = arith.mulf %76, %85 : vector<16x128xf32>
    %92 = arith.mulf %91, %89 : vector<16x128xf32>
    %93 = arith.addf %90, %92 : vector<16x128xf32>
    %94 = vector.extract_strided_slice %67 {offsets = [0, 512], sizes = [16, 128], strides = [1, 1]} : vector<16x640xf32> to vector<16x128xf32>
    %95 = vector.extract_strided_slice %68 {offsets = [0, 384], sizes = [16, 128], strides = [1, 1]} : vector<16x512xf32> to vector<16x128xf32>
    %96 = arith.addf %94, %95 : vector<16x128xf32>
    %cst_36 = arith.constant dense<0.000000e+00> : vector<16x128xf32>
    %97 = tpu.matmul %93, %17, %cst_36 {dimension_numbers = #tpu.dot_dimension_numbers<[1], [0], [0], [1], [0, 0, 1, 1], [], []>} : vector<16x128xf32>, vector<128x128xf32>, vector<16x128xf32> -> vector<16x128xf32>
    %98 = arith.addf %96, %97 : vector<16x128xf32>
    %99 = arith.negf %98 : vector<16x128xf32>
    %100 = math.exp %99 : vector<16x128xf32>
    %cst_37 = arith.constant 1.000000e+00 : f32
    %101 = vector.broadcast %cst_37 : f32 to vector<16x128xf32>
    %102 = arith.addf %101, %100 : vector<16x128xf32>
    %103 = arith.divf %101, %102 : vector<16x128xf32>
    %104 = math.tanh %93 : vector<16x128xf32>
    %105 = arith.mulf %103, %104 : vector<16x128xf32>
    %106 = arith.index_cast %c1_i32 : i32 to index
    %c0_38 = arith.constant 0 : index
    %c0_39 = arith.constant 0 : index
    %107 = vector.load %arg7[%106, %c0_38, %c0_39] : memref<8x16x128xf32, #tpu.memory_space<vmem>>, vector<1x16x128xf32>
    %108 = vector.shape_cast %107 : vector<1x16x128xf32> to vector<16x128xf32>
    %109 = vector.shape_cast %105 : vector<16x128xf32> to vector<1x16x128xf32>
    tpu.vector_store %arg7[%106, %c0_38, %c0_39], %109 {strides = array<i32>} : memref<8x16x128xf32, #tpu.memory_space<vmem>>, vector<1x16x128xf32>,
    %c2_i32 = arith.constant 2 : i32
    %110 = arith.index_cast %c2_i32 : i32 to index
    %c0_40 = arith.constant 0 : index
    %c0_41 = arith.constant 0 : index
    %111 = vector.load %arg9[%110, %c0_40, %c0_41] : memref<8x16x640xf32, #tpu.memory_space<vmem>>, vector<1x16x640xf32>
    %112 = vector.shape_cast %111 : vector<1x16x640xf32> to vector<16x640xf32>
    %cst_42 = arith.constant dense<0.000000e+00> : vector<16x512xf32>
    %113 = tpu.matmul %105, %16, %cst_42 {dimension_numbers = #tpu.dot_dimension_numbers<[1], [0], [0], [1], [0, 0, 1, 1], [], []>} : vector<16x128xf32>, vector<128x512xf32>, vector<16x512xf32> -> vector<16x512xf32>
    %114 = vector.extract_strided_slice %112 {offsets = [0, 0], sizes = [16, 128], strides = [1, 1]} : vector<16x640xf32> to vector<16x128xf32>
    %115 = vector.extract_strided_slice %113 {offsets = [0, 0], sizes = [16, 128], strides = [1, 1]} : vector<16x512xf32> to vector<16x128xf32>
    %116 = arith.addf %114, %115 : vector<16x128xf32>
    %117 = arith.negf %116 : vector<16x128xf32>
    %118 = math.exp %117 : vector<16x128xf32>
    %cst_43 = arith.constant 1.000000e+00 : f32
    %119 = vector.broadcast %cst_43 : f32 to vector<16x128xf32>
    %120 = arith.addf %119, %118 : vector<16x128xf32>
    %121 = arith.divf %119, %120 : vector<16x128xf32>
    %122 = vector.extract_strided_slice %112 {offsets = [0, 128], sizes = [16, 128], strides = [1, 1]} : vector<16x640xf32> to vector<16x128xf32>
    %123 = vector.extract_strided_slice %113 {offsets = [0, 128], sizes = [16, 128], strides = [1, 1]} : vector<16x512xf32> to vector<16x128xf32>
    %124 = arith.addf %122, %123 : vector<16x128xf32>
    %125 = arith.negf %124 : vector<16x128xf32>
    %126 = math.exp %125 : vector<16x128xf32>
    %cst_44 = arith.constant 1.000000e+00 : f32
    %127 = vector.broadcast %cst_44 : f32 to vector<16x128xf32>
    %128 = arith.addf %127, %126 : vector<16x128xf32>
    %129 = arith.divf %127, %128 : vector<16x128xf32>
    %130 = vector.extract_strided_slice %112 {offsets = [0, 256], sizes = [16, 128], strides = [1, 1]} : vector<16x640xf32> to vector<16x128xf32>
    %131 = vector.extract_strided_slice %112 {offsets = [0, 384], sizes = [16, 128], strides = [1, 1]} : vector<16x640xf32> to vector<16x128xf32>
    %132 = vector.extract_strided_slice %113 {offsets = [0, 256], sizes = [16, 128], strides = [1, 1]} : vector<16x512xf32> to vector<16x128xf32>
    %133 = arith.addf %131, %132 : vector<16x128xf32>
    %134 = math.tanh %133 : vector<16x128xf32>
    %135 = arith.mulf %129, %93 : vector<16x128xf32>
    %136 = arith.mulf %121, %130 : vector<16x128xf32>
    %137 = arith.mulf %136, %134 : vector<16x128xf32>
    %138 = arith.addf %135, %137 : vector<16x128xf32>
    %139 = vector.extract_strided_slice %112 {offsets = [0, 512], sizes = [16, 128], strides = [1, 1]} : vector<16x640xf32> to vector<16x128xf32>
    %140 = vector.extract_strided_slice %113 {offsets = [0, 384], sizes = [16, 128], strides = [1, 1]} : vector<16x512xf32> to vector<16x128xf32>
    %141 = arith.addf %139, %140 : vector<16x128xf32>
    %cst_45 = arith.constant dense<0.000000e+00> : vector<16x128xf32>
    %142 = tpu.matmul %138, %17, %cst_45 {dimension_numbers = #tpu.dot_dimension_numbers<[1], [0], [0], [1], [0, 0, 1, 1], [], []>} : vector<16x128xf32>, vector<128x128xf32>, vector<16x128xf32> -> vector<16x128xf32>
    %143 = arith.addf %141, %142 : vector<16x128xf32>
    %144 = arith.negf %143 : vector<16x128xf32>
    %145 = math.exp %144 : vector<16x128xf32>
    %cst_46 = arith.constant 1.000000e+00 : f32
    %146 = vector.broadcast %cst_46 : f32 to vector<16x128xf32>
    %147 = arith.addf %146, %145 : vector<16x128xf32>
    %148 = arith.divf %146, %147 : vector<16x128xf32>
    %149 = math.tanh %138 : vector<16x128xf32>
    %150 = arith.mulf %148, %149 : vector<16x128xf32>
    %151 = arith.index_cast %c2_i32 : i32 to index
    %c0_47 = arith.constant 0 : index
    %c0_48 = arith.constant 0 : index
    %152 = vector.load %arg7[%151, %c0_47, %c0_48] : memref<8x16x128xf32, #tpu.memory_space<vmem>>, vector<1x16x128xf32>
    %153 = vector.shape_cast %152 : vector<1x16x128xf32> to vector<16x128xf32>
    %154 = vector.shape_cast %150 : vector<16x128xf32> to vector<1x16x128xf32>
    tpu.vector_store %arg7[%151, %c0_47, %c0_48], %154 {strides = array<i32>} : memref<8x16x128xf32, #tpu.memory_space<vmem>>, vector<1x16x128xf32>,
    %c3_i32 = arith.constant 3 : i32
    %155 = arith.index_cast %c3_i32 : i32 to index
    %c0_49 = arith.constant 0 : index
    %c0_50 = arith.constant 0 : index
    %156 = vector.load %arg9[%155, %c0_49, %c0_50] : memref<8x16x640xf32, #tpu.memory_space<vmem>>, vector<1x16x640xf32>
    %157 = vector.shape_cast %156 : vector<1x16x640xf32> to vector<16x640xf32>
    %cst_51 = arith.constant dense<0.000000e+00> : vector<16x512xf32>
    %158 = tpu.matmul %150, %16, %cst_51 {dimension_numbers = #tpu.dot_dimension_numbers<[1], [0], [0], [1], [0, 0, 1, 1], [], []>} : vector<16x128xf32>, vector<128x512xf32>, vector<16x512xf32> -> vector<16x512xf32>
    %159 = vector.extract_strided_slice %157 {offsets = [0, 0], sizes = [16, 128], strides = [1, 1]} : vector<16x640xf32> to vector<16x128xf32>
    %160 = vector.extract_strided_slice %158 {offsets = [0, 0], sizes = [16, 128], strides = [1, 1]} : vector<16x512xf32> to vector<16x128xf32>
    %161 = arith.addf %159, %160 : vector<16x128xf32>
    %162 = arith.negf %161 : vector<16x128xf32>
    %163 = math.exp %162 : vector<16x128xf32>
    %cst_52 = arith.constant 1.000000e+00 : f32
    %164 = vector.broadcast %cst_52 : f32 to vector<16x128xf32>
    %165 = arith.addf %164, %163 : vector<16x128xf32>
    %166 = arith.divf %164, %165 : vector<16x128xf32>
    %167 = vector.extract_strided_slice %157 {offsets = [0, 128], sizes = [16, 128], strides = [1, 1]} : vector<16x640xf32> to vector<16x128xf32>
    %168 = vector.extract_strided_slice %158 {offsets = [0, 128], sizes = [16, 128], strides = [1, 1]} : vector<16x512xf32> to vector<16x128xf32>
    %169 = arith.addf %167, %168 : vector<16x128xf32>
    %170 = arith.negf %169 : vector<16x128xf32>
    %171 = math.exp %170 : vector<16x128xf32>
    %cst_53 = arith.constant 1.000000e+00 : f32
    %172 = vector.broadcast %cst_53 : f32 to vector<16x128xf32>
    %173 = arith.addf %172, %171 : vector<16x128xf32>
    %174 = arith.divf %172, %173 : vector<16x128xf32>
    %175 = vector.extract_strided_slice %157 {offsets = [0, 256], sizes = [16, 128], strides = [1, 1]} : vector<16x640xf32> to vector<16x128xf32>
    %176 = vector.extract_strided_slice %157 {offsets = [0, 384], sizes = [16, 128], strides = [1, 1]} : vector<16x640xf32> to vector<16x128xf32>
    %177 = vector.extract_strided_slice %158 {offsets = [0, 256], sizes = [16, 128], strides = [1, 1]} : vector<16x512xf32> to vector<16x128xf32>
    %178 = arith.addf %176, %177 : vector<16x128xf32>
    %179 = math.tanh %178 : vector<16x128xf32>
    %180 = arith.mulf %174, %138 : vector<16x128xf32>
    %181 = arith.mulf %166, %175 : vector<16x128xf32>
    %182 = arith.mulf %181, %179 : vector<16x128xf32>
    %183 = arith.addf %180, %182 : vector<16x128xf32>
    %184 = vector.extract_strided_slice %157 {offsets = [0, 512], sizes = [16, 128], strides = [1, 1]} : vector<16x640xf32> to vector<16x128xf32>
    %185 = vector.extract_strided_slice %158 {offsets = [0, 384], sizes = [16, 128], strides = [1, 1]} : vector<16x512xf32> to vector<16x128xf32>
    %186 = arith.addf %184, %185 : vector<16x128xf32>
    %cst_54 = arith.constant dense<0.000000e+00> : vector<16x128xf32>
    %187 = tpu.matmul %183, %17, %cst_54 {dimension_numbers = #tpu.dot_dimension_numbers<[1], [0], [0], [1], [0, 0, 1, 1], [], []>} : vector<16x128xf32>, vector<128x128xf32>, vector<16x128xf32> -> vector<16x128xf32>
    %188 = arith.addf %186, %187 : vector<16x128xf32>
    %189 = arith.negf %188 : vector<16x128xf32>
    %190 = math.exp %189 : vector<16x128xf32>
    %cst_55 = arith.constant 1.000000e+00 : f32
    %191 = vector.broadcast %cst_55 : f32 to vector<16x128xf32>
    %192 = arith.addf %191, %190 : vector<16x128xf32>
    %193 = arith.divf %191, %192 : vector<16x128xf32>
    %194 = math.tanh %183 : vector<16x128xf32>
    %195 = arith.mulf %193, %194 : vector<16x128xf32>
    %196 = arith.index_cast %c3_i32 : i32 to index
    %c0_56 = arith.constant 0 : index
    %c0_57 = arith.constant 0 : index
    %197 = vector.load %arg7[%196, %c0_56, %c0_57] : memref<8x16x128xf32, #tpu.memory_space<vmem>>, vector<1x16x128xf32>
    %198 = vector.shape_cast %197 : vector<1x16x128xf32> to vector<16x128xf32>
    %199 = vector.shape_cast %195 : vector<16x128xf32> to vector<1x16x128xf32>
    tpu.vector_store %arg7[%196, %c0_56, %c0_57], %199 {strides = array<i32>} : memref<8x16x128xf32, #tpu.memory_space<vmem>>, vector<1x16x128xf32>,
    %c4_i32 = arith.constant 4 : i32
    %200 = arith.index_cast %c4_i32 : i32 to index
    %c0_58 = arith.constant 0 : index
    %c0_59 = arith.constant 0 : index
    %201 = vector.load %arg9[%200, %c0_58, %c0_59] : memref<8x16x640xf32, #tpu.memory_space<vmem>>, vector<1x16x640xf32>
    %202 = vector.shape_cast %201 : vector<1x16x640xf32> to vector<16x640xf32>
    %cst_60 = arith.constant dense<0.000000e+00> : vector<16x512xf32>
    %203 = tpu.matmul %195, %16, %cst_60 {dimension_numbers = #tpu.dot_dimension_numbers<[1], [0], [0], [1], [0, 0, 1, 1], [], []>} : vector<16x128xf32>, vector<128x512xf32>, vector<16x512xf32> -> vector<16x512xf32>
    %204 = vector.extract_strided_slice %202 {offsets = [0, 0], sizes = [16, 128], strides = [1, 1]} : vector<16x640xf32> to vector<16x128xf32>
    %205 = vector.extract_strided_slice %203 {offsets = [0, 0], sizes = [16, 128], strides = [1, 1]} : vector<16x512xf32> to vector<16x128xf32>
    %206 = arith.addf %204, %205 : vector<16x128xf32>
    %207 = arith.negf %206 : vector<16x128xf32>
    %208 = math.exp %207 : vector<16x128xf32>
    %cst_61 = arith.constant 1.000000e+00 : f32
    %209 = vector.broadcast %cst_61 : f32 to vector<16x128xf32>
    %210 = arith.addf %209, %208 : vector<16x128xf32>
    %211 = arith.divf %209, %210 : vector<16x128xf32>
    %212 = vector.extract_strided_slice %202 {offsets = [0, 128], sizes = [16, 128], strides = [1, 1]} : vector<16x640xf32> to vector<16x128xf32>
    %213 = vector.extract_strided_slice %203 {offsets = [0, 128], sizes = [16, 128], strides = [1, 1]} : vector<16x512xf32> to vector<16x128xf32>
    %214 = arith.addf %212, %213 : vector<16x128xf32>
    %215 = arith.negf %214 : vector<16x128xf32>
    %216 = math.exp %215 : vector<16x128xf32>
    %cst_62 = arith.constant 1.000000e+00 : f32
    %217 = vector.broadcast %cst_62 : f32 to vector<16x128xf32>
    %218 = arith.addf %217, %216 : vector<16x128xf32>
    %219 = arith.divf %217, %218 : vector<16x128xf32>
    %220 = vector.extract_strided_slice %202 {offsets = [0, 256], sizes = [16, 128], strides = [1, 1]} : vector<16x640xf32> to vector<16x128xf32>
    %221 = vector.extract_strided_slice %202 {offsets = [0, 384], sizes = [16, 128], strides = [1, 1]} : vector<16x640xf32> to vector<16x128xf32>
    %222 = vector.extract_strided_slice %203 {offsets = [0, 256], sizes = [16, 128], strides = [1, 1]} : vector<16x512xf32> to vector<16x128xf32>
    %223 = arith.addf %221, %222 : vector<16x128xf32>
    %224 = math.tanh %223 : vector<16x128xf32>
    %225 = arith.mulf %219, %183 : vector<16x128xf32>
    %226 = arith.mulf %211, %220 : vector<16x128xf32>
    %227 = arith.mulf %226, %224 : vector<16x128xf32>
    %228 = arith.addf %225, %227 : vector<16x128xf32>
    %229 = vector.extract_strided_slice %202 {offsets = [0, 512], sizes = [16, 128], strides = [1, 1]} : vector<16x640xf32> to vector<16x128xf32>
    %230 = vector.extract_strided_slice %203 {offsets = [0, 384], sizes = [16, 128], strides = [1, 1]} : vector<16x512xf32> to vector<16x128xf32>
    %231 = arith.addf %229, %230 : vector<16x128xf32>
    %cst_63 = arith.constant dense<0.000000e+00> : vector<16x128xf32>
    %232 = tpu.matmul %228, %17, %cst_63 {dimension_numbers = #tpu.dot_dimension_numbers<[1], [0], [0], [1], [0, 0, 1, 1], [], []>} : vector<16x128xf32>, vector<128x128xf32>, vector<16x128xf32> -> vector<16x128xf32>
    %233 = arith.addf %231, %232 : vector<16x128xf32>
    %234 = arith.negf %233 : vector<16x128xf32>
    %235 = math.exp %234 : vector<16x128xf32>
    %cst_64 = arith.constant 1.000000e+00 : f32
    %236 = vector.broadcast %cst_64 : f32 to vector<16x128xf32>
    %237 = arith.addf %236, %235 : vector<16x128xf32>
    %238 = arith.divf %236, %237 : vector<16x128xf32>
    %239 = math.tanh %228 : vector<16x128xf32>
    %240 = arith.mulf %238, %239 : vector<16x128xf32>
    %241 = arith.index_cast %c4_i32 : i32 to index
    %c0_65 = arith.constant 0 : index
    %c0_66 = arith.constant 0 : index
    %242 = vector.load %arg7[%241, %c0_65, %c0_66] : memref<8x16x128xf32, #tpu.memory_space<vmem>>, vector<1x16x128xf32>
    %243 = vector.shape_cast %242 : vector<1x16x128xf32> to vector<16x128xf32>
    %244 = vector.shape_cast %240 : vector<16x128xf32> to vector<1x16x128xf32>
    tpu.vector_store %arg7[%241, %c0_65, %c0_66], %244 {strides = array<i32>} : memref<8x16x128xf32, #tpu.memory_space<vmem>>, vector<1x16x128xf32>,
    %c5_i32 = arith.constant 5 : i32
    %245 = arith.index_cast %c5_i32 : i32 to index
    %c0_67 = arith.constant 0 : index
    %c0_68 = arith.constant 0 : index
    %246 = vector.load %arg9[%245, %c0_67, %c0_68] : memref<8x16x640xf32, #tpu.memory_space<vmem>>, vector<1x16x640xf32>
    %247 = vector.shape_cast %246 : vector<1x16x640xf32> to vector<16x640xf32>
    %cst_69 = arith.constant dense<0.000000e+00> : vector<16x512xf32>
    %248 = tpu.matmul %240, %16, %cst_69 {dimension_numbers = #tpu.dot_dimension_numbers<[1], [0], [0], [1], [0, 0, 1, 1], [], []>} : vector<16x128xf32>, vector<128x512xf32>, vector<16x512xf32> -> vector<16x512xf32>
    %249 = vector.extract_strided_slice %247 {offsets = [0, 0], sizes = [16, 128], strides = [1, 1]} : vector<16x640xf32> to vector<16x128xf32>
    %250 = vector.extract_strided_slice %248 {offsets = [0, 0], sizes = [16, 128], strides = [1, 1]} : vector<16x512xf32> to vector<16x128xf32>
    %251 = arith.addf %249, %250 : vector<16x128xf32>
    %252 = arith.negf %251 : vector<16x128xf32>
    %253 = math.exp %252 : vector<16x128xf32>
    %cst_70 = arith.constant 1.000000e+00 : f32
    %254 = vector.broadcast %cst_70 : f32 to vector<16x128xf32>
    %255 = arith.addf %254, %253 : vector<16x128xf32>
    %256 = arith.divf %254, %255 : vector<16x128xf32>
    %257 = vector.extract_strided_slice %247 {offsets = [0, 128], sizes = [16, 128], strides = [1, 1]} : vector<16x640xf32> to vector<16x128xf32>
    %258 = vector.extract_strided_slice %248 {offsets = [0, 128], sizes = [16, 128], strides = [1, 1]} : vector<16x512xf32> to vector<16x128xf32>
    %259 = arith.addf %257, %258 : vector<16x128xf32>
    %260 = arith.negf %259 : vector<16x128xf32>
    %261 = math.exp %260 : vector<16x128xf32>
    %cst_71 = arith.constant 1.000000e+00 : f32
    %262 = vector.broadcast %cst_71 : f32 to vector<16x128xf32>
    %263 = arith.addf %262, %261 : vector<16x128xf32>
    %264 = arith.divf %262, %263 : vector<16x128xf32>
    %265 = vector.extract_strided_slice %247 {offsets = [0, 256], sizes = [16, 128], strides = [1, 1]} : vector<16x640xf32> to vector<16x128xf32>
    %266 = vector.extract_strided_slice %247 {offsets = [0, 384], sizes = [16, 128], strides = [1, 1]} : vector<16x640xf32> to vector<16x128xf32>
    %267 = vector.extract_strided_slice %248 {offsets = [0, 256], sizes = [16, 128], strides = [1, 1]} : vector<16x512xf32> to vector<16x128xf32>
    %268 = arith.addf %266, %267 : vector<16x128xf32>
    %269 = math.tanh %268 : vector<16x128xf32>
    %270 = arith.mulf %264, %228 : vector<16x128xf32>
    %271 = arith.mulf %256, %265 : vector<16x128xf32>
    %272 = arith.mulf %271, %269 : vector<16x128xf32>
    %273 = arith.addf %270, %272 : vector<16x128xf32>
    %274 = vector.extract_strided_slice %247 {offsets = [0, 512], sizes = [16, 128], strides = [1, 1]} : vector<16x640xf32> to vector<16x128xf32>
    %275 = vector.extract_strided_slice %248 {offsets = [0, 384], sizes = [16, 128], strides = [1, 1]} : vector<16x512xf32> to vector<16x128xf32>
    %276 = arith.addf %274, %275 : vector<16x128xf32>
    %cst_72 = arith.constant dense<0.000000e+00> : vector<16x128xf32>
    %277 = tpu.matmul %273, %17, %cst_72 {dimension_numbers = #tpu.dot_dimension_numbers<[1], [0], [0], [1], [0, 0, 1, 1], [], []>} : vector<16x128xf32>, vector<128x128xf32>, vector<16x128xf32> -> vector<16x128xf32>
    %278 = arith.addf %276, %277 : vector<16x128xf32>
    %279 = arith.negf %278 : vector<16x128xf32>
    %280 = math.exp %279 : vector<16x128xf32>
    %cst_73 = arith.constant 1.000000e+00 : f32
    %281 = vector.broadcast %cst_73 : f32 to vector<16x128xf32>
    %282 = arith.addf %281, %280 : vector<16x128xf32>
    %283 = arith.divf %281, %282 : vector<16x128xf32>
    %284 = math.tanh %273 : vector<16x128xf32>
    %285 = arith.mulf %283, %284 : vector<16x128xf32>
    %286 = arith.index_cast %c5_i32 : i32 to index
    %c0_74 = arith.constant 0 : index
    %c0_75 = arith.constant 0 : index
    %287 = vector.load %arg7[%286, %c0_74, %c0_75] : memref<8x16x128xf32, #tpu.memory_space<vmem>>, vector<1x16x128xf32>
    %288 = vector.shape_cast %287 : vector<1x16x128xf32> to vector<16x128xf32>
    %289 = vector.shape_cast %285 : vector<16x128xf32> to vector<1x16x128xf32>
    tpu.vector_store %arg7[%286, %c0_74, %c0_75], %289 {strides = array<i32>} : memref<8x16x128xf32, #tpu.memory_space<vmem>>, vector<1x16x128xf32>,
    %c6_i32 = arith.constant 6 : i32
    %290 = arith.index_cast %c6_i32 : i32 to index
    %c0_76 = arith.constant 0 : index
    %c0_77 = arith.constant 0 : index
    %291 = vector.load %arg9[%290, %c0_76, %c0_77] : memref<8x16x640xf32, #tpu.memory_space<vmem>>, vector<1x16x640xf32>
    %292 = vector.shape_cast %291 : vector<1x16x640xf32> to vector<16x640xf32>
    %cst_78 = arith.constant dense<0.000000e+00> : vector<16x512xf32>
    %293 = tpu.matmul %285, %16, %cst_78 {dimension_numbers = #tpu.dot_dimension_numbers<[1], [0], [0], [1], [0, 0, 1, 1], [], []>} : vector<16x128xf32>, vector<128x512xf32>, vector<16x512xf32> -> vector<16x512xf32>
    %294 = vector.extract_strided_slice %292 {offsets = [0, 0], sizes = [16, 128], strides = [1, 1]} : vector<16x640xf32> to vector<16x128xf32>
    %295 = vector.extract_strided_slice %293 {offsets = [0, 0], sizes = [16, 128], strides = [1, 1]} : vector<16x512xf32> to vector<16x128xf32>
    %296 = arith.addf %294, %295 : vector<16x128xf32>
    %297 = arith.negf %296 : vector<16x128xf32>
    %298 = math.exp %297 : vector<16x128xf32>
    %cst_79 = arith.constant 1.000000e+00 : f32
    %299 = vector.broadcast %cst_79 : f32 to vector<16x128xf32>
    %300 = arith.addf %299, %298 : vector<16x128xf32>
    %301 = arith.divf %299, %300 : vector<16x128xf32>
    %302 = vector.extract_strided_slice %292 {offsets = [0, 128], sizes = [16, 128], strides = [1, 1]} : vector<16x640xf32> to vector<16x128xf32>
    %303 = vector.extract_strided_slice %293 {offsets = [0, 128], sizes = [16, 128], strides = [1, 1]} : vector<16x512xf32> to vector<16x128xf32>
    %304 = arith.addf %302, %303 : vector<16x128xf32>
    %305 = arith.negf %304 : vector<16x128xf32>
    %306 = math.exp %305 : vector<16x128xf32>
    %cst_80 = arith.constant 1.000000e+00 : f32
    %307 = vector.broadcast %cst_80 : f32 to vector<16x128xf32>
    %308 = arith.addf %307, %306 : vector<16x128xf32>
    %309 = arith.divf %307, %308 : vector<16x128xf32>
    %310 = vector.extract_strided_slice %292 {offsets = [0, 256], sizes = [16, 128], strides = [1, 1]} : vector<16x640xf32> to vector<16x128xf32>
    %311 = vector.extract_strided_slice %292 {offsets = [0, 384], sizes = [16, 128], strides = [1, 1]} : vector<16x640xf32> to vector<16x128xf32>
    %312 = vector.extract_strided_slice %293 {offsets = [0, 256], sizes = [16, 128], strides = [1, 1]} : vector<16x512xf32> to vector<16x128xf32>
    %313 = arith.addf %311, %312 : vector<16x128xf32>
    %314 = math.tanh %313 : vector<16x128xf32>
    %315 = arith.mulf %309, %273 : vector<16x128xf32>
    %316 = arith.mulf %301, %310 : vector<16x128xf32>
    %317 = arith.mulf %316, %314 : vector<16x128xf32>
    %318 = arith.addf %315, %317 : vector<16x128xf32>
    %319 = vector.extract_strided_slice %292 {offsets = [0, 512], sizes = [16, 128], strides = [1, 1]} : vector<16x640xf32> to vector<16x128xf32>
    %320 = vector.extract_strided_slice %293 {offsets = [0, 384], sizes = [16, 128], strides = [1, 1]} : vector<16x512xf32> to vector<16x128xf32>
    %321 = arith.addf %319, %320 : vector<16x128xf32>
    %cst_81 = arith.constant dense<0.000000e+00> : vector<16x128xf32>
    %322 = tpu.matmul %318, %17, %cst_81 {dimension_numbers = #tpu.dot_dimension_numbers<[1], [0], [0], [1], [0, 0, 1, 1], [], []>} : vector<16x128xf32>, vector<128x128xf32>, vector<16x128xf32> -> vector<16x128xf32>
    %323 = arith.addf %321, %322 : vector<16x128xf32>
    %324 = arith.negf %323 : vector<16x128xf32>
    %325 = math.exp %324 : vector<16x128xf32>
    %cst_82 = arith.constant 1.000000e+00 : f32
    %326 = vector.broadcast %cst_82 : f32 to vector<16x128xf32>
    %327 = arith.addf %326, %325 : vector<16x128xf32>
    %328 = arith.divf %326, %327 : vector<16x128xf32>
    %329 = math.tanh %318 : vector<16x128xf32>
    %330 = arith.mulf %328, %329 : vector<16x128xf32>
    %331 = arith.index_cast %c6_i32 : i32 to index
    %c0_83 = arith.constant 0 : index
    %c0_84 = arith.constant 0 : index
    %332 = vector.load %arg7[%331, %c0_83, %c0_84] : memref<8x16x128xf32, #tpu.memory_space<vmem>>, vector<1x16x128xf32>
    %333 = vector.shape_cast %332 : vector<1x16x128xf32> to vector<16x128xf32>
    %334 = vector.shape_cast %330 : vector<16x128xf32> to vector<1x16x128xf32>
    tpu.vector_store %arg7[%331, %c0_83, %c0_84], %334 {strides = array<i32>} : memref<8x16x128xf32, #tpu.memory_space<vmem>>, vector<1x16x128xf32>,
    %c7_i32 = arith.constant 7 : i32
    %335 = arith.index_cast %c7_i32 : i32 to index
    %c0_85 = arith.constant 0 : index
    %c0_86 = arith.constant 0 : index
    %336 = vector.load %arg9[%335, %c0_85, %c0_86] : memref<8x16x640xf32, #tpu.memory_space<vmem>>, vector<1x16x640xf32>
    %337 = vector.shape_cast %336 : vector<1x16x640xf32> to vector<16x640xf32>
    %cst_87 = arith.constant dense<0.000000e+00> : vector<16x512xf32>
    %338 = tpu.matmul %330, %16, %cst_87 {dimension_numbers = #tpu.dot_dimension_numbers<[1], [0], [0], [1], [0, 0, 1, 1], [], []>} : vector<16x128xf32>, vector<128x512xf32>, vector<16x512xf32> -> vector<16x512xf32>
    %339 = vector.extract_strided_slice %337 {offsets = [0, 0], sizes = [16, 128], strides = [1, 1]} : vector<16x640xf32> to vector<16x128xf32>
    %340 = vector.extract_strided_slice %338 {offsets = [0, 0], sizes = [16, 128], strides = [1, 1]} : vector<16x512xf32> to vector<16x128xf32>
    %341 = arith.addf %339, %340 : vector<16x128xf32>
    %342 = arith.negf %341 : vector<16x128xf32>
    %343 = math.exp %342 : vector<16x128xf32>
    %cst_88 = arith.constant 1.000000e+00 : f32
    %344 = vector.broadcast %cst_88 : f32 to vector<16x128xf32>
    %345 = arith.addf %344, %343 : vector<16x128xf32>
    %346 = arith.divf %344, %345 : vector<16x128xf32>
    %347 = vector.extract_strided_slice %337 {offsets = [0, 128], sizes = [16, 128], strides = [1, 1]} : vector<16x640xf32> to vector<16x128xf32>
    %348 = vector.extract_strided_slice %338 {offsets = [0, 128], sizes = [16, 128], strides = [1, 1]} : vector<16x512xf32> to vector<16x128xf32>
    %349 = arith.addf %347, %348 : vector<16x128xf32>
    %350 = arith.negf %349 : vector<16x128xf32>
    %351 = math.exp %350 : vector<16x128xf32>
    %cst_89 = arith.constant 1.000000e+00 : f32
    %352 = vector.broadcast %cst_89 : f32 to vector<16x128xf32>
    %353 = arith.addf %352, %351 : vector<16x128xf32>
    %354 = arith.divf %352, %353 : vector<16x128xf32>
    %355 = vector.extract_strided_slice %337 {offsets = [0, 256], sizes = [16, 128], strides = [1, 1]} : vector<16x640xf32> to vector<16x128xf32>
    %356 = vector.extract_strided_slice %337 {offsets = [0, 384], sizes = [16, 128], strides = [1, 1]} : vector<16x640xf32> to vector<16x128xf32>
    %357 = vector.extract_strided_slice %338 {offsets = [0, 256], sizes = [16, 128], strides = [1, 1]} : vector<16x512xf32> to vector<16x128xf32>
    %358 = arith.addf %356, %357 : vector<16x128xf32>
    %359 = math.tanh %358 : vector<16x128xf32>
    %360 = arith.mulf %354, %318 : vector<16x128xf32>
    %361 = arith.mulf %346, %355 : vector<16x128xf32>
    %362 = arith.mulf %361, %359 : vector<16x128xf32>
    %363 = arith.addf %360, %362 : vector<16x128xf32>
    %364 = vector.extract_strided_slice %337 {offsets = [0, 512], sizes = [16, 128], strides = [1, 1]} : vector<16x640xf32> to vector<16x128xf32>
    %365 = vector.extract_strided_slice %338 {offsets = [0, 384], sizes = [16, 128], strides = [1, 1]} : vector<16x512xf32> to vector<16x128xf32>
    %366 = arith.addf %364, %365 : vector<16x128xf32>
    %cst_90 = arith.constant dense<0.000000e+00> : vector<16x128xf32>
    %367 = tpu.matmul %363, %17, %cst_90 {dimension_numbers = #tpu.dot_dimension_numbers<[1], [0], [0], [1], [0, 0, 1, 1], [], []>} : vector<16x128xf32>, vector<128x128xf32>, vector<16x128xf32> -> vector<16x128xf32>
    %368 = arith.addf %366, %367 : vector<16x128xf32>
    %369 = arith.negf %368 : vector<16x128xf32>
    %370 = math.exp %369 : vector<16x128xf32>
    %cst_91 = arith.constant 1.000000e+00 : f32
    %371 = vector.broadcast %cst_91 : f32 to vector<16x128xf32>
    %372 = arith.addf %371, %370 : vector<16x128xf32>
    %373 = arith.divf %371, %372 : vector<16x128xf32>
    %374 = math.tanh %363 : vector<16x128xf32>
    %375 = arith.mulf %373, %374 : vector<16x128xf32>
    %376 = arith.index_cast %c7_i32 : i32 to index
    %c0_92 = arith.constant 0 : index
    %c0_93 = arith.constant 0 : index
    %377 = vector.load %arg7[%376, %c0_92, %c0_93] : memref<8x16x128xf32, #tpu.memory_space<vmem>>, vector<1x16x128xf32>
    %378 = vector.shape_cast %377 : vector<1x16x128xf32> to vector<16x128xf32>
    %379 = vector.shape_cast %375 : vector<16x128xf32> to vector<1x16x128xf32>
    tpu.vector_store %arg7[%376, %c0_92, %c0_93], %379 {strides = array<i32>} : memref<8x16x128xf32, #tpu.memory_space<vmem>>, vector<1x16x128xf32>,
    %c8_i32 = arith.constant 8 : i32
    %cst_94 = arith.constant 0.000000e+00 : f32
    %380 = vector.broadcast %cst_94 : f32 to vector<16x128xf32>
    %c0_i32_95 = arith.constant 0 : i32
    %381 = arith.index_cast %c0_i32_95 : i32 to index
    %382 = memref.load %arg1[%381] : memref<8xf32, #tpu.memory_space<smem>>
    %383 = arith.index_cast %c0_i32_95 : i32 to index
    %c0_96 = arith.constant 0 : index
    %c0_97 = arith.constant 0 : index
    %384 = vector.load %arg7[%383, %c0_96, %c0_97] : memref<8x16x128xf32, #tpu.memory_space<vmem>>, vector<1x16x128xf32>
    %385 = vector.shape_cast %384 : vector<1x16x128xf32> to vector<16x128xf32>
    %386 = vector.broadcast %382 : f32 to vector<16x128xf32>
    %387 = arith.mulf %386, %385 : vector<16x128xf32>
    %388 = arith.addf %380, %387 : vector<16x128xf32>
    %c1_i32_98 = arith.constant 1 : i32
    %389 = arith.index_cast %c1_i32_98 : i32 to index
    %390 = memref.load %arg1[%389] : memref<8xf32, #tpu.memory_space<smem>>
    %391 = arith.index_cast %c1_i32_98 : i32 to index
    %c0_99 = arith.constant 0 : index
    %c0_100 = arith.constant 0 : index
    %392 = vector.load %arg7[%391, %c0_99, %c0_100] : memref<8x16x128xf32, #tpu.memory_space<vmem>>, vector<1x16x128xf32>
    %393 = vector.shape_cast %392 : vector<1x16x128xf32> to vector<16x128xf32>
    %394 = vector.broadcast %390 : f32 to vector<16x128xf32>
    %395 = arith.mulf %394, %393 : vector<16x128xf32>
    %396 = arith.addf %388, %395 : vector<16x128xf32>
    %c2_i32_101 = arith.constant 2 : i32
    %397 = arith.index_cast %c2_i32_101 : i32 to index
    %398 = memref.load %arg1[%397] : memref<8xf32, #tpu.memory_space<smem>>
    %399 = arith.index_cast %c2_i32_101 : i32 to index
    %c0_102 = arith.constant 0 : index
    %c0_103 = arith.constant 0 : index
    %400 = vector.load %arg7[%399, %c0_102, %c0_103] : memref<8x16x128xf32, #tpu.memory_space<vmem>>, vector<1x16x128xf32>
    %401 = vector.shape_cast %400 : vector<1x16x128xf32> to vector<16x128xf32>
    %402 = vector.broadcast %398 : f32 to vector<16x128xf32>
    %403 = arith.mulf %402, %401 : vector<16x128xf32>
    %404 = arith.addf %396, %403 : vector<16x128xf32>
    %c3_i32_104 = arith.constant 3 : i32
    %405 = arith.index_cast %c3_i32_104 : i32 to index
    %406 = memref.load %arg1[%405] : memref<8xf32, #tpu.memory_space<smem>>
    %407 = arith.index_cast %c3_i32_104 : i32 to index
    %c0_105 = arith.constant 0 : index
    %c0_106 = arith.constant 0 : index
    %408 = vector.load %arg7[%407, %c0_105, %c0_106] : memref<8x16x128xf32, #tpu.memory_space<vmem>>, vector<1x16x128xf32>
    %409 = vector.shape_cast %408 : vector<1x16x128xf32> to vector<16x128xf32>
    %410 = vector.broadcast %406 : f32 to vector<16x128xf32>
    %411 = arith.mulf %410, %409 : vector<16x128xf32>
    %412 = arith.addf %404, %411 : vector<16x128xf32>
    %c4_i32_107 = arith.constant 4 : i32
    %413 = arith.index_cast %c4_i32_107 : i32 to index
    %414 = memref.load %arg1[%413] : memref<8xf32, #tpu.memory_space<smem>>
    %415 = arith.index_cast %c4_i32_107 : i32 to index
    %c0_108 = arith.constant 0 : index
    %c0_109 = arith.constant 0 : index
    %416 = vector.load %arg7[%415, %c0_108, %c0_109] : memref<8x16x128xf32, #tpu.memory_space<vmem>>, vector<1x16x128xf32>
    %417 = vector.shape_cast %416 : vector<1x16x128xf32> to vector<16x128xf32>
    %418 = vector.broadcast %414 : f32 to vector<16x128xf32>
    %419 = arith.mulf %418, %417 : vector<16x128xf32>
    %420 = arith.addf %412, %419 : vector<16x128xf32>
    %c5_i32_110 = arith.constant 5 : i32
    %421 = arith.index_cast %c5_i32_110 : i32 to index
    %422 = memref.load %arg1[%421] : memref<8xf32, #tpu.memory_space<smem>>
    %423 = arith.index_cast %c5_i32_110 : i32 to index
    %c0_111 = arith.constant 0 : index
    %c0_112 = arith.constant 0 : index
    %424 = vector.load %arg7[%423, %c0_111, %c0_112] : memref<8x16x128xf32, #tpu.memory_space<vmem>>, vector<1x16x128xf32>
    %425 = vector.shape_cast %424 : vector<1x16x128xf32> to vector<16x128xf32>
    %426 = vector.broadcast %422 : f32 to vector<16x128xf32>
    %427 = arith.mulf %426, %425 : vector<16x128xf32>
    %428 = arith.addf %420, %427 : vector<16x128xf32>
    %c6_i32_113 = arith.constant 6 : i32
    %429 = arith.index_cast %c6_i32_113 : i32 to index
    %430 = memref.load %arg1[%429] : memref<8xf32, #tpu.memory_space<smem>>
    %431 = arith.index_cast %c6_i32_113 : i32 to index
    %c0_114 = arith.constant 0 : index
    %c0_115 = arith.constant 0 : index
    %432 = vector.load %arg7[%431, %c0_114, %c0_115] : memref<8x16x128xf32, #tpu.memory_space<vmem>>, vector<1x16x128xf32>
    %433 = vector.shape_cast %432 : vector<1x16x128xf32> to vector<16x128xf32>
    %434 = vector.broadcast %430 : f32 to vector<16x128xf32>
    %435 = arith.mulf %434, %433 : vector<16x128xf32>
    %436 = arith.addf %428, %435 : vector<16x128xf32>
    %c7_i32_116 = arith.constant 7 : i32
    %437 = arith.index_cast %c7_i32_116 : i32 to index
    %438 = memref.load %arg1[%437] : memref<8xf32, #tpu.memory_space<smem>>
    %439 = arith.index_cast %c7_i32_116 : i32 to index
    %c0_117 = arith.constant 0 : index
    %c0_118 = arith.constant 0 : index
    %440 = vector.load %arg7[%439, %c0_117, %c0_118] : memref<8x16x128xf32, #tpu.memory_space<vmem>>, vector<1x16x128xf32>
    %441 = vector.shape_cast %440 : vector<1x16x128xf32> to vector<16x128xf32>
    %442 = vector.broadcast %438 : f32 to vector<16x128xf32>
    %443 = arith.mulf %442, %441 : vector<16x128xf32>
    %444 = arith.addf %436, %443 : vector<16x128xf32>
    %c8_i32_119 = arith.constant 8 : i32
    %c0_120 = arith.constant 0 : index
    %c0_121 = arith.constant 0 : index
    %445 = vector.load %arg8[%c0_120, %c0_121] : memref<16x128xf32, #tpu.memory_space<vmem>>, vector<16x128xf32>
    tpu.vector_store %arg8[%c0_120, %c0_121], %444 {strides = array<i32>} : memref<16x128xf32, #tpu.memory_space<vmem>>, vector<16x128xf32>,
    return
  }
  func.func @transform_0(%arg0: i32) -> i32 {
    %c0_i32 = arith.constant 0 : i32
    %c0_i32_0 = arith.constant 0 : i32
    return %c0_i32 : i32
  }
  func.func @transform_1(%arg0: i32) -> (i32, i32, i32) {
    %c0_i32 = arith.constant 0 : i32
    %c0_i32_0 = arith.constant 0 : i32
    %c0_i32_1 = arith.constant 0 : i32
    %c0_i32_2 = arith.constant 0 : i32
    return %c0_i32, %c0_i32_0, %c0_i32_1 : i32, i32, i32
  }
  func.func @transform_2(%arg0: i32) -> (i32, i32) {
    %c0_i32 = arith.constant 0 : i32
    %c0_i32_0 = arith.constant 0 : i32
    %c0_i32_1 = arith.constant 0 : i32
    return %c0_i32, %c0_i32_0 : i32, i32
  }
  func.func @transform_3(%arg0: i32) -> (i32, i32, i32) {
    %c0_i32 = arith.constant 0 : i32
    %c0_i32_0 = arith.constant 0 : i32
    %c0_i32_1 = arith.constant 0 : i32
    %c0_i32_2 = arith.constant 0 : i32
    return %c0_i32, %c0_i32_0, %c0_i32_1 : i32, i32, i32
  }
  func.func @transform_4(%arg0: i32) -> (i32, i32) {
    %c0_i32 = arith.constant 0 : i32
    %c0_i32_0 = arith.constant 0 : i32
    %c0_i32_1 = arith.constant 0 : i32
    return %c0_i32, %c0_i32_0 : i32, i32
  }
  func.func @transform_5(%arg0: i32) -> (i32, i32) {
    %c0_i32 = arith.constant 0 : i32
    %c0_i32_0 = arith.constant 0 : i32
    %c0_i32_1 = arith.constant 0 : i32
    return %c0_i32, %c0_i32_0 : i32, i32
  }
  func.func @transform_6(%arg0: i32) -> (i32, i32, i32) {
    %c0_i32 = arith.constant 0 : i32
    %c0_i32_0 = arith.constant 0 : i32
    %c0_i32_1 = arith.constant 0 : i32
    %c0_i32_2 = arith.constant 0 : i32
    return %c0_i32, %c0_i32_0, %c0_i32_1 : i32, i32, i32
  }
  func.func @transform_7(%arg0: i32) -> (i32, i32) {
    %c0_i32 = arith.constant 0 : i32
    %c0_i32_0 = arith.constant 0 : i32
    %c0_i32_1 = arith.constant 0 : i32
    return %c0_i32, %c0_i32_0 : i32, i32
  }
}

</mosaic_0001>

<bundles_post_ra>
// kernel: tpu_custom_call.1
= control target key start
LH: loop header
LB: loop body
LE: loop exit
PB: predicated region body
PF: predicated region fallthrough
CT: control target
= control target key end

     0   :  { %13 = vsyncpa [#allocation6], 0  ;;  %s6800_s0 = inlined_call_operand.vmem [shape: f32[8], index: 0, kind: input, shape index: {}]   ;;  %s6801_s1 = inlined_call_operand.vmem [shape: f32[8,16,8], index: 1, kind: input, shape index: {}]   ;;  %s6802_s2 = inlined_call_operand.vmem [shape: f32[8,640], index: 2, kind: input, shape index: {}]   ;;  %s6803_s3 = inlined_call_operand.vmem [shape: f32[8,1,640], index: 3, kind: input, shape index: {}]   ;;  %s6804_s4 = inlined_call_operand.hbm [shape: f32[128,512], index: 4, kind: input, shape index: {}]   ;;  %s6805_s5 = inlined_call_operand.vmem [shape: f32[128,128], index: 5, kind: input, shape index: {}]   ;;  %s6806_s6 = inlined_call_operand.hbm [shape: f32[8,16,128], index: 6, kind: output, shape index: {0}]   ;;  %s6807_s7 = inlined_call_operand.hbm [shape: f32[16,128], index: 7, kind: output, shape index: {1}]  }
   0x1   :  { %14 = vsyncpa [#allocation4], 0 }
   0x2   :  { %15 = vsyncpa [#allocation5], 0 }
   0x3   :  { %16 = vsyncpa [#allocation10], 0  ;;  %s23_s26 = sshll.u32 %s6800_s0, 4  ;;  %s24_s26 = int_to_ptr.vmem [resolvable:$true] %s23_s26 }
   0x4   :  { %s5451_s27 = scalar_lea.vmem %s24_s26, 16  ;;  %p5456_p1 = scmp.lt.s32.totalorder %s24_s26, %s24_s26 }
   0x5   :  { %p5452_p0 = scmp.ne.s32.totalorder %s24_s26, %s5451_s27  ;;  %p5457_p2 = scmp.lt.s32.totalorder %s5451_s27, %s5451_s27 }
   0x7   :  { %p5458_p3 = por %p5457_p2, %p5456_p1 }
   0x9   :  { %p5459_p4 = pnand %p5458_p3, %p5452_p0 }
   0xb   :  { %5462 = shalt.err (!%p5459_p4)
}
   0xc   :  { %s5537_s28 = smov [#allocation3]   ;;  %s5538_s29 = smov [#allocation7]  }
   0xd   :  { %26 = dma.vmem_to_smem %s24_s26, 16, %s5537_s28, [#allocation6]  }
   0xe   :  { %s38_s30 = sshll.u32 %s5538_s29, 4  ;;  %s5463_s10 = scalar_lea.hbm %s6804_s4, 8192  ;;  %s39_s30 = int_to_ptr.vmem [resolvable:$true] %s38_s30 }
   0xf   :  { %p5464_p5 = scmp.ne.s32.totalorder %s6804_s4, %s5463_s10  ;;  %p5467_p6 = scmp.lt.u32.totalorder %s5463_s10, %s6804_s4 }
  0x11   :  { %p5469_p7 = pnand %p5467_p6, %p5464_p5 }
  0x13   :  { %5472 = shalt.err (!%p5469_p7)
}
  0x14   :  { %s5473_s14 = scalar_lea.vmem %s39_s30, 8192  ;;  %p5478_p9 = scmp.lt.s32.totalorder %s39_s30, %s39_s30 }
  0x15   :  { %p5474_p8 = scmp.ne.s32.totalorder %s39_s30, %s5473_s14  ;;  %p5479_p10 = scmp.lt.s32.totalorder %s5473_s14, %s5473_s14 }
  0x17   :  { %p5480_p11 = por %p5479_p10, %p5478_p9 }
  0x19   :  { %p5481_p12 = pnand %p5480_p11, %p5474_p8 }
  0x1b   :  { %5484 = shalt.err (!%p5481_p12)
}
  0x1c   :  { %s5539_s15 = smov 512   ;;  %s5540_s16 = smov 32  }
  0x1d   :  { %44 = dma.hbm_to_vmem [thread:$0]  %s6804_s4, 8192, %s39_s30, [#allocation4], %s5539_s15, %s5539_s15, %s5540_s16  }
  0x1e   :  { %5529 = dma.done.wait [#allocation6], 16  }
  0x1f   :  { %5530 = vsyncadd [#allocation6], 4294967280 }
  0x20   :  { %5531 = dma.done.wait [#allocation4], 8192  }
  0x21   :  { %5532 = vsyncadd [#allocation4], 4294959104 }
  0x22   :  { %53 = sfence }
  0x23   :  { %v71_v0 = vld [vmem:[%s6802_s2 + $0x8] sm:$0xff]  ;;  %v70_v1 = vld [vmem:[%s6802_s2] sm:$0xff]  ;;  %vm75_vm0 = vcmask 64512   ;;  %v6808_v5 = vmov 0.0   ;;  %v73_v6 = vld [vmem:[%s6802_s2 + $0x18] sm:$0xff]  ;;  %s6742_s0 = sld [smem:[#allocation3]] }
  0x24   :  { %124 = vmatprep.subr.mxu0 %v71_v0  ;;  %5051 = vmatprep.subr.mxu1 %v71_v0  ;;  %v5610_v2 = vld [vmem:[%s6801_s1] sm:$0xff]  ;;  %v5615_v3 = vld [vmem:[%s6801_s1 + $0x68] sm:$0xff]  ;;  %v5638_v8 = vld [vmem:[%s6801_s1 + $0x70] sm:$0xff]  ;;  %s6744_s13 = sld [smem:[#allocation3 + $0x2]]  ;;  %s6748_s14 = sld [smem:[#allocation3 + $0x4]] }
  0x25   :  { %125 = vmatpush1.msra.mxu0 %v70_v1  ;;  %5052 = vmatpush1.msra.mxu1 %v70_v1  ;;  %v74_v4 = vld [vmem:[%s6802_s2 + $0x20] sm:$0xff]  ;;  %v5633_v7 = vld [vmem:[%s6801_s1 + $0x8] sm:$0xff]  ;;  %v1098_v9 = vld [vmem:[#allocation7 + $0x18] sm:$0xff]  ;;  %s6750_s15 = sld [smem:[#allocation3 + $0x5]]  ;;  %s5542_s16 = smov [#allocation8]  }
  0x26   :  { %188 = vmatprep.mubr.f32.mxu0 %v6808_v5  ;;  %266 = vmatprep.mubr.f32.mxu1 %v6808_v5  ;;  %v1102_v10 = vld [vmem:[#allocation7 + $0x38] sm:$0xff]  ;;  %v72_v11 = vld [vmem:[%s6802_s2 + $0x10] sm:$0xff]  ;;  %v1096_v15 = vld [vmem:[#allocation7 + $0x8] sm:$0xff]  ;;  %s6754_s2 = sld [smem:[#allocation3 + $0x6]]  ;;  %s3668_s17 = sshll.u32 %s5542_s16, 4  ;;  %s6760_s17 = int_to_ptr.vmem [resolvable:$true] %s3668_s17 }
  0x27   :  { %3697 = vmatmul.mubr.msk.f32.vlgmr.msra.gmra.mrb[0].mxu0 %vm75_vm0, %v5610_v2  ;;  %3710 = vmatmul.mubr.msk.f32.vlgmr.msra.gmra.mrb[0].mxu1 %vm75_vm0, %v5615_v3  ;;  %v5644_v12 = vpack.c.bf16 %v1102_v10, %v1098_v9  ;;  %v5655_v13 = vld [vmem:[%s6801_s1 + $0x10] sm:$0xff]  ;;  %v5660_v14 = vld [vmem:[%s6801_s1 + $0x78] sm:$0xff]  ;;  %v1100_v16 = vld [vmem:[#allocation7 + $0x28] sm:$0xff]  ;;  %s6758_s18 = sld [smem:[#allocation3 + $0x7]]  ;;  %s5485_s19 = scalar_lea.vmem %s6760_s17, 2048 }
  0x28   :  { %3977 = vmatprep.subr.mxu0 %v74_v4  ;;  %194 = vmatprep.mubr.f32.mxu0 %v6808_v5  ;;  %v1097_v17 = vld [vmem:[#allocation7 + $0x10] sm:$0xff]  ;;  %v5663_v19 = vpack.c.bf16 %v1100_v16, %v1096_v15  ;;  %v1106_v20 = vld [vmem:[#allocation7 + $0x58] sm:$0xff]  ;;  %v5690_v29 = vld [vmem:[%s6801_s1 + $0x20] sm:$0xff]  ;;  %p5486_p13 = scmp.ne.s32.totalorder %s6760_s17, %s5485_s19  ;;  %p5490_p0 = scmp.lt.s32.totalorder %s6760_s17, %s6760_s17 }
  0x29   :  { %3978 = vmatpush3.msra.mxu0 %v74_v4  ;;  %272 = vmatprep.mubr.f32.mxu1 %v6808_v5  ;;  %v1101_v18 = vld [vmem:[#allocation7 + $0x30] sm:$0xff]  ;;  %v1110_v21 = vld [vmem:[#allocation7 + $0x78] sm:$0xff]  ;;  %v5707_v36 = vld [vmem:[%s6801_s1 + $0x28] sm:$0xff]  ;;  %p5491_p1 = scmp.lt.s32.totalorder %s5485_s19, %s5485_s19 }
  0x2a   :  { %285 = vmatprep.subr.mxu1 %v73_v6  ;;  %v5674_v22 = vld [vmem:[%s6801_s1 + $0x18] sm:$0xff]  ;;  %v5676_v23 = vpack.c.bf16 %v1101_v18, %v1097_v17  ;;  %4284 = vmatprep.subr.bf16.mxu0 %v5663_v19  ;;  %v5679_v24 = vpack.c.bf16 %v1110_v21, %v1106_v20  ;;  %v1105_v25 = vld [vmem:[#allocation7 + $0x50] sm:$0xff]  ;;  %v5758_v57 = vld [vmem:[%s6801_s1 + $0x40] sm:$0xff] }
  0x2b   :  { %3698 = vmatmul.mubr.msk.f32.gmra.mrb[2].mxu0 %vm75_vm0, %v5633_v7  ;;  %3711 = vmatmul.mubr.msk.f32.gmra.mrb[2].mxu1 %vm75_vm0, %v5638_v8  ;;  %v1109_v26 = vld [vmem:[#allocation7 + $0x70] sm:$0xff]  ;;  %v1114_v27 = vld [vmem:[#allocation7 + $0x98] sm:$0xff]  ;;  %v5775_v0 = vld [vmem:[%s6801_s1 + $0x48] sm:$0xff]  ;;  %p5492_p2 = por %p5491_p1, %p5490_p0 }
  0x2c   :  { %200 = vmatprep.mubr.f32.mxu0 %v6808_v5  ;;  %278 = vmatprep.mubr.f32.mxu1 %v6808_v5  ;;  %v1118_v28 = vld [vmem:[#allocation7 + $0xb8] sm:$0xff]  ;;  %v5693_v30 = vpack.c.bf16 %v1109_v26, %v1105_v25  ;;  %v1113_v32 = vld [vmem:[#allocation7 + $0x90] sm:$0xff]  ;;  %v5819_v16 = vld [vmem:[%s6801_s1 + $0x60] sm:$0xff] }
  0x2d   :  { %286 = vmatpush1.msra.mxu1 %v72_v11  ;;  %v5696_v31 = vpack.c.bf16 %v1118_v28, %v1114_v27  ;;  %v1117_v33 = vld [vmem:[#allocation7 + $0xb0] sm:$0xff]  ;;  %v1122_v34 = vld [vmem:[#allocation7 + $0xd8] sm:$0xff]  ;;  %v1095_v17 = vld [vmem:[#allocation7] sm:$0xff]  ;;  %p5493_p3 = pnand %p5492_p2, %p5486_p13 }
  0x2e   :  { %4316 = vmatprep.subr.bf16.mxu1 %v5644_v12  ;;  %v1126_v35 = vld [vmem:[#allocation7 + $0xf8] sm:$0xff]  ;;  %v5710_v37 = vpack.c.bf16 %v1117_v33, %v1113_v32  ;;  %v1121_v39 = vld [vmem:[#allocation7 + $0xd0] sm:$0xff]  ;;  %v1099_v18 = vld [vmem:[#allocation7 + $0x20] sm:$0xff] }
  0x2f   :  { %3699 = vmatmul.mubr.msk.f32.gmra.mrb[4].mxu0 %vm75_vm0, %v5655_v13  ;;  %3712 = vmatmul.mubr.msk.f32.gmra.mrb[4].mxu1 %vm75_vm0, %v5660_v14  ;;  %v5713_v38 = vpack.c.bf16 %v1126_v35, %v1122_v34  ;;  %v1125_v40 = vld [vmem:[#allocation7 + $0xf0] sm:$0xff]  ;;  %v1130_v41 = vld [vmem:[#allocation7 + $0x118] sm:$0xff]  ;;  %v1104_v20 = vld [vmem:[#allocation7 + $0x48] sm:$0xff]  ;;  %v5828_v25 = vpack.c.bf16 %v1099_v18, %v1095_v17 }
  0x30   :  { %206 = vmatprep.mubr.f32.mxu0 %v6808_v5  ;;  %349 = vmatprep.mubr.f32.mxu1 %v6808_v5  ;;  %v1134_v42 = vld [vmem:[#allocation7 + $0x138] sm:$0xff]  ;;  %v5724_v43 = vld [vmem:[%s6801_s1 + $0x30] sm:$0xff]  ;;  %v5727_v44 = vpack.c.bf16 %v1125_v40, %v1121_v39  ;;  %v1108_v21 = vld [vmem:[#allocation7 + $0x68] sm:$0xff] }
  0x31   :  { %v5730_v45 = vpack.c.bf16 %v1134_v42, %v1130_v41  ;;  %v1129_v46 = vld [vmem:[#allocation7 + $0x110] sm:$0xff]  ;;  %v1138_v48 = vld [vmem:[#allocation7 + $0x158] sm:$0xff]  ;;  %v5830_v26 = vpack.c.bf16 %v1108_v21, %v1104_v20  ;;  %v1103_v27 = vld [vmem:[#allocation7 + $0x40] sm:$0xff] }
  0x32   :  { %v1133_v47 = vld [vmem:[#allocation7 + $0x130] sm:$0xff]  ;;  %v1142_v49 = vld [vmem:[#allocation7 + $0x178] sm:$0xff]  ;;  %v1107_v28 = vld [vmem:[#allocation7 + $0x60] sm:$0xff] }
  0x33   :  { %3700 = vmatmul.mubr.msk.f32.gmra.mrb[6].mxu0 %vm75_vm0, %v5674_v22  ;;  %3713 = vmatmul.mubr.msk.f32.vlgmr.msra.gmra.mrb[6].mxu1 %vm75_vm0, %v5610_v2  ;;  %v5741_v50 = vld [vmem:[%s6801_s1 + $0x38] sm:$0xff]  ;;  %v5744_v51 = vpack.c.bf16 %v1133_v47, %v1129_v46  ;;  %v5747_v52 = vpack.c.bf16 %v1142_v49, %v1138_v48  ;;  %v1137_v53 = vld [vmem:[#allocation7 + $0x150] sm:$0xff]  ;;  %6852 = vst [vmem:[#allocation15_spill] sm:$0xff] %v5830_v26  ;;  %v1112_v32 = vld [vmem:[#allocation7 + $0x88] sm:$0xff] }
  0x34   :  { %212 = vmatprep.mubr.f32.mxu0 %v6808_v5  ;;  %355 = vmatprep.mubr.f32.mxu1 %v6808_v5  ;;  %v1141_v54 = vld [vmem:[#allocation7 + $0x170] sm:$0xff]  ;;  %v1146_v55 = vld [vmem:[#allocation7 + $0x198] sm:$0xff]  ;;  %v1116_v33 = vld [vmem:[#allocation7 + $0xa8] sm:$0xff]  ;;  %v5838_v34 = vpack.c.bf16 %v1107_v28, %v1103_v27 }
  0x35   :  { %4318 = vmatpush1.bf16.msra.mxu1 %v5676_v23  ;;  %v1150_v56 = vld [vmem:[#allocation7 + $0x1b8] sm:$0xff]  ;;  %v5761_v58 = vpack.c.bf16 %v1141_v54, %v1137_v53  ;;  %v1145_v60 = vld [vmem:[#allocation7 + $0x190] sm:$0xff]  ;;  %v1111_v35 = vld [vmem:[#allocation7 + $0x80] sm:$0xff] }
  0x36   :  { %4320 = vmatprep.subr.bf16.mxu1 %v5679_v24  ;;  %v5764_v59 = vpack.c.bf16 %v1150_v56, %v1146_v55  ;;  %v1149_v61 = vld [vmem:[#allocation7 + $0x1b0] sm:$0xff]  ;;  %v1154_v62 = vld [vmem:[#allocation7 + $0x1d8] sm:$0xff]  ;;  %6853 = vst [vmem:[#allocation16_spill] sm:$0xff] %v5838_v34  ;;  %v1115_v39 = vld [vmem:[#allocation7 + $0xa0] sm:$0xff] }
  0x37   :  { %3701 = vmatmul.mubr.msk.f32.gmra.mrb[8].mxu0 %vm75_vm0, %v5690_v29  ;;  %3714 = vmatmul.mubr.msk.f32.gmra.mrb[8].mxu1 %vm75_vm0, %v5633_v7  ;;  %v1158_v63 = vld [vmem:[#allocation7 + $0x1f8] sm:$0xff]  ;;  %v5778_v1 = vpack.c.bf16 %v1149_v61, %v1145_v60  ;;  %v1153_v6 = vld [vmem:[#allocation7 + $0x1d0] sm:$0xff]  ;;  %v1120_v40 = vld [vmem:[#allocation7 + $0xc8] sm:$0xff] }
  0x38   :  { %218 = vmatprep.mubr.f32.mxu0 %v6808_v5  ;;  %361 = vmatprep.mubr.f32.mxu1 %v6808_v5  ;;  %v5781_v4 = vpack.c.bf16 %v1158_v63, %v1154_v62  ;;  %v1157_v9 = vld [vmem:[#allocation7 + $0x1f0] sm:$0xff]  ;;  %v5807_v15 = vld [vmem:[%s6801_s1 + $0x58] sm:$0xff]  ;;  %v1124_v41 = vld [vmem:[#allocation7 + $0xe8] sm:$0xff] }
  0x39   :  { %4322 = vmatpush1.bf16.msra.mxu1 %v5693_v30  ;;  %v5792_v10 = vld [vmem:[%s6801_s1 + $0x50] sm:$0xff]  ;;  %v5795_v11 = vpack.c.bf16 %v1157_v9, %v1153_v6  ;;  %v1119_v42 = vld [vmem:[#allocation7 + $0xc0] sm:$0xff]  ;;  %v1128_v47 = vld [vmem:[#allocation7 + $0x108] sm:$0xff] }
  0x3a   :  { %4324 = vmatprep.subr.bf16.mxu1 %v5696_v31  ;;  %v1123_v46 = vld [vmem:[#allocation7 + $0xe0] sm:$0xff]  ;;  %v1132_v48 = vld [vmem:[#allocation7 + $0x128] sm:$0xff]  ;;  %v1162_v21 = vld [vmem:[%s6805_s5 + $0x18] sm:$0xff] }
  0x3b   :  { %3702 = vmatmul.mubr.msk.f32.gmra.mrb[10].mxu0 %vm75_vm0, %v5707_v36  ;;  %3715 = vmatmul.mubr.msk.f32.gmra.mrb[10].mxu1 %vm75_vm0, %v5655_v13  ;;  %v1127_v49 = vld [vmem:[#allocation7 + $0x100] sm:$0xff]  ;;  %v1136_v54 = vld [vmem:[#allocation7 + $0x148] sm:$0xff] }
  0x3c   :  { %224 = vmatprep.mubr.f32.mxu0 %v6808_v5  ;;  %367 = vmatprep.mubr.f32.mxu1 %v6808_v5  ;;  %v1131_v53 = vld [vmem:[#allocation7 + $0x120] sm:$0xff]  ;;  %v1140_v55 = vld [vmem:[#allocation7 + $0x168] sm:$0xff] }
  0x3d   :  { %4326 = vmatpush1.bf16.msra.mxu1 %v5710_v37  ;;  %v1135_v56 = vld [vmem:[#allocation7 + $0x140] sm:$0xff]  ;;  %v1144_v61 = vld [vmem:[#allocation7 + $0x188] sm:$0xff] }
  0x3e   :  { %4328 = vmatprep.subr.bf16.mxu1 %v5713_v38  ;;  %v1139_v60 = vld [vmem:[#allocation7 + $0x160] sm:$0xff]  ;;  %v1148_v62 = vld [vmem:[#allocation7 + $0x1a8] sm:$0xff] }
  0x3f   :  { %3703 = vmatmul.mubr.msk.f32.gmra.mrb[12].mxu0 %vm75_vm0, %v5724_v43  ;;  %3716 = vmatmul.mubr.msk.f32.gmra.mrb[12].mxu1 %vm75_vm0, %v5674_v22  ;;  %v1143_v63 = vld [vmem:[#allocation7 + $0x180] sm:$0xff]  ;;  %v1152_v9 = vld [vmem:[#allocation7 + $0x1c8] sm:$0xff] }
  0x40   :  { %230 = vmatprep.mubr.f32.mxu0 %v6808_v5  ;;  %373 = vmatprep.mubr.f32.mxu1 %v6808_v5  ;;  %v1147_v6 = vld [vmem:[#allocation7 + $0x1a0] sm:$0xff]  ;;  %v1156_v17 = vld [vmem:[#allocation7 + $0x1e8] sm:$0xff] }
  0x41   :  { %4330 = vmatpush1.bf16.msra.mxu1 %v5727_v44  ;;  %v1151_v18 = vld [vmem:[#allocation7 + $0x1c0] sm:$0xff] }
  0x42   :  { %4332 = vmatprep.subr.bf16.mxu1 %v5730_v45  ;;  %v1155_v20 = vld [vmem:[#allocation7 + $0x1e0] sm:$0xff] }
  0x43   :  { %3704 = vmatmul.mubr.msk.f32.gmra.mrb[14].mxu0 %vm75_vm0, %v5741_v50  ;;  %3717 = vmatmul.mubr.msk.f32.gmra.mrb[14].mxu1 %vm75_vm0, %v5690_v29  ;;  %v1163_v28 = vld [vmem:[%s6805_s5 + $0x20] sm:$0xff] }
  0x44   :  { %236 = vmatprep.mubr.f32.mxu0 %v6808_v5  ;;  %379 = vmatprep.mubr.f32.mxu1 %v6808_v5 }
  0x45   :  { %4334 = vmatpush1.bf16.msra.mxu1 %v5744_v51 }
  0x46   :  { %4336 = vmatprep.subr.bf16.mxu1 %v5747_v52 }
  0x47   :  { %3705 = vmatmul.mubr.msk.f32.gmra.mrb[16].mxu0 %vm75_vm0, %v5758_v57  ;;  %3718 = vmatmul.mubr.msk.f32.gmra.mrb[16].mxu1 %vm75_vm0, %v5707_v36 }
  0x48   :  { %242 = vmatprep.mubr.f32.mxu0 %v6808_v5  ;;  %385 = vmatprep.mubr.f32.mxu1 %v6808_v5 }
  0x49   :  { %4338 = vmatpush1.bf16.msra.mxu1 %v5761_v58 }
  0x4a   :  { %4340 = vmatprep.subr.bf16.mxu1 %v5764_v59 }
  0x4b   :  { %3706 = vmatmul.mubr.msk.f32.gmra.mrb[18].mxu0 %vm75_vm0, %v5775_v0  ;;  %3719 = vmatmul.mubr.msk.f32.gmra.mrb[18].mxu1 %vm75_vm0, %v5724_v43 }
  0x4c   :  { %248 = vmatprep.mubr.f32.mxu0 %v6808_v5  ;;  %391 = vmatprep.mubr.f32.mxu1 %v6808_v5 }
  0x4d   :  { %4342 = vmatpush1.bf16.msra.mxu1 %v5778_v1 }
  0x4e   :  { %4344 = vmatprep.subr.bf16.mxu1 %v5781_v4 }
  0x4f   :  { %3707 = vmatmul.mubr.msk.f32.gmra.mrb[20].mxu0 %vm75_vm0, %v5792_v10  ;;  %3720 = vmatmul.mubr.msk.f32.gmra.mrb[20].mxu1 %vm75_vm0, %v5741_v50 }
  0x50   :  { %254 = vmatprep.mubr.f32.mxu0 %v6808_v5  ;;  %397 = vmatprep.mubr.f32.mxu1 %v6808_v5 }
  0x51   :  { %4346 = vmatpush1.bf16.msra.mxu1 %v5795_v11 }
  0x53   :  { %3708 = vmatmul.mubr.msk.f32.gmra.mrb[22].mxu0 %vm75_vm0, %v5807_v15  ;;  %3721 = vmatmul.mubr.msk.f32.gmra.mrb[22].mxu1 %vm75_vm0, %v5758_v57 }
  0x54   :  { %260 = vmatprep.mubr.f32.mxu0 %v6808_v5  ;;  %403 = vmatprep.mubr.f32.mxu1 %v6808_v5 }
  0x57   :  { %3709 = vmatmul.mubr.msk.f32.gmra.mrb[24].mxu0 %vm75_vm0, %v5819_v16  ;;  %3722 = vmatmul.mubr.msk.f32.gmra.mrb[24].mxu1 %vm75_vm0, %v5775_v0 }
  0x58   :  { %409 = vmatprep.mubr.f32.mxu1 %v6808_v5  ;;  %3979 = vmatprep.mubr.msk.f32.mxu0 %vm75_vm0, %v5610_v2  ;;  %v5843_v2 = vpack.c.bf16 %v1116_v33, %v1112_v32  ;;  %v1164_v32 = vld [vmem:[%s6805_s5 + $0x28] sm:$0xff] }
  0x59   :  { %v5972_v33 = vpack.c.bf16 %v1164_v32, %v1163_v28 }
  0x5a   :  { %6854 = vst [vmem:[#allocation17_spill] sm:$0xff] %v5843_v2 }
  0x5b   :  { %3723 = vmatmul.mubr.msk.f32.gmra.mrb[26].mxu1 %vm75_vm0, %v5792_v10  ;;  %3980 = vmatmul.mubr.msk.f32.vlgmr.msra.gmra.mrb[26].mxu0 %vm75_vm0, %v5633_v7  ;;  %v5851_v7 = vpack.c.bf16 %v1115_v39, %v1111_v35  ;;  %v1165_v35 = vld [vmem:[%s6805_s5 + $0x30] sm:$0xff]  ;;  %v1166_v39 = vld [vmem:[%s6805_s5 + $0x38] sm:$0xff] }
  0x5c   :  { %4286 = vmatpush1.bf16.msra.mxu0 %v5828_v25  ;;  %415 = vmatprep.mubr.f32.mxu1 %v6808_v5 }
  0x5d   :  { %3982 = vmatprep.mubr.msk.f32.mxu0 %vm75_vm0, %v5655_v13  ;;  %4288 = vmatprep.subr.bf16.mxu0 %v5830_v26  ;;  %6855 = vst [vmem:[#allocation18_spill] sm:$0xff] %v5851_v7  ;;  %v5856_v13 = vpack.c.bf16 %v1124_v41, %v1120_v40  ;;  %v5982_v40 = vpack.c.bf16 %v1166_v39, %v1165_v35  ;;  %v1167_v41 = vld [vmem:[%s6805_s5 + $0x40] sm:$0xff] }
  0x5f   :  { %3724 = vmatmul.mubr.msk.f32.gmra.mrb[28].mxu1 %vm75_vm0, %v5807_v15  ;;  %3983 = vmatmul.mubr.msk.f32.gmra.mrb[28].mxu0 %vm75_vm0, %v5674_v22  ;;  %6856 = vst [vmem:[#allocation19_spill] sm:$0xff] %v5856_v13  ;;  %v5864_v22 = vpack.c.bf16 %v1123_v46, %v1119_v42  ;;  %v1168_v42 = vld [vmem:[%s6805_s5 + $0x48] sm:$0xff] }
  0x60   :  { %4290 = vmatpush1.bf16.msra.mxu0 %v5838_v34  ;;  %421 = vmatprep.mubr.f32.mxu1 %v6808_v5  ;;  %v5992_v46 = vpack.c.bf16 %v1168_v42, %v1167_v41 }
  0x61   :  { %3985 = vmatprep.mubr.msk.f32.mxu0 %vm75_vm0, %v5690_v29  ;;  %4292 = vmatprep.subr.bf16.mxu0 %v5843_v2  ;;  %6857 = vst [vmem:[#allocation20_spill] sm:$0xff] %v5864_v22  ;;  %v5869_v29 = vpack.c.bf16 %v1132_v48, %v1128_v47  ;;  %v1169_v47 = vld [vmem:[%s6805_s5 + $0x50] sm:$0xff]  ;;  %v1170_v48 = vld [vmem:[%s6805_s5 + $0x58] sm:$0xff] }
  0x63   :  { %3725 = vmatmul.mubr.msk.f32.gmra.mrb[30].mxu1 %vm75_vm0, %v5819_v16  ;;  %3986 = vmatmul.mubr.msk.f32.gmra.mrb[30].mxu0 %vm75_vm0, %v5707_v36  ;;  %6858 = vst [vmem:[#allocation21_spill] sm:$0xff] %v5869_v29  ;;  %v5877_v36 = vpack.c.bf16 %v1131_v53, %v1127_v49  ;;  %v6002_v49 = vpack.c.bf16 %v1170_v48, %v1169_v47  ;;  %v1171_v53 = vld [vmem:[%s6805_s5 + $0x60] sm:$0xff]  ;;  %v6066_v48 = vld [vmem:[%s6803_s3 + $0xa] sm:$0x1f] }
  0x64   :  { %4294 = vmatpush1.bf16.msra.mxu0 %v5851_v7  ;;  %427 = vmatprep.mubr.f32.mxu1 %v6808_v5  ;;  %6872 = vst [vmem:[#allocation35_spill] sm:$0xff] %v6066_v48 }
  0x65   :  { %3988 = vmatprep.mubr.msk.f32.mxu0 %vm75_vm0, %v5724_v43  ;;  %4296 = vmatprep.subr.bf16.mxu0 %v5856_v13  ;;  %6859 = vst [vmem:[#allocation22_spill] sm:$0xff] %v5877_v36  ;;  %v5882_v43 = vpack.c.bf16 %v1140_v55, %v1136_v54  ;;  %v1172_v54 = vld [vmem:[%s6805_s5 + $0x68] sm:$0xff] }
  0x66   :  { %v6012_v55 = vpack.c.bf16 %v1172_v54, %v1171_v53 }
  0x67   :  { %3726 = vmatmul.mubr.msk.f32.gmra.mrb[32].mxu1 %vm75_vm0, %v5615_v3  ;;  %3989 = vmatmul.mubr.msk.f32.gmra.mrb[32].mxu0 %vm75_vm0, %v5741_v50  ;;  %6860 = vst [vmem:[#allocation23_spill] sm:$0xff] %v5882_v43  ;;  %v5890_v50 = vpack.c.bf16 %v1139_v60, %v1135_v56  ;;  %v1173_v56 = vld [vmem:[%s6805_s5 + $0x70] sm:$0xff]  ;;  %v1174_v60 = vld [vmem:[%s6805_s5 + $0x78] sm:$0xff] }
  0x68   :  { %4298 = vmatpush1.bf16.msra.mxu0 %v5864_v22  ;;  %433 = vmatprep.mubr.f32.mxu1 %v6808_v5 }
  0x69   :  { %3991 = vmatprep.mubr.msk.f32.mxu0 %vm75_vm0, %v5758_v57  ;;  %4300 = vmatprep.subr.bf16.mxu0 %v5869_v29  ;;  %6861 = vst [vmem:[#allocation24_spill] sm:$0xff] %v5890_v50  ;;  %v5895_v57 = vpack.c.bf16 %v1148_v62, %v1144_v61  ;;  %v6022_v61 = vpack.c.bf16 %v1174_v60, %v1173_v56 }
  0x6b   :  { %3727 = vmatmul.mubr.msk.f32.gmra.mrb[34].mxu1 %vm75_vm0, %v5638_v8  ;;  %3992 = vmatmul.mubr.msk.f32.gmra.mrb[34].mxu0 %vm75_vm0, %v5775_v0  ;;  %6862 = vst [vmem:[#allocation25_spill] sm:$0xff] %v5895_v57  ;;  %v5904_v0 = vpack.c.bf16 %v1147_v6, %v1143_v63 }
  0x6c   :  { %4302 = vmatpush1.bf16.msra.mxu0 %v5877_v36  ;;  %439 = vmatprep.mubr.f32.mxu1 %v6808_v5 }
  0x6d   :  { %3994 = vmatprep.mubr.msk.f32.mxu0 %vm75_vm0, %v5792_v10  ;;  %4304 = vmatprep.subr.bf16.mxu0 %v5882_v43  ;;  %6863 = vst [vmem:[#allocation26_spill] sm:$0xff] %v5904_v0  ;;  %v5908_v10 = vpack.c.bf16 %v1156_v17, %v1152_v9 }
  0x6f   :  { %3728 = vmatmul.mubr.msk.f32.gmra.mrb[36].mxu1 %vm75_vm0, %v5660_v14  ;;  %3995 = vmatmul.mubr.msk.f32.gmra.mrb[36].mxu0 %vm75_vm0, %v5807_v15  ;;  %6864 = vst [vmem:[#allocation27_spill] sm:$0xff] %v5908_v10  ;;  %v5916_v15 = vpack.c.bf16 %v1155_v20, %v1151_v18  ;;  %v607_v20 = vlaneseq }
  0x70   :  { %4306 = vmatpush1.bf16.msra.mxu0 %v5890_v50  ;;  %3997 = vmatprep.mubr.msk.f32.mxu0 %vm75_vm0, %v5819_v16  ;;  %v1161_v16 = vld [vmem:[%s6805_s5 + $0x10] sm:$0xff] }
  0x71   :  { %1326 = vmatprep.mubr.f32.mxu1 %v6808_v5  ;;  %4308 = vmatprep.subr.bf16.mxu0 %v5895_v57  ;;  %6865 = vst [vmem:[#allocation28_spill] sm:$0xff] %v5916_v15  ;;  %v5962_v27 = vpack.c.bf16 %v1162_v21, %v1161_v16  ;;  %v6043_v16 = vshrl.u32 %v607_v20, 7  ;;  %v6048_v21 = vld [vmem:[%s6803_s3 + $0x5] sm:$0x1f] }
  0x73   :  { %3998 = vmatmul.mubr.msk.f32.gmra.mrb[38].mxu0 %vm75_vm0, %v5615_v3  ;;  %1327 = vmatmul.mubr.f32.vlgmr.msra.gmra.mrb[38].mxu1 %v6808_v5  ;;  %v1159_v3 = vld [vmem:[%s6805_s5] sm:$0xff]  ;;  %v6051_v28 = vsub.s32 3, %v6043_v16 }
  0x74   :  { %4310 = vmatpush1.bf16.msra.mxu0 %v5904_v0  ;;  %4000 = vmatprep.mubr.msk.f32.mxu0 %vm75_vm0, %v5638_v8  ;;  %v1160_v8 = vld [vmem:[%s6805_s5 + $0x8] sm:$0xff]  ;;  %s6746_s5 = sld [smem:[#allocation3 + $0x3]] }
  0x75   :  { %1332 = vmatprep.mubr.f32.mxu1 %v6808_v5  ;;  %4312 = vmatprep.subr.bf16.mxu0 %v5908_v10  ;;  %v642_v39 = vrot.slane %v6048_v21, %v6051_v28  ;;  %v662_v60 = vrot.slane %v6066_v48, %v6051_v28 }
  0x77   :  { %4001 = vmatmul.mubr.msk.f32.gmra.mrb[40].mxu0 %vm75_vm0, %v5660_v14  ;;  %1333 = vmatmul.mubr.f32.gmra.mrb[40].mxu1 %v6808_v5  ;;  %v5951_v14 = vpack.c.bf16 %v1160_v8, %v1159_v3 }
  0x78   :  { %4314 = vmatpush1.bf16.msra.mxu0 %v5916_v15  ;;  %1249 = vmatprep.mubr.f32.mxu0 %v6808_v5 }
  0x79   :  { %4380 = vmatprep.subr.bf16.mxu0 %v5663_v19  ;;  %4348 = vmatprep.subr.bf16.mxu1 %v5951_v14 }
  0x7a   :  { %4350 = vmatpush3.bf16.msra.mxu1 %v5951_v14 }
  0x7b   :  { %1250 = vmatmul.mubr.f32.vlgmr.msra.gmra.mrb[0].mxu0 %v6808_v5  ;;  %4352 = vmatprep.subr.bf16.mxu1 %v5962_v27 }
  0x7c   :  { %1255 = vmatprep.mubr.f32.mxu0 %v6808_v5  ;;  %4382 = vmatpush1.bf16.msra.mxu0 %v5828_v25 }
  0x7d   :  { %4384 = vmatprep.subr.bf16.mxu0 %v5830_v26 }
  0x7e   :  { %4354 = vmatpush3.bf16.msra.mxu1 %v5962_v27 }
  0x7f   :  { %1256 = vmatmul.mubr.f32.gmra.mrb[2].mxu0 %v6808_v5  ;;  %4356 = vmatprep.subr.bf16.mxu1 %v5972_v33 }
  0x80   :  { %4386 = vmatpush1.bf16.msra.mxu0 %v5838_v34  ;;  %1551 = vmatprep.mubr.f32.mxu0 %v6808_v5 }
  0x81   :  { %4388 = vmatprep.subr.bf16.mxu0 %v5843_v2 }
  0x82   :  { %4358 = vmatpush3.bf16.msra.mxu1 %v5972_v33 }
  0x83   :  { %4360 = vmatprep.subr.bf16.mxu1 %v5982_v40 }
  0x84   :  { %4390 = vmatpush1.bf16.msra.mxu0 %v5851_v7 }
  0x85   :  { %4392 = vmatprep.subr.bf16.mxu0 %v5856_v13 }
  0x86   :  { %4362 = vmatpush3.bf16.msra.mxu1 %v5982_v40 }
  0x87   :  { %4364 = vmatprep.subr.bf16.mxu1 %v5992_v46 }
  0x88   :  { %4394 = vmatpush1.bf16.msra.mxu0 %v5864_v22 }
  0x89   :  { %4396 = vmatprep.subr.bf16.mxu0 %v5869_v29 }
  0x8a   :  { %4366 = vmatpush3.bf16.msra.mxu1 %v5992_v46 }
  0x8b   :  { %4368 = vmatprep.subr.bf16.mxu1 %v6002_v49 }
  0x8c   :  { %4398 = vmatpush1.bf16.msra.mxu0 %v5877_v36 }
  0x8d   :  { %4400 = vmatprep.subr.bf16.mxu0 %v5882_v43 }
  0x8e   :  { %4370 = vmatpush3.bf16.msra.mxu1 %v6002_v49 }
  0x8f   :  { %4372 = vmatprep.subr.bf16.mxu1 %v6012_v55 }
  0x90   :  { %4402 = vmatpush1.bf16.msra.mxu0 %v5890_v50 }
  0x91   :  { %4404 = vmatprep.subr.bf16.mxu0 %v5895_v57 }
  0x92   :  { %4374 = vmatpush3.bf16.msra.mxu1 %v6012_v55 }
  0x93   :  { %4376 = vmatprep.subr.bf16.mxu1 %v6022_v61 }
  0x94   :  { %4406 = vmatpush1.bf16.msra.mxu0 %v5904_v0 }
  0x95   :  { %4408 = vmatprep.subr.bf16.mxu0 %v5908_v10 }
  0x96   :  { %4378 = vmatpush3.bf16.msra.mxu1 %v6022_v61 }
  0x97   :  { %4412 = vmatprep.subr.bf16.mxu1 %v5644_v12 }
  0x98   :  { %4410 = vmatpush1.bf16.msra.mxu0 %v5916_v15 }
  0x99   :  { %4444 = vmatprep.subr.bf16.mxu0 %v5951_v14 }
  0xfa   :  { %v6027_v62 = vpop.f32.mrb[0].mxu1 }
  0xfb   :  { %6866 = vst [vmem:[#allocation29_spill] sm:$0xff] %v6027_v62  ;;  %v6029_v63 = vpop.f32.mrb[1].mxu1 }
  0xfc   :  { %6867 = vst [vmem:[#allocation30_spill] sm:$0xff] %v6029_v63 }
  0xfe   :  { %v6031_v6 = vpop.f32.mrb[2].mxu1 }
  0xff   :  { %6868 = vst [vmem:[#allocation31_spill] sm:$0xff] %v6031_v6  ;;  %v6033_v9 = vpop.f32.mrb[3].mxu1 }
 0x100   :  { %6869 = vst [vmem:[#allocation32_spill] sm:$0xff] %v6033_v9 }
 0x102   :  { %v6035_v17 = vpop.f32.mrb[4].mxu1 }
 0x103   :  { %6870 = vst [vmem:[#allocation33_spill] sm:$0xff] %v6035_v17  ;;  %v6037_v18 = vpop.f32.mrb[5].mxu1 }
 0x104   :  { %6871 = vst [vmem:[#allocation34_spill] sm:$0xff] %v6037_v18 }
 0x106   :  { %v6039_v3 = vpop.f32.mrb[6].mxu1 }
 0x107   :  { %v6041_v8 = vpop.f32.mrb[7].mxu1 }
 0x10a   :  { %v6053_v32 = vpop.f32.mrb[8].mxu1 }
 0x10b   :  { %v6055_v35 = vpop.f32.mrb[9].mxu1 }
 0x10e   :  { %v6059_v41 = vpop.f32.mrb[10].mxu1 }
 0x10f   :  { %v365_v42 = vpop.f32.mrb[11].mxu1 }
 0x110   :  { %v6061_v47 = vadd.f32 %v642_v39, %v365_v42  ;;  %v594_v42 = vld [vmem:[%s6803_s3 + $0xf] sm:$0x1f] }
 0x112   :  { %v6068_v53 = vpop.f32.mrb[12].mxu1 }
 0x113   :  { %v371_v54 = vpop.f32.mrb[13].mxu1 }
 0x114   :  { %v6070_v56 = vadd.f32 %v642_v39, %v371_v54  ;;  %v682_v39 = vrot.slane %v594_v42, %v6051_v28 }
 0x116   :  { %v6074_v20 = vpop.f32.mrb[14].mxu1 }
 0x117   :  { %6873 = vst [vmem:[#allocation36_spill] sm:$0xff] %v6074_v20  ;;  %v377_v5 = vpop.f32.mrb[15].mxu1 }
 0x118   :  { %v6076_v18 = vadd.f32 %v662_v60, %v377_v5  ;;  %v595_v5 = vld [vmem:[%s6803_s3 + $0x14] sm:$0x1f] }
 0x11a   :  { %6874 = vst [vmem:[#allocation37_spill] sm:$0xff] %v6076_v18  ;;  %v6081_v17 = vpop.f32.mrb[16].mxu1 }
 0x11b   :  { %6875 = vst [vmem:[#allocation38_spill] sm:$0xff] %v6081_v17  ;;  %v383_v9 = vpop.f32.mrb[17].mxu1  ;;  %v702_v17 = vrot.slane %v595_v5, %v6051_v28 }
 0x11c   :  { %v6083_v6 = vadd.f32 %v662_v60, %v383_v9  ;;  %v6101_v60 = vsub.s32 4, %v6043_v16 }
 0x11e   :  { %6876 = vst [vmem:[#allocation39_spill] sm:$0xff] %v6083_v6  ;;  %v6086_v54 = vpop.f32.mrb[18].mxu1 }
 0x11f   :  { %6877 = vst [vmem:[#allocation40_spill] sm:$0xff] %v6086_v54  ;;  %v389_v63 = vpop.f32.mrb[19].mxu1 }
 0x120   :  { %v6088_v62 = vadd.f32 %v682_v39, %v389_v63  ;;  %v6108_v63 = vld [vmem:[%s6803_s3] sm:$0x1f] }
 0x122   :  { %6878 = vst [vmem:[#allocation41_spill] sm:$0xff] %v6088_v62  ;;  %v6093_v18 = vpop.f32.mrb[20].mxu1 }
 0x123   :  { %6879 = vst [vmem:[#allocation42_spill] sm:$0xff] %v6093_v18  ;;  %v395_v20 = vpop.f32.mrb[21].mxu1 }
 0x124   :  { %v6095_v15 = vadd.f32 %v682_v39, %v395_v20  ;;  %v626_v20 = vrot.slane %v6108_v63, %v6101_v60 }
 0x126   :  { %6880 = vst [vmem:[#allocation43_spill] sm:$0xff] %v6095_v15  ;;  %v6098_v9 = vpop.f32.mrb[22].mxu1 }
 0x127   :  { %6881 = vst [vmem:[#allocation44_spill] sm:$0xff] %v6098_v9  ;;  %v401_v54 = vpop.f32.mrb[23].mxu1  ;;  %v596_v9 = vld [vmem:[%s6803_s3 + $0x19] sm:$0x1f] }
 0x128   :  { %v6103_v6 = vadd.f32 %v702_v17, %v401_v54  ;;  %v722_v54 = vrot.slane %v596_v9, %v6051_v28 }
 0x12a   :  { %6882 = vst [vmem:[#allocation45_spill] sm:$0xff] %v6103_v6  ;;  %v6110_v62 = vpop.f32.mrb[24].mxu1 }
 0x12b   :  { %6883 = vst [vmem:[#allocation46_spill] sm:$0xff] %v6110_v62  ;;  %v407_v39 = vpop.f32.mrb[25].mxu1  ;;  %v646_v62 = vrot.slane %v6048_v21, %v6101_v60 }
 0x12c   :  { %v6117_v15 = vadd.f32 %v702_v17, %v407_v39  ;;  %v597_v17 = vld [vmem:[%s6803_s3 + $0x1e] sm:$0x1f] }
 0x12e   :  { %6884 = vst [vmem:[#allocation47_spill] sm:$0xff] %v6117_v15  ;;  %v3981_v6 = vpop.f32.mrb[26].mxu0  ;;  %v6120_v18 = vpop.f32.mrb[26].mxu1 }
 0x12f   :  { %6885 = vst [vmem:[#allocation48_spill] sm:$0xff] %v6120_v18  ;;  %v6122_v10 = vadd.f32 %v3981_v6, %v626_v20  ;;  %v512_v0 = vpop.f32.mrb[27].mxu0  ;;  %v413_v57 = vpop.f32.mrb[27].mxu1  ;;  %v666_v6 = vrot.slane %v6066_v48, %v6101_v60 }
 0x130   :  { %v811_v50 = vadd.f32 %v626_v20, %v512_v0  ;;  %v6126_v43 = vadd.f32 %v722_v54, %v413_v57  ;;  %v742_v57 = vrot.slane %v597_v17, %v6051_v28 }
 0x132   :  { %6886 = vst [vmem:[#allocation49_spill] sm:$0xff] %v6126_v43  ;;  %v3984_v36 = vpop.f32.mrb[28].mxu0  ;;  %v6128_v29 = vpop.f32.mrb[28].mxu1 }
 0x133   :  { %6887 = vst [vmem:[#allocation50_spill] sm:$0xff] %v6128_v29  ;;  %v6133_v39 = vadd.f32 %v3984_v36, %v646_v62  ;;  %v522_v18 = vpop.f32.mrb[29].mxu0  ;;  %v419_v15 = vpop.f32.mrb[29].mxu1  ;;  %v686_v36 = vrot.slane %v594_v42, %v6101_v60 }
 0x134   :  { %v6137_v22 = vadd.f32 %v646_v62, %v522_v18  ;;  %v6139_v13 = vadd.f32 %v722_v54, %v419_v15  ;;  %v598_v15 = vld [vmem:[%s6803_s3 + $0x23] sm:$0x1f] }
 0x136   :  { %6888 = vst [vmem:[#allocation51_spill] sm:$0xff] %v6139_v13  ;;  %v3987_v0 = vpop.f32.mrb[30].mxu0  ;;  %v6142_v20 = vpop.f32.mrb[30].mxu1 }
 0x137   :  { %6889 = vst [vmem:[#allocation52_spill] sm:$0xff] %v6142_v20  ;;  %v6144_v43 = vadd.f32 %v3987_v0, %v666_v6  ;;  %v532_v29 = vpop.f32.mrb[31].mxu0  ;;  %v425_v7 = vpop.f32.mrb[31].mxu1  ;;  %v706_v0 = vrot.slane %v595_v5, %v6101_v60 }
 0x138   :  { %v6147_v2 = vadd.f32 %v666_v6, %v532_v29  ;;  %v6149_v34 = vadd.f32 %v742_v57, %v425_v7  ;;  %v762_v7 = vrot.slane %v598_v15, %v6051_v28  ;;  %v6165_v29 = vsub.s32 2, %v6043_v16 }
 0x139   :  { %6890 = vst [vmem:[#allocation53_spill] sm:$0xff] %v6144_v43 }
 0x13a   :  { %6891 = vst [vmem:[#allocation54_spill] sm:$0xff] %v6147_v2  ;;  %6892 = vst [vmem:[#allocation55_spill] sm:$0xff] %v6149_v34  ;;  %v3990_v48 = vpop.f32.mrb[32].mxu0  ;;  %v6151_v62 = vpop.f32.mrb[32].mxu1 }
 0x13b   :  { %6893 = vst [vmem:[#allocation56_spill] sm:$0xff] %v6151_v62  ;;  %v6156_v18 = vadd.f32 %v3990_v48, %v686_v36  ;;  %v542_v54 = vpop.f32.mrb[33].mxu0  ;;  %v431_v20 = vpop.f32.mrb[33].mxu1 }
 0x13c   :  { %v6159_v13 = vadd.f32 %v686_v36, %v542_v54  ;;  %v6161_v42 = vadd.f32 %v742_v57, %v431_v20  ;;  %v622_v57 = vrot.slane %v6108_v63, %v6051_v28  ;;  %v618_v20 = vrot.slane %v6108_v63, %v6165_v29 }
 0x13d   :  { %6894 = vst [vmem:[#allocation57_spill] sm:$0xff] %v6156_v18  ;;  %v726_v18 = vrot.slane %v596_v9, %v6101_v60  ;;  %v746_v9 = vrot.slane %v597_v17, %v6101_v60 }
 0x13e   :  { %6895 = vst [vmem:[#allocation58_spill] sm:$0xff] %v6159_v13  ;;  %6896 = vst [vmem:[#allocation59_spill] sm:$0xff] %v6161_v42  ;;  %v3993_v6 = vpop.f32.mrb[34].mxu0  ;;  %v6167_v34 = vpop.f32.mrb[34].mxu1  ;;  %v809_v28 = vadd.f32 %v618_v20, %v6039_v3  ;;  %v6203_v3 = vsub.s32 1, %v6043_v16 }
 0x13f   :  { %6897 = vst [vmem:[#allocation60_spill] sm:$0xff] %v6167_v34  ;;  %v6169_v62 = vadd.f32 %v3993_v6, %v706_v0  ;;  %v552_v48 = vpop.f32.mrb[35].mxu0  ;;  %v437_v43 = vpop.f32.mrb[35].mxu1 }
 0x140   :  { %v6172_v5 = vadd.f32 %v706_v0, %v552_v48  ;;  %v6174_v36 = vadd.f32 %v762_v7, %v437_v43  ;;  %v810_v43 = vadd.f32 %v622_v57, %v6041_v8  ;;  %v815_v8 = vadd.f32 %v622_v57, %v6055_v35 }
 0x141   :  { %6898 = vst [vmem:[#allocation61_spill] sm:$0xff] %v6169_v62 }
 0x142   :  { %6899 = vst [vmem:[#allocation62_spill] sm:$0xff] %v6172_v5  ;;  %6900 = vst [vmem:[#allocation63_spill] sm:$0xff] %v6174_v36  ;;  %v3996_v54 = vpop.f32.mrb[36].mxu0  ;;  %v6180_v42 = vpop.f32.mrb[36].mxu1 }
 0x143   :  { %6901 = vst [vmem:[#allocation64_spill] sm:$0xff] %v6180_v42  ;;  %v6182_v34 = vadd.f32 %v3996_v54, %v726_v18  ;;  %v562_v6 = vpop.f32.mrb[37].mxu0  ;;  %v443_v62 = vpop.f32.mrb[37].mxu1 }
 0x144   :  { %v6185_v13 = vadd.f32 %v726_v18, %v562_v6  ;;  %v6187_v0 = vadd.f32 %v762_v7, %v443_v62  ;;  %v6199_v62 = vsub.s32 0, %v6043_v16  ;;  %v3745_v18 = vmul.f32 -1.442695, %v809_v28 }
 0x145   :  { %6902 = vst [vmem:[#allocation65_spill] sm:$0xff] %v6182_v34  ;;  %v766_v34 = vrot.slane %v598_v15, %v6101_v60  ;;  %v814_v7 = vadd.f32 %v618_v20, %v6053_v32  ;;  %v614_v16 = vrot.slane %v6108_v63, %v6203_v3 }
 0x146   :  { %6903 = vst [vmem:[#allocation66_spill] sm:$0xff] %v6185_v13  ;;  %6904 = vst [vmem:[#allocation67_spill] sm:$0xff] %v6187_v0  ;;  %v3999_v48 = vpop.f32.mrb[38].mxu0  ;;  %v1328_v36 = vpop.f32.mrb[38].mxu1  ;;  %5126 = vpow2.f32 %v3745_v18 }
 0x147   :  { %v6191_v5 = vadd.f32 %v3999_v48, %v746_v9  ;;  %v1367_v2 = vadd.f32 %v1328_v36, %v810_v43  ;;  %v572_v42 = vpop.f32.mrb[39].mxu0  ;;  %v1330_v54 = vpop.f32.mrb[39].mxu1  ;;  %v3746_v32 = vmul.f32 -1.442695, %v814_v7 }
 0x148   :  { %v6194_v26 = vadd.f32 %v746_v9, %v572_v42  ;;  %v6196_v17 = vadd.f32 %v1330_v54, %v811_v50  ;;  %v610_v50 = vrot.slane %v6108_v63, %v6199_v62 }
 0x149   :  { %6905 = vst [vmem:[#allocation68_spill] sm:$0xff] %v6191_v5  ;;  %5128 = vpow2.f32 %v3746_v32 }
 0x14a   :  { %6906 = vst [vmem:[#allocation69_spill] sm:$0xff] %v6194_v26  ;;  %v4002_v36 = vpop.f32.mrb[40].mxu0  ;;  %v1334_v6 = vpop.f32.mrb[40].mxu1 }
 0x14b   :  { %v6206_v43 = vadd.f32 %v4002_v36, %v766_v34  ;;  %v1368_v60 = vadd.f32 %v1334_v6, %v815_v8  ;;  %v582_v15 = vpop.f32.mrb[41].mxu0  ;;  %v1336_v42 = vpop.f32.mrb[41].mxu1 }
 0x14c   :  { %v6210_v9 = vadd.f32 %v766_v34, %v582_v15  ;;  %v6213_v35 = vadd.f32 %v1336_v42, %v6122_v10 }
 0x14d   :  { %6907 = vst [vmem:[#allocation70_spill] sm:$0xff] %v6206_v43 }
 0x14e   :  { %6908 = vst [vmem:[#allocation71_spill] sm:$0xff] %v6210_v9  ;;  %v1251_v57 = vpop.f32.mrb[0].mxu0 }
 0x14f   :  { %v5053_v20 = vadd.f32 %v1251_v57, %v610_v50  ;;  %v1253_v28 = vpop.f32.mrb[1].mxu0 }
 0x150   :  { %v5054_v48 = vadd.f32 %v1253_v28, %v614_v16  ;;  %v5127_v43 = vpop.eup %5126 }
 0x151   :  { %v3761_v54 = vmul.f32 -1.442695, %v5053_v20  ;;  %v1031_v63 = vadd.f32 1.0, %v5127_v43 }
 0x152   :  { %v3763_v8 = vmul.f32 -1.442695, %v5054_v48  ;;  %v1257_v36 = vpop.f32.mrb[2].mxu0 }
 0x153   :  { %5130 = vpow2.f32 %v3761_v54  ;;  %v5055_v6 = vadd.f32 %v1257_v36, %v610_v50  ;;  %v1259_v34 = vpop.f32.mrb[3].mxu0  ;;  %v5129_v18 = vpop.eup %5128 }
 0x154   :  { %v5056_v15 = vadd.f32 %v1259_v34, %v614_v16  ;;  %5132 = vpow2.f32 %v3763_v8  ;;  %v1032_v20 = vadd.f32 1.0, %v5129_v18 }
 0x155   :  { %v3762_v10 = vmul.f32 -1.442695, %v5055_v6 }
 0x156   :  { %v3764_v42 = vmul.f32 -1.442695, %v5056_v15 }
 0x157   :  { %5134 = vpow2.f32 %v3762_v10 }
 0x158   :  { %5136 = vpow2.f32 %v3764_v42 }
 0x159   :  { %5138 = vrcp.f32 %v1031_v63 }
 0x15d   :  { %v5131_v7 = vpop.eup %5130 }
 0x15e   :  { %v1347_v57 = vadd.f32 1.0, %v5131_v7  ;;  %v5133_v0 = vpop.eup %5132 }
 0x15f   :  { %v1361_v32 = vadd.f32 1.0, %v5133_v0 }
 0x160   :  { %5140 = vrcp.f32 %v1347_v57 }
 0x161   :  { %v5135_v28 = vpop.eup %5134  ;;  %5142 = vtanh.f32 %v1367_v2 }
 0x162   :  { %v5137_v50 = vpop.eup %5136  ;;  %5144 = vrcp.f32 %v1361_v32  ;;  %v1348_v16 = vadd.f32 1.0, %v5135_v28 }
 0x163   :  { %5146 = vrcp.f32 %v1032_v20  ;;  %v1362_v48 = vadd.f32 1.0, %v5137_v50  ;;  %v5139_v54 = vpop.eup %5138 }
 0x164   :  { %5148 = vrcp.f32 %v1348_v16 }
 0x165   :  { %5150 = vrcp.f32 %v1362_v48 }
 0x166   :  { %5152 = vtanh.f32 %v1368_v60  ;;  %v6909_v60 = vmov 0.0  }
 0x16a   :  { %v5141_v43 = vpop.eup %5140 }
 0x16b   :  { %v5143_v8 = vpop.eup %5142  ;;  %v1373_v36 = vmul.f32 %v5141_v43, %v5139_v54 }
 0x16c   :  { %v5145_v6 = vpop.eup %5144 }
 0x16d   :  { %v5147_v34 = vpop.eup %5146  ;;  %v1371_v15 = vmul.f32 0.0, %v5145_v6  ;;  %v1375_v10 = vmul.f32 %v5143_v8, %v1373_v36 }
 0x16e   :  { %v5149_v42 = vpop.eup %5148 }
 0x16f   :  { %v5151_v0 = vpop.eup %5150  ;;  %v1374_v63 = vmul.f32 %v5149_v42, %v5147_v34  ;;  %v6217_v2 = vadd.f32 %v1375_v10, %v1371_v15 }
 0x170   :  { %v5153_v18 = vpop.eup %5152  ;;  %v1372_v7 = vmul.f32 0.0, %v5151_v0  ;;  %v638_v0 = vrot.slane %v6048_v21, %v6165_v29 }
 0x171   :  { %v1376_v57 = vmul.f32 %v5153_v18, %v1374_v63  ;;  %4035 = vmatprep.mubr.f32.mxu1 %v6217_v2 }
 0x172   :  { %v819_v63 = vadd.f32 %v638_v0, %v6059_v41 }
 0x173   :  { %v6220_v20 = vadd.f32 %v1376_v57, %v1372_v7  ;;  %v824_v7 = vadd.f32 %v638_v0, %v6068_v53  ;;  %v630_v57 = vrot.slane %v6048_v21, %v6199_v62 }
 0x174   :  { %v3747_v18 = vmul.f32 -1.442695, %v819_v63 }
 0x175   :  { %4036 = vmatmul.mubr.f32.vlgmr.msra.gmra.mrb[42].mxu1 %v6220_v20 }
 0x176   :  { %4414 = vmatpush1.bf16.msra.mxu1 %v5676_v23  ;;  %1628 = vmatprep.mubr.f32.mxu1 %v6909_v60 }
 0x177   :  { %4416 = vmatprep.subr.bf16.mxu1 %v5679_v24 }
 0x17a   :  { %4418 = vmatpush1.bf16.msra.mxu1 %v5693_v30 }
 0x17b   :  { %4420 = vmatprep.subr.bf16.mxu1 %v5696_v31 }
 0x17e   :  { %4422 = vmatpush1.bf16.msra.mxu1 %v5710_v37 }
 0x17f   :  { %4424 = vmatprep.subr.bf16.mxu1 %v5713_v38 }
 0x182   :  { %4426 = vmatpush1.bf16.msra.mxu1 %v5727_v44 }
 0x183   :  { %4428 = vmatprep.subr.bf16.mxu1 %v5730_v45 }
 0x186   :  { %4430 = vmatpush1.bf16.msra.mxu1 %v5744_v51 }
 0x187   :  { %4432 = vmatprep.subr.bf16.mxu1 %v5747_v52 }
 0x18a   :  { %4434 = vmatpush1.bf16.msra.mxu1 %v5761_v58 }
 0x18b   :  { %4436 = vmatprep.subr.bf16.mxu1 %v5764_v59 }
 0x18e   :  { %4438 = vmatpush1.bf16.msra.mxu1 %v5778_v1 }
 0x18f   :  { %4440 = vmatprep.subr.bf16.mxu1 %v5781_v4 }
 0x192   :  { %4442 = vmatpush1.bf16.msra.mxu1 %v5795_v11 }
 0x193   :  { %4508 = vmatprep.subr.bf16.mxu1 %v5644_v12 }
 0x248   :  { %v4037_v32 = vpop.f32.mrb[42].mxu1 }
 0x249   :  { %v1457_v28 = vadd.f32 %v4037_v32, %v6213_v35  ;;  %v1447_v50 = vpop.f32.mrb[43].mxu1  ;;  %v634_v32 = vrot.slane %v6048_v21, %v6203_v3 }
 0x24a   :  { %v1456_v16 = vadd.f32 %v1447_v50, %v6196_v17 }
 0x24b   :  { %v3766_v48 = vmul.f32 -1.442695, %v1457_v28  ;;  %v3748_v28 = vmul.f32 -1.442695, %v824_v7 }
 0x24c   :  { %v3765_v54 = vmul.f32 -1.442695, %v1456_v16 }
 0x24d   :  { %5154 = vpow2.f32 %v3766_v48 }
 0x24e   :  { %5156 = vpow2.f32 %v3765_v54 }
 0x24f   :  { %5158 = vtanh.f32 %v6217_v2 }
 0x250   :  { %5160 = vtanh.f32 %v6220_v20 }
 0x257   :  { %v5155_v43 = vpop.eup %5154 }
 0x258   :  { %v5157_v8 = vpop.eup %5156  ;;  %v1465_v36 = vadd.f32 1.0, %v5155_v43 }
 0x259   :  { %v1464_v6 = vadd.f32 1.0, %v5157_v8  ;;  %v5159_v34 = vpop.eup %5158 }
 0x25a   :  { %5162 = vrcp.f32 %v1465_v36  ;;  %v5161_v15 = vpop.eup %5160 }
 0x25b   :  { %5164 = vrcp.f32 %v1464_v6 }
 0x25c   :  { %5166 = vpow2.f32 %v3747_v18 }
 0x25d   :  { %5168 = vpow2.f32 %v3748_v28 }
 0x264   :  { %v5163_v35 = vpop.eup %5162 }
 0x265   :  { %v5165_v10 = vpop.eup %5164  ;;  %v1473_v42 = vmul.f32 %v5163_v35, %v5161_v15 }
 0x266   :  { %v1472_v17 = vmul.f32 %v5165_v10, %v5159_v34 }
 0x267   :  { %1475 = vst [vmem:[#allocation8 + $0x8] sm:$0xff] %v1473_v42 }
 0x268   :  { %1474 = vst [vmem:[#allocation8] sm:$0xff] %v1472_v17  ;;  %1552 = vmatmul.mubr.f32.vlgmr.msra.gmra.mrb[4].mxu0 %v1472_v17  ;;  %1629 = vmatmul.mubr.f32.vlgmr.msra.gmra.mrb[44].mxu1 %v1472_v17 }
 0x269   :  { %1557 = vmatprep.mubr.f32.mxu0 %v6909_v60  ;;  %1634 = vmatprep.mubr.f32.mxu1 %v6909_v60 }
 0x26a   :  { %4446 = vmatpush3.bf16.msra.mxu0 %v5951_v14  ;;  %4510 = vmatpush1.bf16.msra.mxu1 %v5676_v23 }
 0x26b   :  { %4448 = vmatprep.subr.bf16.mxu0 %v5962_v27  ;;  %4512 = vmatprep.subr.bf16.mxu1 %v5679_v24 }
 0x26c   :  { %1558 = vmatmul.mubr.f32.gmra.mrb[6].mxu0 %v1473_v42  ;;  %1635 = vmatmul.mubr.f32.gmra.mrb[46].mxu1 %v1473_v42 }
 0x26d   :  { %1931 = vmatprep.mubr.f32.mxu1 %v6909_v60 }
 0x26e   :  { %4450 = vmatpush3.bf16.msra.mxu0 %v5962_v27  ;;  %4514 = vmatpush1.bf16.msra.mxu1 %v5693_v30 }
 0x26f   :  { %4452 = vmatprep.subr.bf16.mxu0 %v5972_v33  ;;  %4516 = vmatprep.subr.bf16.mxu1 %v5696_v31 }
 0x272   :  { %4454 = vmatpush3.bf16.msra.mxu0 %v5972_v33  ;;  %4518 = vmatpush1.bf16.msra.mxu1 %v5710_v37 }
 0x273   :  { %4456 = vmatprep.subr.bf16.mxu0 %v5982_v40  ;;  %4520 = vmatprep.subr.bf16.mxu1 %v5713_v38 }
 0x276   :  { %4458 = vmatpush3.bf16.msra.mxu0 %v5982_v40  ;;  %4522 = vmatpush1.bf16.msra.mxu1 %v5727_v44 }
 0x277   :  { %4460 = vmatprep.subr.bf16.mxu0 %v5992_v46  ;;  %4524 = vmatprep.subr.bf16.mxu1 %v5730_v45 }
 0x27a   :  { %4462 = vmatpush3.bf16.msra.mxu0 %v5992_v46  ;;  %4526 = vmatpush1.bf16.msra.mxu1 %v5744_v51 }
 0x27b   :  { %4464 = vmatprep.subr.bf16.mxu0 %v6002_v49  ;;  %4528 = vmatprep.subr.bf16.mxu1 %v5747_v52 }
 0x27e   :  { %4466 = vmatpush3.bf16.msra.mxu0 %v6002_v49  ;;  %4530 = vmatpush1.bf16.msra.mxu1 %v5761_v58 }
 0x27f   :  { %4468 = vmatprep.subr.bf16.mxu0 %v6012_v55  ;;  %4532 = vmatprep.subr.bf16.mxu1 %v5764_v59 }
 0x282   :  { %4470 = vmatpush3.bf16.msra.mxu0 %v6012_v55  ;;  %4534 = vmatpush1.bf16.msra.mxu1 %v5778_v1 }
 0x283   :  { %4472 = vmatprep.subr.bf16.mxu0 %v6022_v61  ;;  %4536 = vmatprep.subr.bf16.mxu1 %v5781_v4 }
 0x286   :  { %4474 = vmatpush3.bf16.msra.mxu0 %v6022_v61  ;;  %4538 = vmatpush1.bf16.msra.mxu1 %v5795_v11 }
 0x287   :  { %4476 = vmatprep.subr.bf16.mxu0 %v5663_v19  ;;  %4540 = vmatprep.subr.bf16.mxu1 %v5951_v14 }
 0x33b   :  { %v1553_v50 = vpop.f32.mrb[4].mxu0  ;;  %v1630_v16 = vpop.f32.mrb[44].mxu1 }
 0x33c   :  { %v5057_v48 = vadd.f32 %v1553_v50, %v630_v57  ;;  %v1669_v54 = vadd.f32 %v1630_v16, %v6061_v47  ;;  %v1555_v43 = vpop.f32.mrb[5].mxu0  ;;  %v1632_v8 = vpop.f32.mrb[45].mxu1 }
 0x33d   :  { %v5058_v36 = vadd.f32 %v1555_v43, %v634_v32  ;;  %v6289_v41 = vadd.f32 %v1632_v8, %v6137_v22  ;;  %v5167_v22 = vpop.eup %5166 }
 0x33e   :  { %v3767_v53 = vmul.f32 -1.442695, %v5057_v48  ;;  %v1033_v18 = vadd.f32 1.0, %v5167_v22  ;;  %v5169_v7 = vpop.eup %5168 }
 0x33f   :  { %v3769_v6 = vmul.f32 -1.442695, %v5058_v36  ;;  %v1559_v34 = vpop.f32.mrb[6].mxu0  ;;  %v1636_v15 = vpop.f32.mrb[46].mxu1 }
 0x340   :  { %5170 = vpow2.f32 %v3767_v53  ;;  %v5059_v21 = vadd.f32 %v1559_v34, %v630_v57  ;;  %v1670_v35 = vadd.f32 %v1636_v15, %v6070_v56  ;;  %v1561_v10 = vpop.f32.mrb[7].mxu0  ;;  %v1638_v42 = vpop.f32.mrb[47].mxu1  ;;  %v1034_v57 = vadd.f32 1.0, %v5169_v7  ;;  %v6911_v7 = vld [vmem:[#allocation16_spill] sm:$0xff] }
 0x341   :  { %5172 = vpow2.f32 %v3769_v6  ;;  %v5060_v17 = vadd.f32 %v1561_v10, %v634_v32  ;;  %v1682_v47 = vadd.f32 %v1638_v42, %v6133_v39 }
 0x342   :  { %v3768_v0 = vmul.f32 -1.442695, %v5059_v21 }
 0x343   :  { %v3770_v63 = vmul.f32 -1.442695, %v5060_v17 }
 0x344   :  { %5174 = vpow2.f32 %v3768_v0 }
 0x345   :  { %5176 = vpow2.f32 %v3770_v63 }
 0x346   :  { %5178 = vrcp.f32 %v1033_v18 }
 0x34a   :  { %v5171_v28 = vpop.eup %5170 }
 0x34b   :  { %v5173_v50 = vpop.eup %5172  ;;  %v1649_v16 = vadd.f32 1.0, %v5171_v28  ;;  %v6912_v28 = vld [vmem:[#allocation17_spill] sm:$0xff] }
 0x34c   :  { %v1663_v48 = vadd.f32 1.0, %v5173_v50  ;;  %v6913_v50 = vld [vmem:[#allocation18_spill] sm:$0xff] }
 0x34d   :  { %5180 = vrcp.f32 %v1649_v16  ;;  %v6915_v16 = vld [vmem:[#allocation20_spill] sm:$0xff] }
 0x34e   :  { %v5175_v56 = vpop.eup %5174  ;;  %5182 = vrcp.f32 %v1663_v48  ;;  %v6917_v48 = vld [vmem:[#allocation22_spill] sm:$0xff] }
 0x34f   :  { %v5177_v43 = vpop.eup %5176  ;;  %5184 = vtanh.f32 %v1669_v54  ;;  %v1650_v32 = vadd.f32 1.0, %v5175_v56  ;;  %v6918_v56 = vld [vmem:[#allocation23_spill] sm:$0xff] }
 0x350   :  { %5186 = vrcp.f32 %v1034_v57  ;;  %v1664_v39 = vadd.f32 1.0, %v5177_v43  ;;  %v5179_v8 = vpop.eup %5178  ;;  %v6916_v57 = vld [vmem:[#allocation21_spill] sm:$0xff]  ;;  %v6919_v43 = vld [vmem:[#allocation24_spill] sm:$0xff] }
 0x351   :  { %5188 = vrcp.f32 %v1650_v32  ;;  %v6920_v32 = vld [vmem:[#allocation25_spill] sm:$0xff] }
 0x352   :  { %5190 = vrcp.f32 %v1664_v39  ;;  %v6921_v39 = vld [vmem:[#allocation26_spill] sm:$0xff] }
 0x353   :  { %5192 = vtanh.f32 %v1670_v35 }
 0x357   :  { %v5181_v36 = vpop.eup %5180 }
 0x358   :  { %v5183_v53 = vpop.eup %5182  ;;  %v1675_v6 = vmul.f32 %v5181_v36, %v5179_v8  ;;  %v6922_v8 = vld [vmem:[#allocation27_spill] sm:$0xff]  ;;  %v6923_v36 = vld [vmem:[#allocation28_spill] sm:$0xff] }
 0x359   :  { %v5185_v34 = vpop.eup %5184  ;;  %v1673_v15 = vmul.f32 %v5183_v53, %v6217_v2  ;;  %v6910_v2 = vld [vmem:[#allocation15_spill] sm:$0xff] }
 0x35a   :  { %v5187_v21 = vpop.eup %5186  ;;  %v1677_v10 = vmul.f32 %v5185_v34, %v1675_v6 }
 0x35b   :  { %v5189_v42 = vpop.eup %5188 }
 0x35c   :  { %v5191_v17 = vpop.eup %5190  ;;  %v1676_v0 = vmul.f32 %v5189_v42, %v5187_v21  ;;  %v6294_v63 = vadd.f32 %v1677_v10, %v1673_v15 }
 0x35d   :  { %v5193_v54 = vpop.eup %5192  ;;  %v1674_v22 = vmul.f32 %v5191_v17, %v6220_v20  ;;  %v6914_v20 = vld [vmem:[#allocation19_spill] sm:$0xff] }
 0x35e   :  { %v1678_v18 = vmul.f32 %v5193_v54, %v1676_v0  ;;  %4070 = vmatprep.mubr.f32.mxu0 %v6294_v63 }
 0x360   :  { %v6298_v35 = vadd.f32 %v1678_v18, %v1674_v22 }
 0x362   :  { %4071 = vmatmul.mubr.f32.vlgmr.msra.gmra.mrb[42].mxu0 %v6298_v35 }
 0x363   :  { %4478 = vmatpush1.bf16.msra.mxu0 %v5828_v25  ;;  %1854 = vmatprep.mubr.f32.mxu0 %v6909_v60 }
 0x364   :  { %4480 = vmatprep.subr.bf16.mxu0 %v6910_v2 }
 0x367   :  { %4482 = vmatpush1.bf16.msra.mxu0 %v6911_v7 }
 0x368   :  { %4484 = vmatprep.subr.bf16.mxu0 %v6912_v28 }
 0x36b   :  { %4486 = vmatpush1.bf16.msra.mxu0 %v6913_v50 }
 0x36c   :  { %4488 = vmatprep.subr.bf16.mxu0 %v6914_v20 }
 0x36f   :  { %4490 = vmatpush1.bf16.msra.mxu0 %v6915_v16 }
 0x370   :  { %4492 = vmatprep.subr.bf16.mxu0 %v6916_v57 }
 0x373   :  { %4494 = vmatpush1.bf16.msra.mxu0 %v6917_v48 }
 0x374   :  { %4496 = vmatprep.subr.bf16.mxu0 %v6918_v56 }
 0x377   :  { %4498 = vmatpush1.bf16.msra.mxu0 %v6919_v43 }
 0x378   :  { %4500 = vmatprep.subr.bf16.mxu0 %v6920_v32 }
 0x37b   :  { %4502 = vmatpush1.bf16.msra.mxu0 %v6921_v39 }
 0x37c   :  { %4504 = vmatprep.subr.bf16.mxu0 %v6922_v8 }
 0x37f   :  { %4506 = vmatpush1.bf16.msra.mxu0 %v6923_v36 }
 0x380   :  { %4572 = vmatprep.subr.bf16.mxu0 %v5663_v19 }
 0x435   :  { %v4072_v53 = vpop.f32.mrb[42].mxu0 }
 0x436   :  { %v1759_v6 = vadd.f32 %v4072_v53, %v1682_v47  ;;  %v1749_v34 = vpop.f32.mrb[43].mxu0 }
 0x437   :  { %v1758_v15 = vadd.f32 %v1749_v34, %v6289_v41  ;;  %v6925_v34 = vld [vmem:[#allocation36_spill] sm:$0xff] }
 0x438   :  { %v3772_v21 = vmul.f32 -1.442695, %v1759_v6 }
 0x439   :  { %v3771_v10 = vmul.f32 -1.442695, %v1758_v15 }
 0x43a   :  { %5194 = vpow2.f32 %v3772_v21 }
 0x43b   :  { %5196 = vpow2.f32 %v3771_v10  ;;  %v6926_v10 = vld [vmem:[#allocation38_spill] sm:$0xff] }
 0x43c   :  { %5198 = vtanh.f32 %v6294_v63 }
 0x43d   :  { %5200 = vtanh.f32 %v6298_v35 }
 0x444   :  { %v5195_v42 = vpop.eup %5194 }
 0x445   :  { %v5197_v17 = vpop.eup %5196  ;;  %v1767_v0 = vadd.f32 1.0, %v5195_v42 }
 0x446   :  { %v1766_v54 = vadd.f32 1.0, %v5197_v17  ;;  %v5199_v22 = vpop.eup %5198 }
 0x447   :  { %5202 = vrcp.f32 %v1767_v0  ;;  %v5201_v18 = vpop.eup %5200 }
 0x448   :  { %5204 = vrcp.f32 %v1766_v54 }
 0x451   :  { %v5203_v47 = vpop.eup %5202 }
 0x452   :  { %v5205_v53 = vpop.eup %5204  ;;  %v1775_v9 = vmul.f32 %v5203_v47, %v5201_v18 }
 0x453   :  { %v1774_v41 = vmul.f32 %v5205_v53, %v5199_v22  ;;  %v6927_v53 = vld [vmem:[#allocation37_spill] sm:$0xff] }
 0x454   :  { %1778 = vst [vmem:[#allocation8 + $0x18] sm:$0xff] %v1775_v9 }
 0x455   :  { %1777 = vst [vmem:[#allocation8 + $0x10] sm:$0xff] %v1774_v41  ;;  %1855 = vmatmul.mubr.f32.vlgmr.msra.gmra.mrb[8].mxu0 %v1774_v41  ;;  %1932 = vmatmul.mubr.f32.vlgmr.msra.gmra.mrb[48].mxu1 %v1774_v41 }
 0x456   :  { %1860 = vmatprep.mubr.f32.mxu0 %v6909_v60  ;;  %1937 = vmatprep.mubr.f32.mxu1 %v6909_v60 }
 0x457   :  { %4542 = vmatpush3.bf16.msra.mxu1 %v5951_v14  ;;  %4574 = vmatpush1.bf16.msra.mxu0 %v5828_v25 }
 0x458   :  { %4544 = vmatprep.subr.bf16.mxu1 %v5962_v27  ;;  %4576 = vmatprep.subr.bf16.mxu0 %v6910_v2 }
 0x459   :  { %1861 = vmatmul.mubr.f32.gmra.mrb[10].mxu0 %v1775_v9  ;;  %1938 = vmatmul.mubr.f32.gmra.mrb[50].mxu1 %v1775_v9  ;;  %v6924_v9 = vld [vmem:[#allocation35_spill] sm:$0xff] }
 0x45a   :  { %2157 = vmatprep.mubr.f32.mxu0 %v6909_v60  ;;  %v658_v6 = vrot.slane %v6924_v9, %v6165_v29  ;;  %v650_v17 = vrot.slane %v6924_v9, %v6199_v62  ;;  %v654_v0 = vrot.slane %v6924_v9, %v6203_v3 }
 0x45b   :  { %4546 = vmatpush3.bf16.msra.mxu1 %v5962_v27  ;;  %4578 = vmatpush1.bf16.msra.mxu0 %v6911_v7 }
 0x45c   :  { %4548 = vmatprep.subr.bf16.mxu1 %v5972_v33  ;;  %4580 = vmatprep.subr.bf16.mxu0 %v6912_v28  ;;  %v829_v15 = vadd.f32 %v658_v6, %v6925_v34  ;;  %v834_v42 = vadd.f32 %v658_v6, %v6926_v10  ;;  %v6928_v34 = vld [vmem:[#allocation54_spill] sm:$0xff] }
 0x45e   :  { %v3749_v21 = vmul.f32 -1.442695, %v829_v15  ;;  %v3750_v54 = vmul.f32 -1.442695, %v834_v42 }
 0x45f   :  { %4550 = vmatpush3.bf16.msra.mxu1 %v5972_v33  ;;  %4582 = vmatpush1.bf16.msra.mxu0 %v6913_v50 }
 0x460   :  { %4552 = vmatprep.subr.bf16.mxu1 %v5982_v40  ;;  %4584 = vmatprep.subr.bf16.mxu0 %v6914_v20  ;;  %5206 = vpow2.f32 %v3749_v21  ;;  %v6929_v21 = vld [vmem:[#allocation39_spill] sm:$0xff] }
 0x461   :  { %5208 = vpow2.f32 %v3750_v54 }
 0x463   :  { %4554 = vmatpush3.bf16.msra.mxu1 %v5982_v40  ;;  %4586 = vmatpush1.bf16.msra.mxu0 %v6915_v16 }
 0x464   :  { %4556 = vmatprep.subr.bf16.mxu1 %v5992_v46  ;;  %4588 = vmatprep.subr.bf16.mxu0 %v6916_v57 }
 0x467   :  { %4558 = vmatpush3.bf16.msra.mxu1 %v5992_v46  ;;  %4590 = vmatpush1.bf16.msra.mxu0 %v6917_v48 }
 0x468   :  { %4560 = vmatprep.subr.bf16.mxu1 %v6002_v49  ;;  %4592 = vmatprep.subr.bf16.mxu0 %v6918_v56 }
 0x46b   :  { %4562 = vmatpush3.bf16.msra.mxu1 %v6002_v49  ;;  %4594 = vmatpush1.bf16.msra.mxu0 %v6919_v43 }
 0x46c   :  { %4564 = vmatprep.subr.bf16.mxu1 %v6012_v55  ;;  %4596 = vmatprep.subr.bf16.mxu0 %v6920_v32 }
 0x46f   :  { %4566 = vmatpush3.bf16.msra.mxu1 %v6012_v55  ;;  %4598 = vmatpush1.bf16.msra.mxu0 %v6921_v39 }
 0x470   :  { %4568 = vmatprep.subr.bf16.mxu1 %v6022_v61  ;;  %4600 = vmatprep.subr.bf16.mxu0 %v6922_v8 }
 0x473   :  { %4570 = vmatpush3.bf16.msra.mxu1 %v6022_v61  ;;  %4602 = vmatpush1.bf16.msra.mxu0 %v6923_v36 }
 0x474   :  { %4604 = vmatprep.subr.bf16.mxu1 %v5644_v12  ;;  %4636 = vmatprep.subr.bf16.mxu0 %v5951_v14 }
 0x528   :  { %v1856_v22 = vpop.f32.mrb[8].mxu0  ;;  %v1933_v18 = vpop.f32.mrb[48].mxu1 }
 0x529   :  { %v5061_v47 = vadd.f32 %v1856_v22, %v650_v17  ;;  %v1972_v41 = vadd.f32 %v1933_v18, %v6927_v53  ;;  %v1858_v5 = vpop.f32.mrb[9].mxu0  ;;  %v1935_v26 = vpop.f32.mrb[49].mxu1  ;;  %v6930_v18 = vld [vmem:[#allocation53_spill] sm:$0xff] }
 0x52a   :  { %v5062_v13 = vadd.f32 %v1858_v5, %v654_v0  ;;  %v6366_v15 = vadd.f32 %v1935_v26, %v6928_v34  ;;  %v5207_v26 = vpop.eup %5206 }
 0x52b   :  { %v3773_v6 = vmul.f32 -1.442695, %v5061_v47  ;;  %v1035_v47 = vadd.f32 1.0, %v5207_v26  ;;  %v5209_v54 = vpop.eup %5208 }
 0x52c   :  { %v3775_v10 = vmul.f32 -1.442695, %v5062_v13  ;;  %v1862_v36 = vpop.f32.mrb[10].mxu0  ;;  %v1939_v8 = vpop.f32.mrb[50].mxu1 }
 0x52d   :  { %5210 = vpow2.f32 %v3773_v6  ;;  %v5063_v9 = vadd.f32 %v1862_v36, %v650_v17  ;;  %v1973_v42 = vadd.f32 %v1939_v8, %v6929_v21  ;;  %v1864_v39 = vpop.f32.mrb[11].mxu0  ;;  %v1941_v32 = vpop.f32.mrb[51].mxu1  ;;  %v1036_v36 = vadd.f32 1.0, %v5209_v54 }
 0x52e   :  { %5212 = vpow2.f32 %v3775_v10  ;;  %v5064_v22 = vadd.f32 %v1864_v39, %v654_v0  ;;  %v1985_v53 = vadd.f32 %v1941_v32, %v6930_v18 }
 0x52f   :  { %v3774_v43 = vmul.f32 -1.442695, %v5063_v9 }
 0x530   :  { %v3776_v5 = vmul.f32 -1.442695, %v5064_v22 }
 0x531   :  { %5214 = vpow2.f32 %v3774_v43 }
 0x532   :  { %5216 = vpow2.f32 %v3776_v5 }
 0x533   :  { %5218 = vrcp.f32 %v1035_v47 }
 0x537   :  { %v5211_v13 = vpop.eup %5210 }
 0x538   :  { %v5213_v34 = vpop.eup %5212  ;;  %v1952_v56 = vadd.f32 1.0, %v5211_v13 }
 0x539   :  { %v1966_v17 = vadd.f32 1.0, %v5213_v34 }
 0x53a   :  { %5220 = vrcp.f32 %v1952_v56 }
 0x53b   :  { %v5215_v8 = vpop.eup %5214  ;;  %5222 = vrcp.f32 %v1966_v17 }
 0x53c   :  { %v5217_v6 = vpop.eup %5216  ;;  %5224 = vtanh.f32 %v1972_v41  ;;  %v1953_v39 = vadd.f32 1.0, %v5215_v8 }
 0x53d   :  { %5226 = vrcp.f32 %v1036_v36  ;;  %v1967_v32 = vadd.f32 1.0, %v5217_v6  ;;  %v5219_v43 = vpop.eup %5218 }
 0x53e   :  { %5228 = vrcp.f32 %v1953_v39 }
 0x53f   :  { %5230 = vrcp.f32 %v1967_v32 }
 0x540   :  { %5232 = vtanh.f32 %v1973_v42 }
 0x544   :  { %v5221_v0 = vpop.eup %5220 }
 0x545   :  { %v5223_v10 = vpop.eup %5222  ;;  %v1978_v9 = vmul.f32 %v5221_v0, %v5219_v43 }
 0x546   :  { %v5225_v21 = vpop.eup %5224  ;;  %v1976_v22 = vmul.f32 %v5223_v10, %v6294_v63 }
 0x547   :  { %v5227_v18 = vpop.eup %5226  ;;  %v1980_v5 = vmul.f32 %v5225_v21, %v1978_v9 }
 0x548   :  { %v5229_v56 = vpop.eup %5228 }
 0x549   :  { %v5231_v26 = vpop.eup %5230  ;;  %v1979_v47 = vmul.f32 %v5229_v56, %v5227_v18  ;;  %v6371_v54 = vadd.f32 %v1980_v5, %v1976_v22  ;;  %v5446_v18 = vld [vmem:[%s6803_s3 + $0xf] sm:$0x1f]  ;;  %v6931_v56 = vld [vmem:[#allocation40_spill] sm:$0xff] }
 0x54a   :  { %v5233_v41 = vpop.eup %5232  ;;  %v1977_v13 = vmul.f32 %v5231_v26, %v6298_v35  ;;  %v678_v5 = vrot.slane %v5446_v18, %v6165_v29 }
 0x54b   :  { %v1981_v34 = vmul.f32 %v5233_v41, %v1979_v47  ;;  %4105 = vmatprep.mubr.f32.mxu1 %v6371_v54  ;;  %v6932_v41 = vld [vmem:[#allocation42_spill] sm:$0xff] }
 0x54c   :  { %v839_v26 = vadd.f32 %v678_v5, %v6931_v56 }
 0x54d   :  { %v6375_v42 = vadd.f32 %v1981_v34, %v1977_v13  ;;  %v844_v13 = vadd.f32 %v678_v5, %v6932_v41  ;;  %v670_v34 = vrot.slane %v5446_v18, %v6199_v62  ;;  %v6935_v5 = vld [vmem:[#allocation43_spill] sm:$0xff] }
 0x54e   :  { %v3751_v47 = vmul.f32 -1.442695, %v839_v26 }
 0x54f   :  { %4106 = vmatmul.mubr.f32.vlgmr.msra.gmra.mrb[52].mxu1 %v6375_v42 }
 0x550   :  { %4606 = vmatpush1.bf16.msra.mxu1 %v5676_v23  ;;  %2234 = vmatprep.mubr.f32.mxu1 %v6909_v60 }
 0x551   :  { %4608 = vmatprep.subr.bf16.mxu1 %v5679_v24 }
 0x554   :  { %4610 = vmatpush1.bf16.msra.mxu1 %v5693_v30 }
 0x555   :  { %4612 = vmatprep.subr.bf16.mxu1 %v5696_v31 }
 0x558   :  { %4614 = vmatpush1.bf16.msra.mxu1 %v5710_v37 }
 0x559   :  { %4616 = vmatprep.subr.bf16.mxu1 %v5713_v38 }
 0x55c   :  { %4618 = vmatpush1.bf16.msra.mxu1 %v5727_v44 }
 0x55d   :  { %4620 = vmatprep.subr.bf16.mxu1 %v5730_v45 }
 0x560   :  { %4622 = vmatpush1.bf16.msra.mxu1 %v5744_v51 }
 0x561   :  { %4624 = vmatprep.subr.bf16.mxu1 %v5747_v52 }
 0x564   :  { %4626 = vmatpush1.bf16.msra.mxu1 %v5761_v58 }
 0x565   :  { %4628 = vmatprep.subr.bf16.mxu1 %v5764_v59 }
 0x568   :  { %4630 = vmatpush1.bf16.msra.mxu1 %v5778_v1 }
 0x569   :  { %4632 = vmatprep.subr.bf16.mxu1 %v5781_v4 }
 0x56c   :  { %4634 = vmatpush1.bf16.msra.mxu1 %v5795_v11 }
 0x56d   :  { %4700 = vmatprep.subr.bf16.mxu1 %v5644_v12 }
 0x622   :  { %v4107_v63 = vpop.f32.mrb[52].mxu1 }
 0x623   :  { %v2062_v35 = vadd.f32 %v4107_v63, %v1985_v53  ;;  %v2052_v36 = vpop.f32.mrb[53].mxu1  ;;  %v674_v63 = vrot.slane %v5446_v18, %v6203_v3 }
 0x624   :  { %v2061_v17 = vadd.f32 %v2052_v36, %v6366_v15 }
 0x625   :  { %v3778_v8 = vmul.f32 -1.442695, %v2062_v35  ;;  %v3752_v35 = vmul.f32 -1.442695, %v844_v13  ;;  %v6936_v13 = vld [vmem:[#allocation57_spill] sm:$0xff] }
 0x626   :  { %v3777_v6 = vmul.f32 -1.442695, %v2061_v17 }
 0x627   :  { %5234 = vpow2.f32 %v3778_v8 }
 0x628   :  { %5236 = vpow2.f32 %v3777_v6  ;;  %v6933_v6 = vld [vmem:[#allocation41_spill] sm:$0xff] }
 0x629   :  { %5238 = vtanh.f32 %v6371_v54 }
 0x62a   :  { %5240 = vtanh.f32 %v6375_v42 }
 0x631   :  { %v5235_v39 = vpop.eup %5234 }
 0x632   :  { %v5237_v32 = vpop.eup %5236  ;;  %v2070_v43 = vadd.f32 1.0, %v5235_v39 }
 0x633   :  { %v2069_v0 = vadd.f32 1.0, %v5237_v32  ;;  %v5239_v10 = vpop.eup %5238 }
 0x634   :  { %5242 = vrcp.f32 %v2070_v43  ;;  %v5241_v9 = vpop.eup %5240 }
 0x635   :  { %5244 = vrcp.f32 %v2069_v0 }
 0x636   :  { %5246 = vpow2.f32 %v3751_v47 }
 0x637   :  { %5248 = vpow2.f32 %v3752_v35 }
 0x63e   :  { %v5243_v53 = vpop.eup %5242 }
 0x63f   :  { %v5245_v21 = vpop.eup %5244  ;;  %v2078_v22 = vmul.f32 %v5243_v53, %v5241_v9 }
 0x640   :  { %v2077_v15 = vmul.f32 %v5245_v21, %v5239_v10  ;;  %v6934_v10 = vld [vmem:[#allocation58_spill] sm:$0xff] }
 0x641   :  { %2081 = vst [vmem:[#allocation8 + $0x28] sm:$0xff] %v2078_v22 }
 0x642   :  { %2080 = vst [vmem:[#allocation8 + $0x20] sm:$0xff] %v2077_v15  ;;  %2158 = vmatmul.mubr.f32.vlgmr.msra.gmra.mrb[12].mxu0 %v2077_v15  ;;  %2235 = vmatmul.mubr.f32.vlgmr.msra.gmra.mrb[54].mxu1 %v2077_v15 }
 0x643   :  { %2163 = vmatprep.mubr.f32.mxu0 %v6909_v60  ;;  %2240 = vmatprep.mubr.f32.mxu1 %v6909_v60 }
 0x644   :  { %4638 = vmatpush3.bf16.msra.mxu0 %v5951_v14  ;;  %4702 = vmatpush1.bf16.msra.mxu1 %v5676_v23 }
 0x645   :  { %4640 = vmatprep.subr.bf16.mxu0 %v5962_v27  ;;  %4704 = vmatprep.subr.bf16.mxu1 %v5679_v24 }
 0x646   :  { %2164 = vmatmul.mubr.f32.gmra.mrb[14].mxu0 %v2078_v22  ;;  %2241 = vmatmul.mubr.f32.gmra.mrb[56].mxu1 %v2078_v22 }
 0x647   :  { %2537 = vmatprep.mubr.f32.mxu1 %v6909_v60 }
 0x648   :  { %4642 = vmatpush3.bf16.msra.mxu0 %v5962_v27  ;;  %4706 = vmatpush1.bf16.msra.mxu1 %v5693_v30 }
 0x649   :  { %4644 = vmatprep.subr.bf16.mxu0 %v5972_v33  ;;  %4708 = vmatprep.subr.bf16.mxu1 %v5696_v31 }
 0x64c   :  { %4646 = vmatpush3.bf16.msra.mxu0 %v5972_v33  ;;  %4710 = vmatpush1.bf16.msra.mxu1 %v5710_v37 }
 0x64d   :  { %4648 = vmatprep.subr.bf16.mxu0 %v5982_v40  ;;  %4712 = vmatprep.subr.bf16.mxu1 %v5713_v38 }
 0x650   :  { %4650 = vmatpush3.bf16.msra.mxu0 %v5982_v40  ;;  %4714 = vmatpush1.bf16.msra.mxu1 %v5727_v44 }
 0x651   :  { %4652 = vmatprep.subr.bf16.mxu0 %v5992_v46  ;;  %4716 = vmatprep.subr.bf16.mxu1 %v5730_v45 }
 0x654   :  { %4654 = vmatpush3.bf16.msra.mxu0 %v5992_v46  ;;  %4718 = vmatpush1.bf16.msra.mxu1 %v5744_v51 }
 0x655   :  { %4656 = vmatprep.subr.bf16.mxu0 %v6002_v49  ;;  %4720 = vmatprep.subr.bf16.mxu1 %v5747_v52 }
 0x658   :  { %4658 = vmatpush3.bf16.msra.mxu0 %v6002_v49  ;;  %4722 = vmatpush1.bf16.msra.mxu1 %v5761_v58 }
 0x659   :  { %4660 = vmatprep.subr.bf16.mxu0 %v6012_v55  ;;  %4724 = vmatprep.subr.bf16.mxu1 %v5764_v59 }
 0x65c   :  { %4662 = vmatpush3.bf16.msra.mxu0 %v6012_v55  ;;  %4726 = vmatpush1.bf16.msra.mxu1 %v5778_v1 }
 0x65d   :  { %4664 = vmatprep.subr.bf16.mxu0 %v6022_v61  ;;  %4728 = vmatprep.subr.bf16.mxu1 %v5781_v4 }
 0x660   :  { %4666 = vmatpush3.bf16.msra.mxu0 %v6022_v61  ;;  %4730 = vmatpush1.bf16.msra.mxu1 %v5795_v11 }
 0x661   :  { %4668 = vmatprep.subr.bf16.mxu0 %v5663_v19  ;;  %4732 = vmatprep.subr.bf16.mxu1 %v5951_v14 }
 0x715   :  { %v2159_v36 = vpop.f32.mrb[12].mxu0  ;;  %v2236_v17 = vpop.f32.mrb[54].mxu1 }
 0x716   :  { %v5065_v8 = vadd.f32 %v2159_v36, %v670_v34  ;;  %v2275_v39 = vadd.f32 %v2236_v17, %v6933_v6  ;;  %v2161_v32 = vpop.f32.mrb[13].mxu0  ;;  %v2238_v43 = vpop.f32.mrb[55].mxu1 }
 0x717   :  { %v5066_v0 = vadd.f32 %v2161_v32, %v674_v63  ;;  %v6443_v9 = vadd.f32 %v2238_v43, %v6934_v10  ;;  %v5247_v32 = vpop.eup %5246 }
 0x718   :  { %v3779_v53 = vmul.f32 -1.442695, %v5065_v8  ;;  %v1037_v8 = vadd.f32 1.0, %v5247_v32  ;;  %v5249_v35 = vpop.eup %5248 }
 0x719   :  { %v3781_v21 = vmul.f32 -1.442695, %v5066_v0  ;;  %v2165_v22 = vpop.f32.mrb[14].mxu0  ;;  %v2242_v15 = vpop.f32.mrb[56].mxu1 }
 0x71a   :  { %5250 = vpow2.f32 %v3779_v53  ;;  %v5067_v18 = vadd.f32 %v2165_v22, %v670_v34  ;;  %v2276_v56 = vadd.f32 %v2242_v15, %v6935_v5  ;;  %v2167_v26 = vpop.f32.mrb[15].mxu0  ;;  %v2244_v47 = vpop.f32.mrb[57].mxu1  ;;  %v1038_v34 = vadd.f32 1.0, %v5249_v35 }
 0x71b   :  { %5252 = vpow2.f32 %v3781_v21  ;;  %v5068_v41 = vadd.f32 %v2167_v26, %v674_v63  ;;  %v2288_v36 = vadd.f32 %v2244_v47, %v6936_v13 }
 0x71c   :  { %v3780_v17 = vmul.f32 -1.442695, %v5067_v18 }
 0x71d   :  { %v3782_v6 = vmul.f32 -1.442695, %v5068_v41 }
 0x71e   :  { %5254 = vpow2.f32 %v3780_v17 }
 0x71f   :  { %5256 = vpow2.f32 %v3782_v6 }
 0x720   :  { %5258 = vrcp.f32 %v1037_v8 }
 0x724   :  { %v5251_v43 = vpop.eup %5250 }
 0x725   :  { %v5253_v0 = vpop.eup %5252  ;;  %v2255_v10 = vadd.f32 1.0, %v5251_v43 }
 0x726   :  { %v2269_v53 = vadd.f32 1.0, %v5253_v0 }
 0x727   :  { %5260 = vrcp.f32 %v2255_v10 }
 0x728   :  { %v5255_v22 = vpop.eup %5254  ;;  %5262 = vrcp.f32 %v2269_v53  ;;  %v6940_v53 = vld [vmem:[#allocation26_spill] sm:$0xff] }
 0x729   :  { %v5257_v21 = vpop.eup %5256  ;;  %5264 = vtanh.f32 %v2275_v39  ;;  %v2256_v63 = vadd.f32 1.0, %v5255_v22  ;;  %v6941_v22 = vld [vmem:[#allocation27_spill] sm:$0xff] }
 0x72a   :  { %5266 = vrcp.f32 %v1038_v34  ;;  %v2270_v15 = vadd.f32 1.0, %v5257_v21  ;;  %v5259_v18 = vpop.eup %5258  ;;  %v6939_v34 = vld [vmem:[#allocation25_spill] sm:$0xff]  ;;  %v6942_v21 = vld [vmem:[#allocation28_spill] sm:$0xff] }
 0x72b   :  { %5268 = vrcp.f32 %v2256_v63 }
 0x72c   :  { %5270 = vrcp.f32 %v2270_v15 }
 0x72d   :  { %5272 = vtanh.f32 %v2276_v56 }
 0x731   :  { %v5261_v5 = vpop.eup %5260 }
 0x732   :  { %v5263_v26 = vpop.eup %5262  ;;  %v2281_v47 = vmul.f32 %v5261_v5, %v5259_v18 }
 0x733   :  { %v5265_v41 = vpop.eup %5264  ;;  %v2279_v13 = vmul.f32 %v5263_v26, %v6371_v54  ;;  %v6937_v54 = vld [vmem:[#allocation23_spill] sm:$0xff] }
 0x734   :  { %v5267_v17 = vpop.eup %5266  ;;  %v2283_v6 = vmul.f32 %v5265_v41, %v2281_v47 }
 0x735   :  { %v5269_v32 = vpop.eup %5268 }
 0x736   :  { %v5271_v8 = vpop.eup %5270  ;;  %v2282_v35 = vmul.f32 %v5269_v32, %v5267_v17  ;;  %v6448_v43 = vadd.f32 %v2283_v6, %v2279_v13 }
 0x737   :  { %v5273_v39 = vpop.eup %5272  ;;  %v2280_v0 = vmul.f32 %v5271_v8, %v6375_v42  ;;  %v6938_v42 = vld [vmem:[#allocation24_spill] sm:$0xff] }
 0x738   :  { %v2284_v10 = vmul.f32 %v5273_v39, %v2282_v35  ;;  %4140 = vmatprep.mubr.f32.mxu0 %v6448_v43 }
 0x73a   :  { %v6452_v56 = vadd.f32 %v2284_v10, %v2280_v0  ;;  %v5447_v0 = vld [vmem:[%s6803_s3 + $0x14] sm:$0x1f] }
 0x73b   :  { %v698_v10 = vrot.slane %v5447_v0, %v6165_v29 }
 0x73c   :  { %4141 = vmatmul.mubr.f32.vlgmr.msra.gmra.mrb[44].mxu0 %v6452_v56 }
 0x73d   :  { %4670 = vmatpush1.bf16.msra.mxu0 %v5828_v25  ;;  %2460 = vmatprep.mubr.f32.mxu0 %v6909_v60 }
 0x73e   :  { %4672 = vmatprep.subr.bf16.mxu0 %v6910_v2 }
 0x741   :  { %4674 = vmatpush1.bf16.msra.mxu0 %v6911_v7 }
 0x742   :  { %4676 = vmatprep.subr.bf16.mxu0 %v6912_v28 }
 0x745   :  { %4678 = vmatpush1.bf16.msra.mxu0 %v6913_v50 }
 0x746   :  { %4680 = vmatprep.subr.bf16.mxu0 %v6914_v20 }
 0x749   :  { %4682 = vmatpush1.bf16.msra.mxu0 %v6915_v16 }
 0x74a   :  { %4684 = vmatprep.subr.bf16.mxu0 %v6916_v57 }
 0x74d   :  { %4686 = vmatpush1.bf16.msra.mxu0 %v6917_v48 }
 0x74e   :  { %4688 = vmatprep.subr.bf16.mxu0 %v6937_v54 }
 0x751   :  { %4690 = vmatpush1.bf16.msra.mxu0 %v6938_v42 }
 0x752   :  { %4692 = vmatprep.subr.bf16.mxu0 %v6939_v34 }
 0x755   :  { %4694 = vmatpush1.bf16.msra.mxu0 %v6940_v53 }
 0x756   :  { %4696 = vmatprep.subr.bf16.mxu0 %v6941_v22 }
 0x759   :  { %4698 = vmatpush1.bf16.msra.mxu0 %v6942_v21 }
 0x75a   :  { %4764 = vmatprep.subr.bf16.mxu0 %v5663_v19 }
 0x80f   :  { %v4142_v63 = vpop.f32.mrb[44].mxu0 }
 0x810   :  { %v2365_v15 = vadd.f32 %v4142_v63, %v2288_v36  ;;  %v2355_v18 = vpop.f32.mrb[45].mxu0  ;;  %v6943_v63 = vld [vmem:[#allocation44_spill] sm:$0xff] }
 0x811   :  { %v2364_v5 = vadd.f32 %v2355_v18, %v6443_v9 }
 0x812   :  { %v3784_v26 = vmul.f32 -1.442695, %v2365_v15  ;;  %v849_v15 = vadd.f32 %v698_v10, %v6943_v63 }
 0x813   :  { %v3783_v47 = vmul.f32 -1.442695, %v2364_v5  ;;  %v6944_v5 = vld [vmem:[#allocation46_spill] sm:$0xff] }
 0x814   :  { %5274 = vpow2.f32 %v3784_v26  ;;  %v3753_v18 = vmul.f32 -1.442695, %v849_v15  ;;  %v854_v26 = vadd.f32 %v698_v10, %v6944_v5 }
 0x815   :  { %5276 = vpow2.f32 %v3783_v47  ;;  %v690_v47 = vrot.slane %v5447_v0, %v6199_v62 }
 0x816   :  { %5278 = vtanh.f32 %v6448_v43 }
 0x817   :  { %5280 = vtanh.f32 %v6452_v56 }
 0x81e   :  { %v5275_v41 = vpop.eup %5274 }
 0x81f   :  { %v5277_v13 = vpop.eup %5276  ;;  %v2373_v17 = vadd.f32 1.0, %v5275_v41  ;;  %v694_v41 = vrot.slane %v5447_v0, %v6203_v3 }
 0x820   :  { %v2372_v6 = vadd.f32 1.0, %v5277_v13  ;;  %v5279_v32 = vpop.eup %5278  ;;  %v3754_v13 = vmul.f32 -1.442695, %v854_v26 }
 0x821   :  { %5282 = vrcp.f32 %v2373_v17  ;;  %v5281_v8 = vpop.eup %5280 }
 0x822   :  { %5284 = vrcp.f32 %v2372_v6 }
 0x823   :  { %5286 = vpow2.f32 %v3753_v18  ;;  %v6947_v18 = vld [vmem:[#allocation47_spill] sm:$0xff] }
 0x824   :  { %5288 = vpow2.f32 %v3754_v13 }
 0x82b   :  { %v5283_v36 = vpop.eup %5282 }
 0x82c   :  { %v5285_v35 = vpop.eup %5284  ;;  %v2381_v39 = vmul.f32 %v5283_v36, %v5281_v8  ;;  %v6945_v8 = vld [vmem:[#allocation45_spill] sm:$0xff] }
 0x82d   :  { %v2380_v9 = vmul.f32 %v5285_v35, %v5279_v32 }
 0x82e   :  { %2384 = vst [vmem:[#allocation8 + $0x38] sm:$0xff] %v2381_v39 }
 0x82f   :  { %2383 = vst [vmem:[#allocation8 + $0x30] sm:$0xff] %v2380_v9  ;;  %2461 = vmatmul.mubr.f32.vlgmr.msra.gmra.mrb[16].mxu0 %v2380_v9  ;;  %2538 = vmatmul.mubr.f32.vlgmr.msra.gmra.mrb[58].mxu1 %v2380_v9 }
 0x830   :  { %2466 = vmatprep.mubr.f32.mxu0 %v6909_v60  ;;  %2543 = vmatprep.mubr.f32.mxu1 %v6909_v60 }
 0x831   :  { %4734 = vmatpush3.bf16.msra.mxu1 %v5951_v14  ;;  %4766 = vmatpush1.bf16.msra.mxu0 %v5828_v25 }
 0x832   :  { %4736 = vmatprep.subr.bf16.mxu1 %v5962_v27  ;;  %4768 = vmatprep.subr.bf16.mxu0 %v6910_v2 }
 0x833   :  { %2467 = vmatmul.mubr.f32.gmra.mrb[18].mxu0 %v2381_v39  ;;  %2544 = vmatmul.mubr.f32.gmra.mrb[60].mxu1 %v2381_v39 }
 0x834   :  { %2763 = vmatprep.mubr.f32.mxu0 %v6909_v60 }
 0x835   :  { %4738 = vmatpush3.bf16.msra.mxu1 %v5962_v27  ;;  %4770 = vmatpush1.bf16.msra.mxu0 %v6911_v7 }
 0x836   :  { %4740 = vmatprep.subr.bf16.mxu1 %v5972_v33  ;;  %4772 = vmatprep.subr.bf16.mxu0 %v6912_v28 }
 0x839   :  { %4742 = vmatpush3.bf16.msra.mxu1 %v5972_v33  ;;  %4774 = vmatpush1.bf16.msra.mxu0 %v6913_v50 }
 0x83a   :  { %4744 = vmatprep.subr.bf16.mxu1 %v5982_v40  ;;  %4776 = vmatprep.subr.bf16.mxu0 %v6914_v20 }
 0x83d   :  { %4746 = vmatpush3.bf16.msra.mxu1 %v5982_v40  ;;  %4778 = vmatpush1.bf16.msra.mxu0 %v6915_v16 }
 0x83e   :  { %4748 = vmatprep.subr.bf16.mxu1 %v5992_v46  ;;  %4780 = vmatprep.subr.bf16.mxu0 %v6916_v57 }
 0x841   :  { %4750 = vmatpush3.bf16.msra.mxu1 %v5992_v46  ;;  %4782 = vmatpush1.bf16.msra.mxu0 %v6917_v48 }
 0x842   :  { %4752 = vmatprep.subr.bf16.mxu1 %v6002_v49  ;;  %4784 = vmatprep.subr.bf16.mxu0 %v6937_v54 }
 0x845   :  { %4754 = vmatpush3.bf16.msra.mxu1 %v6002_v49  ;;  %4786 = vmatpush1.bf16.msra.mxu0 %v6938_v42 }
 0x846   :  { %4756 = vmatprep.subr.bf16.mxu1 %v6012_v55  ;;  %4788 = vmatprep.subr.bf16.mxu0 %v6939_v34 }
 0x849   :  { %4758 = vmatpush3.bf16.msra.mxu1 %v6012_v55  ;;  %4790 = vmatpush1.bf16.msra.mxu0 %v6940_v53 }
 0x84a   :  { %4760 = vmatprep.subr.bf16.mxu1 %v6022_v61  ;;  %4792 = vmatprep.subr.bf16.mxu0 %v6941_v22 }
 0x84d   :  { %4762 = vmatpush3.bf16.msra.mxu1 %v6022_v61  ;;  %4794 = vmatpush1.bf16.msra.mxu0 %v6942_v21  ;;  %v6946_v21 = vld [vmem:[#allocation62_spill] sm:$0xff] }
 0x84e   :  { %4796 = vmatprep.subr.bf16.mxu1 %v5644_v12  ;;  %4828 = vmatprep.subr.bf16.mxu0 %v5951_v14 }
 0x902   :  { %v2462_v17 = vpop.f32.mrb[16].mxu0  ;;  %v2539_v6 = vpop.f32.mrb[58].mxu1 }
 0x903   :  { %v5069_v32 = vadd.f32 %v2462_v17, %v690_v47  ;;  %v2578_v36 = vadd.f32 %v2539_v6, %v6945_v8  ;;  %v2464_v35 = vpop.f32.mrb[17].mxu0  ;;  %v2541_v39 = vpop.f32.mrb[59].mxu1  ;;  %v6948_v6 = vld [vmem:[#allocation61_spill] sm:$0xff] }
 0x904   :  { %v5070_v9 = vadd.f32 %v2464_v35, %v694_v41  ;;  %v6520_v22 = vadd.f32 %v2541_v39, %v6946_v21  ;;  %v5287_v21 = vpop.eup %5286 }
 0x905   :  { %v3785_v63 = vmul.f32 -1.442695, %v5069_v32  ;;  %v1039_v32 = vadd.f32 1.0, %v5287_v21  ;;  %v5289_v13 = vpop.eup %5288 }
 0x906   :  { %v3787_v10 = vmul.f32 -1.442695, %v5070_v9  ;;  %v2468_v15 = vpop.f32.mrb[18].mxu0  ;;  %v2545_v5 = vpop.f32.mrb[60].mxu1 }
 0x907   :  { %5290 = vpow2.f32 %v3785_v63  ;;  %v5071_v0 = vadd.f32 %v2468_v15, %v690_v47  ;;  %v2579_v26 = vadd.f32 %v2545_v5, %v6947_v18  ;;  %v2470_v53 = vpop.f32.mrb[19].mxu0  ;;  %v2547_v34 = vpop.f32.mrb[61].mxu1  ;;  %v1040_v47 = vadd.f32 1.0, %v5289_v13 }
 0x908   :  { %5292 = vpow2.f32 %v3787_v10  ;;  %v5072_v17 = vadd.f32 %v2470_v53, %v694_v41  ;;  %v2591_v8 = vadd.f32 %v2547_v34, %v6948_v6 }
 0x909   :  { %v3786_v42 = vmul.f32 -1.442695, %v5071_v0 }
 0x90a   :  { %v3788_v35 = vmul.f32 -1.442695, %v5072_v17 }
 0x90b   :  { %5294 = vpow2.f32 %v3786_v42 }
 0x90c   :  { %5296 = vpow2.f32 %v3788_v35 }
 0x90d   :  { %5298 = vrcp.f32 %v1039_v32 }
 0x911   :  { %v5291_v39 = vpop.eup %5290 }
 0x912   :  { %v5293_v9 = vpop.eup %5292  ;;  %v2558_v54 = vadd.f32 1.0, %v5291_v39 }
 0x913   :  { %v2572_v63 = vadd.f32 1.0, %v5293_v9 }
 0x914   :  { %5300 = vrcp.f32 %v2558_v54 }
 0x915   :  { %v5295_v15 = vpop.eup %5294  ;;  %5302 = vrcp.f32 %v2572_v63 }
 0x916   :  { %v5297_v10 = vpop.eup %5296  ;;  %5304 = vtanh.f32 %v2578_v36  ;;  %v2559_v53 = vadd.f32 1.0, %v5295_v15 }
 0x917   :  { %5306 = vrcp.f32 %v1040_v47  ;;  %v2573_v34 = vadd.f32 1.0, %v5297_v10  ;;  %v5299_v42 = vpop.eup %5298 }
 0x918   :  { %5308 = vrcp.f32 %v2559_v53 }
 0x919   :  { %5310 = vrcp.f32 %v2573_v34 }
 0x91a   :  { %5312 = vtanh.f32 %v2579_v26 }
 0x91e   :  { %v5301_v41 = vpop.eup %5300 }
 0x91f   :  { %v5303_v5 = vpop.eup %5302  ;;  %v2584_v0 = vmul.f32 %v5301_v41, %v5299_v42 }
 0x920   :  { %v5305_v18 = vpop.eup %5304  ;;  %v2582_v17 = vmul.f32 %v5303_v5, %v6448_v43 }
 0x921   :  { %v5307_v6 = vpop.eup %5306  ;;  %v2586_v35 = vmul.f32 %v5305_v18, %v2584_v0 }
 0x922   :  { %v5309_v54 = vpop.eup %5308 }
 0x923   :  { %v5311_v21 = vpop.eup %5310  ;;  %v2585_v32 = vmul.f32 %v5309_v54, %v5307_v6  ;;  %v6525_v13 = vadd.f32 %v2586_v35, %v2582_v17  ;;  %v5448_v6 = vld [vmem:[%s6803_s3 + $0x19] sm:$0x1f] }
 0x924   :  { %v5313_v36 = vpop.eup %5312  ;;  %v2583_v39 = vmul.f32 %v5311_v21, %v6452_v56  ;;  %v718_v35 = vrot.slane %v5448_v6, %v6165_v29  ;;  %v6949_v54 = vld [vmem:[#allocation48_spill] sm:$0xff] }
 0x925   :  { %v2587_v9 = vmul.f32 %v5313_v36, %v2585_v32  ;;  %4175 = vmatprep.mubr.f32.mxu1 %v6525_v13  ;;  %v6950_v36 = vld [vmem:[#allocation50_spill] sm:$0xff] }
 0x926   :  { %v859_v21 = vadd.f32 %v718_v35, %v6949_v54 }
 0x927   :  { %v6529_v26 = vadd.f32 %v2587_v9, %v2583_v39  ;;  %v864_v39 = vadd.f32 %v718_v35, %v6950_v36  ;;  %v710_v9 = vrot.slane %v5448_v6, %v6199_v62  ;;  %v6953_v35 = vld [vmem:[#allocation51_spill] sm:$0xff] }
 0x928   :  { %v3755_v32 = vmul.f32 -1.442695, %v859_v21 }
 0x929   :  { %4176 = vmatmul.mubr.f32.vlgmr.msra.gmra.mrb[62].mxu1 %v6529_v26 }
 0x92a   :  { %4798 = vmatpush1.bf16.msra.mxu1 %v5676_v23  ;;  %2840 = vmatprep.mubr.f32.mxu1 %v6909_v60 }
 0x92b   :  { %4800 = vmatprep.subr.bf16.mxu1 %v5679_v24 }
 0x92e   :  { %4802 = vmatpush1.bf16.msra.mxu1 %v5693_v30 }
 0x92f   :  { %4804 = vmatprep.subr.bf16.mxu1 %v5696_v31 }
 0x932   :  { %4806 = vmatpush1.bf16.msra.mxu1 %v5710_v37 }
 0x933   :  { %4808 = vmatprep.subr.bf16.mxu1 %v5713_v38 }
 0x936   :  { %4810 = vmatpush1.bf16.msra.mxu1 %v5727_v44 }
 0x937   :  { %4812 = vmatprep.subr.bf16.mxu1 %v5730_v45 }
 0x93a   :  { %4814 = vmatpush1.bf16.msra.mxu1 %v5744_v51 }
 0x93b   :  { %4816 = vmatprep.subr.bf16.mxu1 %v5747_v52 }
 0x93e   :  { %4818 = vmatpush1.bf16.msra.mxu1 %v5761_v58 }
 0x93f   :  { %4820 = vmatprep.subr.bf16.mxu1 %v5764_v59 }
 0x942   :  { %4822 = vmatpush1.bf16.msra.mxu1 %v5778_v1 }
 0x943   :  { %4824 = vmatprep.subr.bf16.mxu1 %v5781_v4 }
 0x946   :  { %4826 = vmatpush1.bf16.msra.mxu1 %v5795_v11 }
 0x947   :  { %4892 = vmatprep.subr.bf16.mxu1 %v5644_v12 }
 0x9fc   :  { %v4177_v43 = vpop.f32.mrb[62].mxu1 }
 0x9fd   :  { %v2668_v56 = vadd.f32 %v4177_v43, %v2591_v8  ;;  %v2658_v47 = vpop.f32.mrb[63].mxu1  ;;  %v714_v43 = vrot.slane %v5448_v6, %v6203_v3 }
 0x9fe   :  { %v2667_v63 = vadd.f32 %v2658_v47, %v6520_v22 }
 0x9ff   :  { %v3790_v15 = vmul.f32 -1.442695, %v2668_v56  ;;  %v3756_v56 = vmul.f32 -1.442695, %v864_v39  ;;  %v6954_v39 = vld [vmem:[#allocation65_spill] sm:$0xff] }
 0xa00   :  { %v3789_v10 = vmul.f32 -1.442695, %v2667_v63 }
 0xa01   :  { %5314 = vpow2.f32 %v3790_v15 }
 0xa02   :  { %5316 = vpow2.f32 %v3789_v10  ;;  %v6951_v10 = vld [vmem:[#allocation49_spill] sm:$0xff] }
 0xa03   :  { %5318 = vtanh.f32 %v6525_v13 }
 0xa04   :  { %5320 = vtanh.f32 %v6529_v26 }
 0xa0b   :  { %v5315_v53 = vpop.eup %5314 }
 0xa0c   :  { %v5317_v34 = vpop.eup %5316  ;;  %v2676_v42 = vadd.f32 1.0, %v5315_v53 }
 0xa0d   :  { %v2675_v41 = vadd.f32 1.0, %v5317_v34  ;;  %v5319_v5 = vpop.eup %5318 }
 0xa0e   :  { %5322 = vrcp.f32 %v2676_v42  ;;  %v5321_v0 = vpop.eup %5320 }
 0xa0f   :  { %5324 = vrcp.f32 %v2675_v41 }
 0xa10   :  { %5326 = vpow2.f32 %v3755_v32 }
 0xa11   :  { %5328 = vpow2.f32 %v3756_v56 }
 0xa18   :  { %v5323_v8 = vpop.eup %5322 }
 0xa19   :  { %v5325_v18 = vpop.eup %5324  ;;  %v2684_v17 = vmul.f32 %v5323_v8, %v5321_v0 }
 0xa1a   :  { %v2683_v22 = vmul.f32 %v5325_v18, %v5319_v5  ;;  %v6952_v5 = vld [vmem:[#allocation66_spill] sm:$0xff] }
 0xa1b   :  { %2687 = vst [vmem:[#allocation8 + $0x48] sm:$0xff] %v2684_v17 }
 0xa1c   :  { %2686 = vst [vmem:[#allocation8 + $0x40] sm:$0xff] %v2683_v22  ;;  %2764 = vmatmul.mubr.f32.vlgmr.msra.gmra.mrb[20].mxu0 %v2683_v22  ;;  %2841 = vmatmul.mubr.f32.vlgmr.msra.gmra.mrb[64].mxu1 %v2683_v22 }
 0xa1d   :  { %2769 = vmatprep.mubr.f32.mxu0 %v6909_v60  ;;  %2846 = vmatprep.mubr.f32.mxu1 %v6909_v60 }
 0xa1e   :  { %4830 = vmatpush3.bf16.msra.mxu0 %v5951_v14  ;;  %4894 = vmatpush1.bf16.msra.mxu1 %v5676_v23 }
 0xa1f   :  { %4832 = vmatprep.subr.bf16.mxu0 %v5962_v27  ;;  %4896 = vmatprep.subr.bf16.mxu1 %v5679_v24 }
 0xa20   :  { %2770 = vmatmul.mubr.f32.gmra.mrb[22].mxu0 %v2684_v17  ;;  %2847 = vmatmul.mubr.f32.gmra.mrb[66].mxu1 %v2684_v17 }
 0xa21   :  { %3143 = vmatprep.mubr.f32.mxu1 %v6909_v60 }
 0xa22   :  { %4834 = vmatpush3.bf16.msra.mxu0 %v5962_v27  ;;  %4898 = vmatpush1.bf16.msra.mxu1 %v5693_v30 }
 0xa23   :  { %4836 = vmatprep.subr.bf16.mxu0 %v5972_v33  ;;  %4900 = vmatprep.subr.bf16.mxu1 %v5696_v31 }
 0xa26   :  { %4838 = vmatpush3.bf16.msra.mxu0 %v5972_v33  ;;  %4902 = vmatpush1.bf16.msra.mxu1 %v5710_v37 }
 0xa27   :  { %4840 = vmatprep.subr.bf16.mxu0 %v5982_v40  ;;  %4904 = vmatprep.subr.bf16.mxu1 %v5713_v38 }
 0xa2a   :  { %4842 = vmatpush3.bf16.msra.mxu0 %v5982_v40  ;;  %4906 = vmatpush1.bf16.msra.mxu1 %v5727_v44 }
 0xa2b   :  { %4844 = vmatprep.subr.bf16.mxu0 %v5992_v46  ;;  %4908 = vmatprep.subr.bf16.mxu1 %v5730_v45 }
 0xa2e   :  { %4846 = vmatpush3.bf16.msra.mxu0 %v5992_v46  ;;  %4910 = vmatpush1.bf16.msra.mxu1 %v5744_v51 }
 0xa2f   :  { %4848 = vmatprep.subr.bf16.mxu0 %v6002_v49  ;;  %4912 = vmatprep.subr.bf16.mxu1 %v5747_v52 }
 0xa32   :  { %4850 = vmatpush3.bf16.msra.mxu0 %v6002_v49  ;;  %4914 = vmatpush1.bf16.msra.mxu1 %v5761_v58 }
 0xa33   :  { %4852 = vmatprep.subr.bf16.mxu0 %v6012_v55  ;;  %4916 = vmatprep.subr.bf16.mxu1 %v5764_v59 }
 0xa36   :  { %4854 = vmatpush3.bf16.msra.mxu0 %v6012_v55  ;;  %4918 = vmatpush1.bf16.msra.mxu1 %v5778_v1 }
 0xa37   :  { %4856 = vmatprep.subr.bf16.mxu0 %v6022_v61  ;;  %4920 = vmatprep.subr.bf16.mxu1 %v5781_v4 }
 0xa3a   :  { %4858 = vmatpush3.bf16.msra.mxu0 %v6022_v61  ;;  %4922 = vmatpush1.bf16.msra.mxu1 %v5795_v11 }
 0xa3b   :  { %4860 = vmatprep.subr.bf16.mxu0 %v5663_v19  ;;  %4924 = vmatprep.subr.bf16.mxu1 %v5951_v14 }
 0xaef   :  { %v2765_v47 = vpop.f32.mrb[20].mxu0  ;;  %v2842_v63 = vpop.f32.mrb[64].mxu1 }
 0xaf0   :  { %v5073_v15 = vadd.f32 %v2765_v47, %v710_v9  ;;  %v2881_v53 = vadd.f32 %v2842_v63, %v6951_v10  ;;  %v2767_v34 = vpop.f32.mrb[21].mxu0  ;;  %v2844_v42 = vpop.f32.mrb[65].mxu1 }
 0xaf1   :  { %v5074_v41 = vadd.f32 %v2767_v34, %v714_v43  ;;  %v6597_v0 = vadd.f32 %v2844_v42, %v6952_v5  ;;  %v5327_v34 = vpop.eup %5326 }
 0xaf2   :  { %v3791_v8 = vmul.f32 -1.442695, %v5073_v15  ;;  %v1041_v15 = vadd.f32 1.0, %v5327_v34  ;;  %v5329_v56 = vpop.eup %5328 }
 0xaf3   :  { %v3793_v18 = vmul.f32 -1.442695, %v5074_v41  ;;  %v2771_v17 = vpop.f32.mrb[22].mxu0  ;;  %v2848_v22 = vpop.f32.mrb[66].mxu1 }
 0xaf4   :  { %5330 = vpow2.f32 %v3791_v8  ;;  %v5075_v6 = vadd.f32 %v2771_v17, %v710_v9  ;;  %v2882_v54 = vadd.f32 %v2848_v22, %v6953_v35  ;;  %v2773_v21 = vpop.f32.mrb[23].mxu0  ;;  %v2850_v32 = vpop.f32.mrb[67].mxu1  ;;  %v1042_v9 = vadd.f32 1.0, %v5329_v56 }
 0xaf5   :  { %5332 = vpow2.f32 %v3793_v18  ;;  %v5076_v36 = vadd.f32 %v2773_v21, %v714_v43  ;;  %v2894_v47 = vadd.f32 %v2850_v32, %v6954_v39 }
 0xaf6   :  { %v3792_v63 = vmul.f32 -1.442695, %v5075_v6 }
 0xaf7   :  { %v3794_v10 = vmul.f32 -1.442695, %v5076_v36 }
 0xaf8   :  { %5334 = vpow2.f32 %v3792_v63 }
 0xaf9   :  { %5336 = vpow2.f32 %v3794_v10 }
 0xafa   :  { %5338 = vrcp.f32 %v1041_v15 }
 0xafe   :  { %v5331_v42 = vpop.eup %5330 }
 0xaff   :  { %v5333_v41 = vpop.eup %5332  ;;  %v2861_v5 = vadd.f32 1.0, %v5331_v42 }
 0xb00   :  { %v2875_v8 = vadd.f32 1.0, %v5333_v41 }
 0xb01   :  { %5340 = vrcp.f32 %v2861_v5 }
 0xb02   :  { %v5335_v17 = vpop.eup %5334  ;;  %5342 = vrcp.f32 %v2875_v8  ;;  %v6958_v8 = vld [vmem:[#allocation26_spill] sm:$0xff] }
 0xb03   :  { %v5337_v18 = vpop.eup %5336  ;;  %5344 = vtanh.f32 %v2881_v53  ;;  %v2862_v43 = vadd.f32 1.0, %v5335_v17  ;;  %v6959_v17 = vld [vmem:[#allocation27_spill] sm:$0xff] }
 0xb04   :  { %5346 = vrcp.f32 %v1042_v9  ;;  %v2876_v22 = vadd.f32 1.0, %v5337_v18  ;;  %v5339_v6 = vpop.eup %5338  ;;  %v6957_v9 = vld [vmem:[#allocation25_spill] sm:$0xff]  ;;  %v6960_v18 = vld [vmem:[#allocation28_spill] sm:$0xff] }
 0xb05   :  { %5348 = vrcp.f32 %v2862_v43 }
 0xb06   :  { %5350 = vrcp.f32 %v2876_v22 }
 0xb07   :  { %5352 = vtanh.f32 %v2882_v54 }
 0xb0b   :  { %v5341_v35 = vpop.eup %5340 }
 0xb0c   :  { %v5343_v21 = vpop.eup %5342  ;;  %v2887_v32 = vmul.f32 %v5341_v35, %v5339_v6 }
 0xb0d   :  { %v5345_v36 = vpop.eup %5344  ;;  %v2885_v39 = vmul.f32 %v5343_v21, %v6525_v13  ;;  %v6955_v13 = vld [vmem:[#allocation23_spill] sm:$0xff] }
 0xb0e   :  { %v5347_v63 = vpop.eup %5346  ;;  %v2889_v10 = vmul.f32 %v5345_v36, %v2887_v32 }
 0xb0f   :  { %v5349_v34 = vpop.eup %5348 }
 0xb10   :  { %v5351_v15 = vpop.eup %5350  ;;  %v2888_v56 = vmul.f32 %v5349_v34, %v5347_v63  ;;  %v6602_v42 = vadd.f32 %v2889_v10, %v2885_v39 }
 0xb11   :  { %v5353_v53 = vpop.eup %5352  ;;  %v2886_v41 = vmul.f32 %v5351_v15, %v6529_v26  ;;  %v6956_v26 = vld [vmem:[#allocation24_spill] sm:$0xff] }
 0xb12   :  { %v2890_v5 = vmul.f32 %v5353_v53, %v2888_v56  ;;  %4210 = vmatprep.mubr.f32.mxu0 %v6602_v42 }
 0xb14   :  { %v6606_v54 = vadd.f32 %v2890_v5, %v2886_v41 }
 0xb16   :  { %4211 = vmatmul.mubr.f32.vlgmr.msra.gmra.mrb[46].mxu0 %v6606_v54 }
 0xb17   :  { %4862 = vmatpush1.bf16.msra.mxu0 %v5828_v25  ;;  %3066 = vmatprep.mubr.f32.mxu0 %v6909_v60 }
 0xb18   :  { %4864 = vmatprep.subr.bf16.mxu0 %v6910_v2 }
 0xb1b   :  { %4866 = vmatpush1.bf16.msra.mxu0 %v6911_v7 }
 0xb1c   :  { %4868 = vmatprep.subr.bf16.mxu0 %v6912_v28 }
 0xb1f   :  { %4870 = vmatpush1.bf16.msra.mxu0 %v6913_v50 }
 0xb20   :  { %4872 = vmatprep.subr.bf16.mxu0 %v6914_v20 }
 0xb23   :  { %4874 = vmatpush1.bf16.msra.mxu0 %v6915_v16 }
 0xb24   :  { %4876 = vmatprep.subr.bf16.mxu0 %v6916_v57 }
 0xb27   :  { %4878 = vmatpush1.bf16.msra.mxu0 %v6917_v48 }
 0xb28   :  { %4880 = vmatprep.subr.bf16.mxu0 %v6955_v13 }
 0xb2b   :  { %4882 = vmatpush1.bf16.msra.mxu0 %v6956_v26 }
 0xb2c   :  { %4884 = vmatprep.subr.bf16.mxu0 %v6957_v9 }
 0xb2f   :  { %4886 = vmatpush1.bf16.msra.mxu0 %v6958_v8 }
 0xb30   :  { %4888 = vmatprep.subr.bf16.mxu0 %v6959_v17 }
 0xb33   :  { %4890 = vmatpush1.bf16.msra.mxu0 %v6960_v18 }
 0xb34   :  { %4956 = vmatprep.subr.bf16.mxu0 %v5663_v19 }
 0xbe9   :  { %v4212_v43 = vpop.f32.mrb[46].mxu0 }
 0xbea   :  { %v2971_v22 = vadd.f32 %v4212_v43, %v2894_v47  ;;  %v2961_v6 = vpop.f32.mrb[47].mxu0 }
 0xbeb   :  { %v2970_v35 = vadd.f32 %v2961_v6, %v6597_v0 }
 0xbec   :  { %v3796_v21 = vmul.f32 -1.442695, %v2971_v22  ;;  %v6965_v22 = vld [vmem:[#allocation29_spill] sm:$0xff] }
 0xbed   :  { %v3795_v32 = vmul.f32 -1.442695, %v2970_v35 }
 0xbee   :  { %5354 = vpow2.f32 %v3796_v21  ;;  %v6966_v21 = vld [vmem:[#allocation30_spill] sm:$0xff] }
 0xbef   :  { %5356 = vpow2.f32 %v3795_v32 }
 0xbf0   :  { %5358 = vtanh.f32 %v6602_v42 }
 0xbf1   :  { %5360 = vtanh.f32 %v6606_v54 }
 0xbf8   :  { %v5355_v36 = vpop.eup %5354 }
 0xbf9   :  { %v5357_v39 = vpop.eup %5356  ;;  %v2979_v63 = vadd.f32 1.0, %v5355_v36 }
 0xbfa   :  { %v2978_v10 = vadd.f32 1.0, %v5357_v39  ;;  %v5359_v19 = vpop.eup %5358 }
 0xbfb   :  { %5362 = vrcp.f32 %v2979_v63  ;;  %v5361_v34 = vpop.eup %5360 }
 0xbfc   :  { %5364 = vrcp.f32 %v2978_v10 }
 0xc05   :  { %v5363_v47 = vpop.eup %5362 }
 0xc06   :  { %v5365_v15 = vpop.eup %5364  ;;  %v2987_v56 = vmul.f32 %v5363_v47, %v5361_v34 }
 0xc07   :  { %v2986_v0 = vmul.f32 %v5365_v15, %v5359_v19  ;;  %v6967_v19 = vld [vmem:[#allocation59_spill] sm:$0xff] }
 0xc08   :  { %2990 = vst [vmem:[#allocation8 + $0x58] sm:$0xff] %v2987_v56 }
 0xc09   :  { %2989 = vst [vmem:[#allocation8 + $0x50] sm:$0xff] %v2986_v0  ;;  %3067 = vmatmul.mubr.f32.vlgmr.msra.gmra.mrb[24].mxu0 %v2986_v0  ;;  %3144 = vmatmul.mubr.f32.vlgmr.msra.gmra.mrb[68].mxu1 %v2986_v0  ;;  %v6968_v0 = vld [vmem:[#allocation68_spill] sm:$0xff] }
 0xc0a   :  { %3072 = vmatprep.mubr.f32.mxu0 %v6909_v60  ;;  %3149 = vmatprep.mubr.f32.mxu1 %v6909_v60 }
 0xc0b   :  { %4926 = vmatpush3.bf16.msra.mxu1 %v5951_v14  ;;  %4958 = vmatpush1.bf16.msra.mxu0 %v5828_v25  ;;  %v5449_v25 = vld [vmem:[%s6803_s3 + $0x1e] sm:$0x1f] }
 0xc0c   :  { %4928 = vmatprep.subr.bf16.mxu1 %v5962_v27  ;;  %4960 = vmatprep.subr.bf16.mxu0 %v6910_v2  ;;  %v738_v2 = vrot.slane %v5449_v25, %v6165_v29 }
 0xc0d   :  { %3073 = vmatmul.mubr.f32.gmra.mrb[48].mxu0 %v2987_v56  ;;  %3150 = vmatmul.mubr.f32.gmra.mrb[70].mxu1 %v2987_v56 }
 0xc0e   :  { %3369 = vmatprep.mubr.f32.mxu0 %v6909_v60 }
 0xc0f   :  { %4930 = vmatpush3.bf16.msra.mxu1 %v5962_v27  ;;  %4962 = vmatpush1.bf16.msra.mxu0 %v6911_v7  ;;  %v6961_v7 = vld [vmem:[#allocation52_spill] sm:$0xff] }
 0xc10   :  { %4932 = vmatprep.subr.bf16.mxu1 %v5972_v33  ;;  %4964 = vmatprep.subr.bf16.mxu0 %v6912_v28  ;;  %v869_v28 = vadd.f32 %v738_v2, %v6961_v7 }
 0xc13   :  { %4934 = vmatpush3.bf16.msra.mxu1 %v5972_v33  ;;  %4966 = vmatpush1.bf16.msra.mxu0 %v6913_v50  ;;  %v3757_v50 = vmul.f32 -1.442695, %v869_v28 }
 0xc14   :  { %4936 = vmatprep.subr.bf16.mxu1 %v5982_v40  ;;  %4968 = vmatprep.subr.bf16.mxu0 %v6914_v20  ;;  %v6962_v20 = vld [vmem:[#allocation56_spill] sm:$0xff] }
 0xc15   :  { %5366 = vpow2.f32 %v3757_v50 }
 0xc17   :  { %4938 = vmatpush3.bf16.msra.mxu1 %v5982_v40  ;;  %4970 = vmatpush1.bf16.msra.mxu0 %v6915_v16  ;;  %v874_v16 = vadd.f32 %v738_v2, %v6962_v20 }
 0xc18   :  { %4940 = vmatprep.subr.bf16.mxu1 %v5992_v46  ;;  %4972 = vmatprep.subr.bf16.mxu0 %v6916_v57  ;;  %v730_v57 = vrot.slane %v5449_v25, %v6199_v62 }
 0xc19   :  { %v3758_v53 = vmul.f32 -1.442695, %v874_v16 }
 0xc1a   :  { %v872_v6 = vadd.f32 %v730_v57, %v6965_v22 }
 0xc1b   :  { %4942 = vmatpush3.bf16.msra.mxu1 %v5992_v46  ;;  %4974 = vmatpush1.bf16.msra.mxu0 %v6917_v48  ;;  %v734_v48 = vrot.slane %v5449_v25, %v6203_v3  ;;  %5368 = vpow2.f32 %v3758_v53 }
 0xc1c   :  { %4944 = vmatprep.subr.bf16.mxu1 %v6002_v49  ;;  %4976 = vmatprep.subr.bf16.mxu0 %v6955_v13  ;;  %v6963_v13 = vld [vmem:[#allocation55_spill] sm:$0xff] }
 0xc1d   :  { %v873_v32 = vadd.f32 %v734_v48, %v6966_v21 }
 0xc1f   :  { %4946 = vmatpush3.bf16.msra.mxu1 %v6002_v49  ;;  %4978 = vmatpush1.bf16.msra.mxu0 %v6956_v26  ;;  %v5367_v28 = vpop.eup %5366 }
 0xc20   :  { %4948 = vmatprep.subr.bf16.mxu1 %v6012_v55  ;;  %4980 = vmatprep.subr.bf16.mxu0 %v6957_v9  ;;  %v1043_v50 = vadd.f32 1.0, %v5367_v28  ;;  %v6973_v28 = vld [vmem:[#allocation63_spill] sm:$0xff] }
 0xc23   :  { %4950 = vmatpush3.bf16.msra.mxu1 %v6012_v55  ;;  %4982 = vmatpush1.bf16.msra.mxu0 %v6958_v8 }
 0xc24   :  { %4952 = vmatprep.subr.bf16.mxu1 %v6022_v61  ;;  %4984 = vmatprep.subr.bf16.mxu0 %v6959_v17 }
 0xc25   :  { %v5369_v20 = vpop.eup %5368 }
 0xc26   :  { %v1044_v53 = vadd.f32 1.0, %v5369_v20 }
 0xc27   :  { %4954 = vmatpush3.bf16.msra.mxu1 %v6022_v61  ;;  %4986 = vmatpush1.bf16.msra.mxu0 %v6960_v18  ;;  %v6964_v18 = vld [vmem:[#allocation69_spill] sm:$0xff] }
 0xc28   :  { %4988 = vmatprep.subr.bf16.mxu1 %v5644_v12  ;;  %5020 = vmatprep.subr.bf16.mxu0 %v5951_v14 }
 0xcdc   :  { %v3068_v12 = vpop.f32.mrb[24].mxu0  ;;  %v3145_v41 = vpop.f32.mrb[68].mxu1 }
 0xcdd   :  { %v5077_v5 = vadd.f32 %v3068_v12, %v730_v57  ;;  %v3184_v26 = vadd.f32 %v3145_v41, %v6963_v13  ;;  %v3070_v9 = vpop.f32.mrb[25].mxu0  ;;  %v3147_v8 = vpop.f32.mrb[69].mxu1 }
 0xcde   :  { %v5078_v17 = vadd.f32 %v3070_v9, %v734_v48  ;;  %v6674_v43 = vadd.f32 %v3147_v8, %v6964_v18 }
 0xcdf   :  { %v3797_v35 = vmul.f32 -1.442695, %v5077_v5 }
 0xce0   :  { %v3799_v36 = vmul.f32 -1.442695, %v5078_v17  ;;  %v3074_v39 = vpop.f32.mrb[48].mxu0  ;;  %v3151_v63 = vpop.f32.mrb[70].mxu1 }
 0xce1   :  { %5370 = vpow2.f32 %v3797_v35  ;;  %v3157_v10 = vadd.f32 %v3074_v39, %v872_v6  ;;  %v3185_v34 = vadd.f32 %v3151_v63, %v6967_v19  ;;  %v3076_v47 = vpop.f32.mrb[49].mxu0  ;;  %v3153_v15 = vpop.f32.mrb[71].mxu1 }
 0xce2   :  { %5372 = vpow2.f32 %v3799_v36  ;;  %v3171_v56 = vadd.f32 %v3076_v47, %v873_v32  ;;  %v3197_v25 = vadd.f32 %v3153_v15, %v6968_v0 }
 0xce3   :  { %v3798_v2 = vmul.f32 -1.442695, %v3157_v10 }
 0xce4   :  { %v3800_v7 = vmul.f32 -1.442695, %v3171_v56  ;;  %v6972_v56 = vld [vmem:[#allocation32_spill] sm:$0xff] }
 0xce5   :  { %5374 = vpow2.f32 %v3798_v2 }
 0xce6   :  { %5376 = vpow2.f32 %v3800_v7 }
 0xce7   :  { %5378 = vrcp.f32 %v1043_v50 }
 0xceb   :  { %v5371_v16 = vpop.eup %5370 }
 0xcec   :  { %v5373_v57 = vpop.eup %5372  ;;  %v3164_v48 = vadd.f32 1.0, %v5371_v16 }
 0xced   :  { %v3178_v12 = vadd.f32 1.0, %v5373_v57 }
 0xcee   :  { %5380 = vrcp.f32 %v3164_v48 }
 0xcef   :  { %v5375_v41 = vpop.eup %5374  ;;  %5382 = vrcp.f32 %v3178_v12  ;;  %v6976_v12 = vld [vmem:[#allocation34_spill] sm:$0xff] }
 0xcf0   :  { %v5377_v5 = vpop.eup %5376  ;;  %5384 = vtanh.f32 %v3184_v26  ;;  %v3165_v13 = vadd.f32 1.0, %v5375_v41 }
 0xcf1   :  { %5386 = vrcp.f32 %v1044_v53  ;;  %v3179_v9 = vadd.f32 1.0, %v5377_v5  ;;  %v5379_v8 = vpop.eup %5378 }
 0xcf2   :  { %5388 = vrcp.f32 %v3165_v13 }
 0xcf3   :  { %5390 = vrcp.f32 %v3179_v9 }
 0xcf4   :  { %5392 = vtanh.f32 %v3185_v34 }
 0xcf8   :  { %v5381_v17 = vpop.eup %5380 }
 0xcf9   :  { %v5383_v18 = vpop.eup %5382  ;;  %v3190_v22 = vmul.f32 %v5381_v17, %v5379_v8  ;;  %v6977_v17 = vld [vmem:[#allocation67_spill] sm:$0xff] }
 0xcfa   :  { %v5385_v6 = vpop.eup %5384  ;;  %v3188_v35 = vmul.f32 %v5383_v18, %v6602_v42 }
 0xcfb   :  { %v5387_v21 = vpop.eup %5386  ;;  %v3192_v32 = vmul.f32 %v5385_v6, %v3190_v22 }
 0xcfc   :  { %v5389_v36 = vpop.eup %5388 }
 0xcfd   :  { %v5391_v39 = vpop.eup %5390  ;;  %v3191_v63 = vmul.f32 %v5389_v36, %v5387_v21  ;;  %v6681_v10 = vadd.f32 %v3192_v32, %v3188_v35  ;;  %v6978_v21 = vld [vmem:[#allocation70_spill] sm:$0xff] }
 0xcfe   :  { %v5393_v26 = vpop.eup %5392  ;;  %v3189_v19 = vmul.f32 %v5391_v39, %v6606_v54  ;;  %v6970_v54 = vld [vmem:[#allocation64_spill] sm:$0xff] }
 0xcff   :  { %v3193_v47 = vmul.f32 %v5393_v26, %v3191_v63  ;;  %4245 = vmatprep.mubr.f32.mxu1 %v6681_v10 }
 0xd01   :  { %v6685_v34 = vadd.f32 %v3193_v47, %v3189_v19 }
 0xd03   :  { %4246 = vmatmul.mubr.f32.vlgmr.msra.gmra.mrb[72].mxu1 %v6685_v34 }
 0xd04   :  { %4990 = vmatpush1.bf16.msra.mxu1 %v5676_v23  ;;  %3446 = vmatprep.mubr.f32.mxu1 %v6909_v60 }
 0xd05   :  { %4992 = vmatprep.subr.bf16.mxu1 %v5679_v24 }
 0xd08   :  { %4994 = vmatpush1.bf16.msra.mxu1 %v5693_v30 }
 0xd09   :  { %4996 = vmatprep.subr.bf16.mxu1 %v5696_v31 }
 0xd0c   :  { %4998 = vmatpush1.bf16.msra.mxu1 %v5710_v37 }
 0xd0d   :  { %5000 = vmatprep.subr.bf16.mxu1 %v5713_v38 }
 0xd10   :  { %5002 = vmatpush1.bf16.msra.mxu1 %v5727_v44 }
 0xd11   :  { %5004 = vmatprep.subr.bf16.mxu1 %v5730_v45 }
 0xd14   :  { %5006 = vmatpush1.bf16.msra.mxu1 %v5744_v51 }
 0xd15   :  { %5008 = vmatprep.subr.bf16.mxu1 %v5747_v52 }
 0xd18   :  { %5010 = vmatpush1.bf16.msra.mxu1 %v5761_v58 }
 0xd19   :  { %5012 = vmatprep.subr.bf16.mxu1 %v5764_v59 }
 0xd1c   :  { %5014 = vmatpush1.bf16.msra.mxu1 %v5778_v1 }
 0xd1d   :  { %5016 = vmatprep.subr.bf16.mxu1 %v5781_v4 }
 0xd20   :  { %5018 = vmatpush1.bf16.msra.mxu1 %v5795_v11 }
 0xdd6   :  { %v4247_v23 = vpop.f32.mrb[72].mxu1 }
 0xdd7   :  { %v3274_v24 = vadd.f32 %v4247_v23, %v3197_v25  ;;  %v3264_v30 = vpop.f32.mrb[73].mxu1 }
 0xdd8   :  { %v3273_v31 = vadd.f32 %v3264_v30, %v6674_v43 }
 0xdd9   :  { %v3802_v37 = vmul.f32 -1.442695, %v3274_v24 }
 0xdda   :  { %v3801_v38 = vmul.f32 -1.442695, %v3273_v31 }
 0xddb   :  { %5394 = vpow2.f32 %v3802_v37 }
 0xddc   :  { %5396 = vpow2.f32 %v3801_v38 }
 0xddd   :  { %5398 = vtanh.f32 %v6681_v10 }
 0xdde   :  { %5400 = vtanh.f32 %v6685_v34 }
 0xde5   :  { %v5395_v44 = vpop.eup %5394 }
 0xde6   :  { %v5397_v45 = vpop.eup %5396  ;;  %v3282_v51 = vadd.f32 1.0, %v5395_v44 }
 0xde7   :  { %v3281_v52 = vadd.f32 1.0, %v5397_v45  ;;  %v5399_v58 = vpop.eup %5398 }
 0xde8   :  { %5402 = vrcp.f32 %v3282_v51  ;;  %v5401_v59 = vpop.eup %5400 }
 0xde9   :  { %5404 = vrcp.f32 %v3281_v52 }
 0xdf2   :  { %v5403_v1 = vpop.eup %5402 }
 0xdf3   :  { %v5405_v4 = vpop.eup %5404  ;;  %v3290_v11 = vmul.f32 %v5403_v1, %v5401_v59 }
 0xdf4   :  { %v3289_v42 = vmul.f32 %v5405_v4, %v5399_v58 }
 0xdf5   :  { %3293 = vst [vmem:[#allocation8 + $0x68] sm:$0xff] %v3290_v11 }
 0xdf6   :  { %3292 = vst [vmem:[#allocation8 + $0x60] sm:$0xff] %v3289_v42  ;;  %3370 = vmatmul.mubr.f32.vlgmr.msra.gmra.mrb[50].mxu0 %v3289_v42  ;;  %3447 = vmatmul.mubr.f32.vlgmr.msra.gmra.mrb[74].mxu1 %v3289_v42 }
 0xdf7   :  { %3375 = vmatprep.mubr.f32.mxu0 %v6909_v60  ;;  %3452 = vmatprep.mubr.f32.mxu1 %v6909_v60 }
 0xdf8   :  { %5022 = vmatpush3.bf16.msra.mxu0 %v5951_v14  ;;  %v5450_v14 = vld [vmem:[%s6803_s3 + $0x23] sm:$0x1f]  ;;  %s3809_s3 = sld [smem:[#allocation3 + $0x1]] }
 0xdf9   :  { %5024 = vmatprep.subr.bf16.mxu0 %v5962_v27 }
 0xdfa   :  { %3376 = vmatmul.mubr.f32.gmra.mrb[52].mxu0 %v3290_v11  ;;  %3453 = vmatmul.mubr.f32.gmra.mrb[76].mxu1 %v3290_v11 }
 0xdfc   :  { %5026 = vmatpush3.bf16.msra.mxu0 %v5962_v27  ;;  %v758_v27 = vrot.slane %v5450_v14, %v6165_v29 }
 0xdfd   :  { %5028 = vmatprep.subr.bf16.mxu0 %v5972_v33 }
 0xdfe   :  { %v884_v43 = vadd.f32 %v758_v27, %v6970_v54 }
 0xe00   :  { %5030 = vmatpush3.bf16.msra.mxu0 %v5972_v33  ;;  %v6969_v33 = vld [vmem:[#allocation60_spill] sm:$0xff] }
 0xe01   :  { %5032 = vmatprep.subr.bf16.mxu0 %v5982_v40 }
 0xe04   :  { %5034 = vmatpush3.bf16.msra.mxu0 %v5982_v40  ;;  %v879_v40 = vadd.f32 %v758_v27, %v6969_v33 }
 0xe05   :  { %5036 = vmatprep.subr.bf16.mxu0 %v5992_v46 }
 0xe06   :  { %v3759_v60 = vmul.f32 -1.442695, %v879_v40 }
 0xe08   :  { %5038 = vmatpush3.bf16.msra.mxu0 %v5992_v46  ;;  %v750_v46 = vrot.slane %v5450_v14, %v6199_v62  ;;  %5406 = vpow2.f32 %v3759_v60  ;;  %v6974_v62 = vld [vmem:[#allocation71_spill] sm:$0xff] }
 0xe09   :  { %5040 = vmatprep.subr.bf16.mxu0 %v6002_v49 }
 0xe0c   :  { %5042 = vmatpush3.bf16.msra.mxu0 %v6002_v49  ;;  %v754_v49 = vrot.slane %v5450_v14, %v6203_v3  ;;  %v6975_v3 = vld [vmem:[#allocation33_spill] sm:$0xff] }
 0xe0d   :  { %5044 = vmatprep.subr.bf16.mxu0 %v6012_v55  ;;  %v882_v48 = vadd.f32 %v750_v46, %v6975_v3 }
 0xe0e   :  { %v878_v0 = vadd.f32 %v754_v49, %v6972_v56  ;;  %v883_v41 = vadd.f32 %v754_v49, %v6976_v12 }
 0xe10   :  { %5046 = vmatpush3.bf16.msra.mxu0 %v6012_v55  ;;  %v6971_v55 = vld [vmem:[#allocation31_spill] sm:$0xff] }
 0xe11   :  { %5048 = vmatprep.subr.bf16.mxu0 %v6022_v61  ;;  %v877_v15 = vadd.f32 %v750_v46, %v6971_v55 }
 0xe12   :  { %v5407_v63 = vpop.eup %5406 }
 0xe13   :  { %v1045_v26 = vadd.f32 1.0, %v5407_v63 }
 0xe14   :  { %5050 = vmatpush3.bf16.msra.mxu0 %v6022_v61  ;;  %v3760_v61 = vmul.f32 -1.442695, %v884_v43 }
 0xe16   :  { %5408 = vpow2.f32 %v3760_v61 }
 0xe20   :  { %v5409_v19 = vpop.eup %5408 }
 0xe21   :  { %v1046_v30 = vadd.f32 1.0, %v5409_v19 }
 0xec9   :  { %v3371_v25 = vpop.f32.mrb[50].mxu0  ;;  %v3448_v2 = vpop.f32.mrb[74].mxu1 }
 0xeca   :  { %v3459_v7 = vadd.f32 %v3371_v25, %v877_v15  ;;  %v3487_v29 = vadd.f32 %v3448_v2, %v6973_v28  ;;  %v3373_v50 = vpop.f32.mrb[51].mxu0  ;;  %v3450_v20 = vpop.f32.mrb[75].mxu1  ;;  %v3608_v28 = vstv %s3809_s3 }
 0xecb   :  { %v3473_v16 = vadd.f32 %v3373_v50, %v878_v0  ;;  %v3499_v57 = vadd.f32 %v3450_v20, %v6974_v62  ;;  %v3599_v50 = vld [vmem:[#allocation8 + $0x8] sm:$0xff]  ;;  %v3600_v20 = vstv %s6742_s0  ;;  %v3616_v62 = vstv %s6744_s13 }
 0xecc   :  { %v3803_v53 = vmul.f32 -1.442695, %v3459_v7  ;;  %v3607_v7 = vld [vmem:[#allocation8 + $0x18] sm:$0xff] }
 0xecd   :  { %v3805_v5 = vmul.f32 -1.442695, %v3473_v16  ;;  %v3377_v13 = vpop.f32.mrb[52].mxu0  ;;  %v3454_v9 = vpop.f32.mrb[76].mxu1  ;;  %v3615_v16 = vld [vmem:[#allocation8 + $0x28] sm:$0xff]  ;;  %v3610_v3 = vmul.f32 %v3608_v28, %v3607_v7 }
 0xece   :  { %5410 = vpow2.f32 %v3803_v53  ;;  %v3460_v8 = vadd.f32 %v3377_v13, %v882_v48  ;;  %v3488_v18 = vadd.f32 %v3454_v9, %v6977_v17  ;;  %v3379_v22 = vpop.f32.mrb[53].mxu0  ;;  %v3456_v6 = vpop.f32.mrb[77].mxu1  ;;  %v3614_v48 = vld [vmem:[#allocation8 + $0x20] sm:$0xff]  ;;  %v3602_v9 = vmul.f32 %v3600_v20, %v3599_v50  ;;  %v3622_v17 = vld [vmem:[#allocation8 + $0x30] sm:$0xff] }
 0xecf   :  { %5412 = vpow2.f32 %v3805_v5  ;;  %v3474_v35 = vadd.f32 %v3379_v22, %v883_v41  ;;  %v3500_v32 = vadd.f32 %v3456_v6, %v6978_v21  ;;  %v3623_v41 = vld [vmem:[#allocation8 + $0x38] sm:$0xff]  ;;  %v3624_v5 = vstv %s6746_s5 }
 0xed0   :  { %v3804_v36 = vmul.f32 -1.442695, %v3460_v8  ;;  %v3618_v8 = vmul.f32 %v3616_v62, %v3615_v16  ;;  %v3617_v6 = vmul.f32 %v3616_v62, %v3614_v48  ;;  %v3632_v21 = vstv %s6748_s14 }
 0xed1   :  { %v3806_v39 = vmul.f32 -1.442695, %v3474_v35  ;;  %v3631_v35 = vld [vmem:[#allocation8 + $0x48] sm:$0xff]  ;;  %v3626_v63 = vmul.f32 %v3624_v5, %v3623_v41 }
 0xed2   :  { %5414 = vpow2.f32 %v3804_v36 }
 0xed3   :  { %5416 = vpow2.f32 %v3806_v39  ;;  %v3612_v39 = vadd.f32 %v3610_v3, %v3602_v9 }
 0xed4   :  { %5418 = vrcp.f32 %v1045_v26  ;;  %v3630_v26 = vld [vmem:[#allocation8 + $0x40] sm:$0xff] }
 0xed8   :  { %v5411_v47 = vpop.eup %5410 }
 0xed9   :  { %v5413_v23 = vpop.eup %5412  ;;  %v3467_v24 = vadd.f32 1.0, %v5411_v47 }
 0xeda   :  { %v3481_v31 = vadd.f32 1.0, %v5413_v23  ;;  %v3625_v23 = vmul.f32 %v3624_v5, %v3622_v17 }
 0xedb   :  { %5420 = vrcp.f32 %v3467_v24  ;;  %v3639_v24 = vld [vmem:[#allocation8 + $0x58] sm:$0xff] }
 0xedc   :  { %v5415_v37 = vpop.eup %5414  ;;  %5422 = vrcp.f32 %v3481_v31  ;;  %v3620_v31 = vadd.f32 %v3618_v8, %v3612_v39 }
 0xedd   :  { %v5417_v38 = vpop.eup %5416  ;;  %5424 = vtanh.f32 %v3487_v29  ;;  %v3468_v44 = vadd.f32 1.0, %v5415_v37  ;;  %v3606_v29 = vld [vmem:[#allocation8 + $0x10] sm:$0xff]  ;;  %v3634_v37 = vmul.f32 %v3632_v21, %v3631_v35 }
 0xede   :  { %5426 = vrcp.f32 %v1046_v30  ;;  %v3482_v45 = vadd.f32 1.0, %v5417_v38  ;;  %v5419_v51 = vpop.eup %5418  ;;  %v3609_v12 = vmul.f32 %v3608_v28, %v3606_v29  ;;  %v3640_v30 = vstv %s6750_s15  ;;  %v3638_v38 = vld [vmem:[#allocation8 + $0x50] sm:$0xff] }
 0xedf   :  { %5428 = vrcp.f32 %v3468_v44 }
 0xee0   :  { %5430 = vrcp.f32 %v3482_v45  ;;  %v3633_v45 = vmul.f32 %v3632_v21, %v3630_v26 }
 0xee1   :  { %5432 = vtanh.f32 %v3488_v18 }
 0xee5   :  { %v5421_v52 = vpop.eup %5420 }
 0xee6   :  { %v5423_v58 = vpop.eup %5422  ;;  %v3493_v59 = vmul.f32 %v5421_v52, %v5419_v51  ;;  %v3647_v51 = vld [vmem:[#allocation8 + $0x68] sm:$0xff]  ;;  %v3648_v52 = vstv %s6754_s2 }
 0xee7   :  { %v5425_v1 = vpop.eup %5424  ;;  %v3491_v4 = vmul.f32 %v5423_v58, %v6681_v10 }
 0xee8   :  { %v5427_v11 = vpop.eup %5426  ;;  %v3495_v42 = vmul.f32 %v5425_v1, %v3493_v59 }
 0xee9   :  { %v5429_v14 = vpop.eup %5428 }
 0xeea   :  { %v5431_v27 = vpop.eup %5430  ;;  %v3494_v33 = vmul.f32 %v5429_v14, %v5427_v11  ;;  %v3497_v40 = vadd.f32 %v3495_v42, %v3491_v4 }
 0xeeb   :  { %v5433_v46 = vpop.eup %5432  ;;  %v3492_v49 = vmul.f32 %v5431_v27, %v6685_v34 }
 0xeec   :  { %v3496_v60 = vmul.f32 %v5433_v46, %v3494_v33  ;;  %4280 = vmatprep.mubr.f32.mxu0 %v3497_v40 }
 0xeee   :  { %v3498_v54 = vadd.f32 %v3496_v60, %v3492_v49 }
 0xef0   :  { %4281 = vmatmul.mubr.f32.vlgmr.msra.gmra.mrb[54].mxu0 %v3498_v54 }
 0xfc3   :  { %v4282_v43 = vpop.f32.mrb[54].mxu0 }
 0xfc4   :  { %v3577_v55 = vadd.f32 %v4282_v43, %v3500_v32  ;;  %v3567_v15 = vpop.f32.mrb[55].mxu0 }
 0xfc5   :  { %v3576_v56 = vadd.f32 %v3567_v15, %v3499_v57  ;;  %v3598_v57 = vld [vmem:[#allocation8] sm:$0xff] }
 0xfc6   :  { %v3808_v0 = vmul.f32 -1.442695, %v3577_v55  ;;  %v3601_v22 = vmul.f32 %v3600_v20, %v3598_v57 }
 0xfc7   :  { %v3807_v61 = vmul.f32 -1.442695, %v3576_v56 }
 0xfc8   :  { %5434 = vpow2.f32 %v3808_v0  ;;  %v3611_v47 = vadd.f32 %v3609_v12, %v3601_v22 }
 0xfc9   :  { %5436 = vpow2.f32 %v3807_v61 }
 0xfca   :  { %5438 = vtanh.f32 %v3497_v40  ;;  %v3619_v44 = vadd.f32 %v3617_v6, %v3611_v47 }
 0xfcb   :  { %5440 = vtanh.f32 %v3498_v54 }
 0xfd2   :  { %v5435_v10 = vpop.eup %5434 }
 0xfd3   :  { %v5437_v25 = vpop.eup %5436  ;;  %v3585_v2 = vadd.f32 1.0, %v5435_v10 }
 0xfd4   :  { %v3584_v34 = vadd.f32 1.0, %v5437_v25  ;;  %v5439_v53 = vpop.eup %5438 }
 0xfd5   :  { %5442 = vrcp.f32 %v3585_v2  ;;  %v5441_v13 = vpop.eup %5440 }
 0xfd6   :  { %5444 = vrcp.f32 %v3584_v34 }
 0xfdf   :  { %v5443_v18 = vpop.eup %5442 }
 0xfe0   :  { %v5445_v32 = vpop.eup %5444  ;;  %v3593_v36 = vmul.f32 %v5443_v18, %v5441_v13 }
 0xfe1   :  { %v3592_v19 = vmul.f32 %v5445_v32, %v5439_v53 }
 0xfe2   :  { %3596 = vst [vmem:[#allocation8 + $0x78] sm:$0xff] %v3593_v36 }
 0xfe3   :  { %3595 = vst [vmem:[#allocation8 + $0x70] sm:$0xff] %v3592_v19 }
 0xfe4   :  { %5496 = shalt.err (!%p5493_p3)
}
 0xfe5   :  { %s5497_s22 = scalar_lea.hbm %s6806_s6, 2048 }
 0xfe6   :  { %p5498_p4 = scmp.ne.s32.totalorder %s6806_s6, %s5497_s22  ;;  %p5501_p5 = scmp.lt.u32.totalorder %s5497_s22, %s6806_s6 }
 0xfe8   :  { %p5503_p6 = pnand %p5501_p5, %p5498_p4 }
 0xfea   :  { %5506 = shalt.err (!%p5503_p6)
}
 0xfeb   :  { %s5543_s26 = smov 128   ;;  %s5544_s27 = smov 8   ;;  %v3628_v58 = vadd.f32 %v3626_v63, %v3620_v31  ;;  %v3642_v59 = vmul.f32 %v3640_v30, %v3639_v24  ;;  %v3646_v1 = vld [vmem:[#allocation8 + $0x60] sm:$0xff]  ;;  %v3627_v4 = vadd.f32 %v3625_v23, %v3619_v44  ;;  %v3641_v11 = vmul.f32 %v3640_v30, %v3638_v38  ;;  %v3655_v60 = vld [vmem:[#allocation8 + $0x78] sm:$0xff]  ;;  %v3654_v43 = vld [vmem:[#allocation8 + $0x70] sm:$0xff] }
 0xfec   :  { %3674 = dma.vmem_to_hbm [thread:$0]  %s6760_s17, 2048, %s6806_s6, [#allocation5], %s5543_s26, %s5543_s26, %s5544_s27   ;;  %v3650_v14 = vmul.f32 %v3648_v52, %v3647_v51  ;;  %v3649_v33 = vmul.f32 %v3648_v52, %v3646_v1 }
 0xfed   :  { %v3636_v42 = vadd.f32 %v3634_v37, %v3628_v58  ;;  %v3635_v27 = vadd.f32 %v3633_v45, %v3627_v4  ;;  %v3656_v40 = vstv %s6758_s18  ;;  %s5545_s30 = smov [#allocation9]  }
 0xfee   :  { %v3658_v55 = vmul.f32 %v3656_v40, %v3655_v60  ;;  %s3680_s8 = sshll.u32 %s5545_s30, 4  ;;  %v3657_v56 = vmul.f32 %v3656_v40, %v3654_v43  ;;  %s3681_s8 = int_to_ptr.vmem [resolvable:$true] %s3680_s8 }
 0xfef   :  { %v3644_v46 = vadd.f32 %v3642_v59, %v3636_v42  ;;  %v3643_v49 = vadd.f32 %v3641_v11, %v3635_v27  ;;  %s5507_s6 = scalar_lea.vmem %s3681_s8, 256  ;;  %p5512_p8 = scmp.lt.s32.totalorder %s3681_s8, %s3681_s8 }
 0xff0   :  { %p5508_p7 = scmp.ne.s32.totalorder %s3681_s8, %s5507_s6  ;;  %p5513_p9 = scmp.lt.s32.totalorder %s5507_s6, %s5507_s6 }
 0xff1   :  { %v3652_v54 = vadd.f32 %v3650_v14, %v3644_v46  ;;  %v3651_v15 = vadd.f32 %v3649_v33, %v3643_v49 }
 0xff2   :  { %p5514_p10 = por %p5513_p9, %p5512_p8 }
 0xff3   :  { %v3660_v0 = vadd.f32 %v3658_v55, %v3652_v54  ;;  %v3659_v61 = vadd.f32 %v3657_v56, %v3651_v15 }
 0xff4   :  { %p5515_p11 = pnand %p5514_p10, %p5508_p7 }
 0xff5   :  { %3662 = vst [vmem:[#allocation9 + $0x8] sm:$0xff] %v3660_v0  ;;  %3661 = vst [vmem:[#allocation9] sm:$0xff] %v3659_v61 }
 0xff6   :  { %5518 = shalt.err (!%p5515_p11)
}
 0xff7   :  { %s5519_s1 = scalar_lea.hbm %s6807_s7, 256 }
 0xff8   :  { %p5520_p12 = scmp.ne.s32.totalorder %s6807_s7, %s5519_s1  ;;  %p5523_p13 = scmp.lt.u32.totalorder %s5519_s1, %s6807_s7 }
 0xffa   :  { %p5525_p0 = pnand %p5523_p13, %p5520_p12 }
 0xffc   :  { %5528 = shalt.err (!%p5525_p0)
}
 0xffd   :  { %3686 = dma.vmem_to_hbm [thread:$0]  %s3681_s8, 256, %s6807_s7, [#allocation10], %s5543_s26, %s5543_s26, %s5544_s27  }
 0xffe   :  { %5533 = dma.done.wait [#allocation5], 2048  }
 0xfff   :  { %5534 = vsyncadd [#allocation5], 4294965248 }
0x1000   :  { %5535 = dma.done.wait [#allocation10], 256  }
0x1001   :  { %5536 = vsyncadd [#allocation10], 4294967040 }
0x1002   :  { %3693 = vsyncpa [#allocation4], 1 }
0x1003   :  { %3694 = vsyncpa [#allocation5], 1 }
0x1004   :  { %3695 = vsyncpa [#allocation10], 1 }
0x1005   :  { %3696 = vsyncpa [#allocation6], 1 }

</bundles_post_ra>
